<compile_context>
chip_gen: v7x
topology: tpu7x:2x2x1
jax: 0.10.0
libtpu: 0.0.40
codegen_flags: <defaults>
</compile_context>

<pallas_src>
import functools
import math

import jax
import jax.numpy as jnp
from jax.experimental import pallas as pl
from jax.experimental.pallas import tpu as pltpu


def _round_up(v, m):
    return (v + m - 1) // m * m


# ---------------------------------------------------------------------------
# Kernel: one grid step per head (grid = (2,), "parallel").
#   layer 1:  h = relu((x @ W1q) * s1 + b1)
#   layer 2:  z = (h @ W2q) * s2 + b2
#   head 0 -> sigmoid(z)  (adjacency),  head 1 -> tanh(z)  (coordinates)
# ---------------------------------------------------------------------------
def decoder_mlp_kernel(x_ref, w1_ref, s1_ref, b1_ref, w2_ref, s2_ref, b2_ref,
                       out_ref):
    is_adj = pl.program_id(0) == 0          # top-level only (no control flow)

    x = x_ref[...]                                            # (B, K) bf16
    w1 = w1_ref[...].astype(jnp.bfloat16)                     # int8 -> bf16 (exact)
    h = jnp.dot(x, w1, preferred_element_type=jnp.float32)    # (B, H_pad) f32
    h = jnp.maximum(h * s1_ref[...] + b1_ref[...], 0.0)       # dequant + bias + ReLU

    w2 = w2_ref[...].astype(jnp.bfloat16)                     # int8 -> bf16 (exact)
    z = jnp.dot(h.astype(jnp.bfloat16), w2,
                preferred_element_type=jnp.float32)           # (B, OUT_PAD) f32
    z = z * s2_ref[...] + b2_ref[...]

    out_ref[...] = jnp.where(is_adj, jax.nn.sigmoid(z), jnp.tanh(z))


# ---------------------------------------------------------------------------
# Wrapper
# ---------------------------------------------------------------------------
def decoder_mlp_forward(x, fused, max_n_nodes):
    """x: (B, bottleneck) f32.  fused: stacked/padded int8+scale params.
    Returns (adj (B, N, N), coord (B, N, 2))."""
    B, K = x.shape
    N = max_n_nodes
    w1q, s1, b1, w2q, s2, b2 = fused
    H_pad = w1q.shape[-1]
    OUT_PAD = w2q.shape[-1]

    grid_spec = pltpu.PrefetchScalarGridSpec(
        num_scalar_prefetch=0,
        grid=(2,),
        in_specs=[
            pl.BlockSpec((B, K), lambda h: (0, 0)),                     # x (bf16)
            pl.BlockSpec((None, K, H_pad), lambda h: (h, 0, 0)),        # W1 int8
            pl.BlockSpec((None, 1, H_pad), lambda h: (h, 0, 0)),        # s1
            pl.BlockSpec((None, 1, H_pad), lambda h: (h, 0, 0)),        # b1
            pl.BlockSpec((None, H_pad, OUT_PAD), lambda h: (h, 0, 0)),  # W2 int8
            pl.BlockSpec((None, 1, OUT_PAD), lambda h: (h, 0, 0)),      # s2
            pl.BlockSpec((None, 1, OUT_PAD), lambda h: (h, 0, 0)),      # b2
        ],
        out_specs=pl.BlockSpec((None, B, OUT_PAD), lambda h: (h, 0, 0)),
    )

    out = pl.pallas_call(
        decoder_mlp_kernel,
        out_shape=jax.ShapeDtypeStruct((2, B, OUT_PAD), jnp.float32),
        grid_spec=grid_spec,
        compiler_params=pltpu.CompilerParams(
            dimension_semantics=("parallel",),        # one head per TC on v7x
            vmem_limit_bytes=32 * 1024 * 1024,        # <= v7x's 64 MiB physical
        ),
    )(x.astype(jnp.bfloat16), w1q, s1, b1, w2q, s2, b2)

    # glue: slice padding, reshape, symmetrize (tiny tensors; stays fused in XLA)
    adj = out[0, :, : N * N].reshape(B, N, N)
    adj = (adj + jnp.transpose(adj, (0, 2, 1))) / 2.0
    coord = out[1, :, : N * 2].reshape(B, N, 2)
    return adj, coord


# ---------------------------------------------------------------------------
# Deterministic parameter init (xavier_uniform weights, bias = 0.01)
# ---------------------------------------------------------------------------
def xavier_uniform(key, fan_in, fan_out):
    limit = math.sqrt(6.0 / (fan_in + fan_out))
    # stored as (in, out) so the kernel computes x @ W  (== PyTorch x @ W.T)
    return jax.random.uniform(
        key, (fan_in, fan_out), dtype=jnp.float32, minval=-limit, maxval=limit
    )


def make_params(key, bottleneck, hidden, max_n_nodes):
    N = max_n_nodes
    k1, k2, k3, k4 = jax.random.split(key, 4)
    wa1 = xavier_uniform(k1, bottleneck, hidden)
    ba1 = jnp.full((hidden,), 0.01, jnp.float32)
    wa2 = xavier_uniform(k2, hidden, N * N)
    ba2 = jnp.full((N * N,), 0.01, jnp.float32)
    wc1 = xavier_uniform(k3, bottleneck, hidden)
    bc1 = jnp.full((hidden,), 0.01, jnp.float32)
    wc2 = xavier_uniform(k4, hidden, N * 2)
    bc2 = jnp.full((N * 2,), 0.01, jnp.float32)
    return (wa1, ba1, wa2, ba2, wc1, bc1, wc2, bc2)


def _pad2(w, rows, cols):
    return jnp.zeros((rows, cols), w.dtype).at[: w.shape[0], : w.shape[1]].set(w)


def _quantize_cols(w):
    """Symmetric int8 quantization, one scale per output column."""
    absmax = jnp.max(jnp.abs(w), axis=0, keepdims=True)         # (1, out)
    scale = jnp.maximum(absmax, 1e-30) / 127.0                  # guard all-zero cols
    q = jnp.clip(jnp.round(w / scale), -127.0, 127.0).astype(jnp.int8)
    return q, scale.astype(jnp.float32)


def fuse_params(params, bottleneck, hidden, max_n_nodes):
    """Stack the two heads on a leading axis, zero-pad hidden to 128-multiple
    and outputs to 128 lanes, and store weights as int8 + per-column scales."""
    N = max_n_nodes
    wa1, ba1, wa2, ba2, wc1, bc1, wc2, bc2 = params
    H_pad = _round_up(hidden, 128)                    # 1600 -> 1664 (no chunk waste)
    OUT_PAD = _round_up(max(N * N, N * 2), 128)       # 100 / 20 -> 128

    def head(w1, b1, w2, b2):
        q1, s1 = _quantize_cols(_pad2(w1, bottleneck, H_pad))
        q2, s2 = _quantize_cols(_pad2(w2, H_pad, OUT_PAD))
        b1p = _pad2(b1[None, :], 1, H_pad)
        b2p = _pad2(b2[None, :], 1, OUT_PAD)
        return q1, s1, b1p, q2, s2, b2p

    adj = head(wa1, ba1, wa2, ba2)
    coo = head(wc1, bc1, wc2, bc2)
    return tuple(jnp.stack([a, c]) for a, c in zip(adj, coo))


if __name__ == "__main__":
    MAX_N_NODES = 10        # module default
    BOTTLENECK = 900        # module default
    HIDDEN = 1600           # hardcoded in module
    BATCH = 2

    key = jax.random.PRNGKey(0)
    k_params, k_x = jax.random.split(key)
    params = make_params(k_params, BOTTLENECK, HIDDEN, MAX_N_NODES)
    fused = fuse_params(params, BOTTLENECK, HIDDEN, MAX_N_NODES)
    x = jax.random.normal(k_x, (BATCH, BOTTLENECK), dtype=jnp.float32)

    fwd = jax.jit(functools.partial(decoder_mlp_forward, max_n_nodes=MAX_N_NODES))
    adj, coord = fwd(x, fused)
    jax.block_until_ready((adj, coord))

    # Reference: f32 math on the same dequantized (int8 * scale) weights the
    # kernel streams, so the check isolates kernel numerics (bf16 activations
    # on the MXU) rather than quantization quality.
    w1q, s1, b1p, w2q, s2, b2p = fused
    w1_deq = w1q.astype(jnp.float32) * s1          # (2, K, H_pad)
    w2_deq = w2q.astype(jnp.float32) * s2          # (2, H_pad, OUT_PAD)

    def ref_head(i):
        h = jnp.maximum(x @ w1_deq[i] + b1p[i], 0.0)
        return h @ w2_deq[i] + b2p[i]

    N = MAX_N_NODES
    a_ref = jax.nn.sigmoid(ref_head(0))[:, : N * N].reshape(BATCH, N, N)
    a_ref = (a_ref + jnp.transpose(a_ref, (0, 2, 1))) / 2.0
    c_ref = jnp.tanh(ref_head(1))[:, : N * 2].reshape(BATCH, N, 2)

    assert adj.shape == (BATCH, MAX_N_NODES, MAX_N_NODES)
    assert coord.shape == (BATCH, MAX_N_NODES, 2)
    # Tolerance covers bf16 rounding of x / hidden activations (outputs are
    # bounded by sigmoid/tanh, so absolute tolerance is the right metric).
    assert jnp.allclose(adj, a_ref, atol=3e-2), float(jnp.max(jnp.abs(adj - a_ref)))
    assert jnp.allclose(coord, c_ref, atol=3e-2), float(jnp.max(jnp.abs(coord - c_ref)))

    print("KERNEL_OK")
</pallas_src>

<mosaic_0001>
module attributes {stable_mosaic.version = 11 : i64} {
  func.func @decoder_mlp_kernel(%arg0: i32, %arg1: memref<2x900xbf16, #tpu.memory_space<vmem>>, %arg2: memref<1x900x1664xi8, #tpu.memory_space<vmem>>, %arg3: memref<1x1x1664xf32, #tpu.memory_space<vmem>>, %arg4: memref<1x1x1664xf32, #tpu.memory_space<vmem>>, %arg5: memref<1x1664x128xi8, #tpu.memory_space<vmem>>, %arg6: memref<1x1x128xf32, #tpu.memory_space<vmem>>, %arg7: memref<1x1x128xf32, #tpu.memory_space<vmem>>, %arg8: memref<1x2x128xf32, #tpu.memory_space<vmem>>) attributes {dimension_semantics = [#tpu.dimension_semantics<parallel>], iteration_bounds = array<i64: 2>, scalar_prefetch = 0 : i64, scratch_operands = 0 : i64, tpu.core_type = #tpu.core_type<tc>, window_params = [{pipeline_mode = #tpu.pipeline_mode<synchronous>, transform_indices = @transform_0, window_bounds = array<i64: 2, 900>}, {transform_indices = @transform_1, window_bounds = array<i64: 1, 900, 1664>}, {transform_indices = @transform_2, window_bounds = array<i64: 1, 1, 1664>}, {transform_indices = @transform_3, window_bounds = array<i64: 1, 1, 1664>}, {transform_indices = @transform_4, window_bounds = array<i64: 1, 1664, 128>}, {transform_indices = @transform_5, window_bounds = array<i64: 1, 1, 128>}, {transform_indices = @transform_6, window_bounds = array<i64: 1, 1, 128>}, {transform_indices = @transform_7, window_bounds = array<i64: 1, 2, 128>}]} {
    %c0_i32 = arith.constant 0 : i32
    %0 = arith.cmpi eq, %arg0, %c0_i32 : i32
    %c0 = arith.constant 0 : index
    %c0_0 = arith.constant 0 : index
    %1 = vector.load %arg1[%c0, %c0_0] : memref<2x900xbf16, #tpu.memory_space<vmem>>, vector<2x900xbf16>
    %c0_1 = arith.constant 0 : index
    %c0_2 = arith.constant 0 : index
    %c0_3 = arith.constant 0 : index
    %2 = vector.load %arg2[%c0_1, %c0_2, %c0_3] : memref<1x900x1664xi8, #tpu.memory_space<vmem>>, vector<1x900x1664xi8>
    %3 = vector.shape_cast %2 : vector<1x900x1664xi8> to vector<900x1664xi8>
    %4 = arith.sitofp %3 : vector<900x1664xi8> to vector<900x1664xbf16>
    %cst = arith.constant dense<0.000000e+00> : vector<2x1664xf32>
    %5 = tpu.matmul %1, %4, %cst {dimension_numbers = #tpu.dot_dimension_numbers<[1], [0], [0], [1], [0, 0, 1, 1], [], []>} : vector<2x900xbf16>, vector<900x1664xbf16>, vector<2x1664xf32> -> vector<2x1664xf32>
    %c0_4 = arith.constant 0 : index
    %c0_5 = arith.constant 0 : index
    %c0_6 = arith.constant 0 : index
    %6 = vector.load %arg3[%c0_4, %c0_5, %c0_6] : memref<1x1x1664xf32, #tpu.memory_space<vmem>>, vector<1x1x1664xf32>
    %7 = vector.shape_cast %6 : vector<1x1x1664xf32> to vector<1x1664xf32>
    %8 = vector.broadcast %7 : vector<1x1664xf32> to vector<2x1664xf32>
    %9 = arith.mulf %5, %8 : vector<2x1664xf32>
    %c0_7 = arith.constant 0 : index
    %c0_8 = arith.constant 0 : index
    %c0_9 = arith.constant 0 : index
    %10 = vector.load %arg4[%c0_7, %c0_8, %c0_9] : memref<1x1x1664xf32, #tpu.memory_space<vmem>>, vector<1x1x1664xf32>
    %11 = vector.shape_cast %10 : vector<1x1x1664xf32> to vector<1x1664xf32>
    %12 = vector.broadcast %11 : vector<1x1664xf32> to vector<2x1664xf32>
    %13 = arith.addf %9, %12 : vector<2x1664xf32>
    %cst_10 = arith.constant 0.000000e+00 : f32
    %14 = vector.broadcast %cst_10 : f32 to vector<2x1664xf32>
    %15 = arith.maximumf %13, %14 : vector<2x1664xf32>
    %c0_11 = arith.constant 0 : index
    %c0_12 = arith.constant 0 : index
    %c0_13 = arith.constant 0 : index
    %16 = vector.load %arg5[%c0_11, %c0_12, %c0_13] : memref<1x1664x128xi8, #tpu.memory_space<vmem>>, vector<1x1664x128xi8>
    %17 = vector.shape_cast %16 : vector<1x1664x128xi8> to vector<1664x128xi8>
    %18 = arith.sitofp %17 : vector<1664x128xi8> to vector<1664x128xbf16>
    %19 = arith.truncf %15 : vector<2x1664xf32> to vector<2x1664xbf16>
    %cst_14 = arith.constant dense<0.000000e+00> : vector<2x128xf32>
    %20 = tpu.matmul %19, %18, %cst_14 {dimension_numbers = #tpu.dot_dimension_numbers<[1], [0], [0], [1], [0, 0, 1, 1], [], []>} : vector<2x1664xbf16>, vector<1664x128xbf16>, vector<2x128xf32> -> vector<2x128xf32>
    %c0_15 = arith.constant 0 : index
    %c0_16 = arith.constant 0 : index
    %c0_17 = arith.constant 0 : index
    %21 = vector.load %arg6[%c0_15, %c0_16, %c0_17] : memref<1x1x128xf32, #tpu.memory_space<vmem>>, vector<1x1x128xf32>
    %22 = vector.shape_cast %21 : vector<1x1x128xf32> to vector<1x128xf32>
    %23 = vector.broadcast %22 : vector<1x128xf32> to vector<2x128xf32>
    %24 = arith.mulf %20, %23 : vector<2x128xf32>
    %c0_18 = arith.constant 0 : index
    %c0_19 = arith.constant 0 : index
    %c0_20 = arith.constant 0 : index
    %25 = vector.load %arg7[%c0_18, %c0_19, %c0_20] : memref<1x1x128xf32, #tpu.memory_space<vmem>>, vector<1x1x128xf32>
    %26 = vector.shape_cast %25 : vector<1x1x128xf32> to vector<1x128xf32>
    %27 = vector.broadcast %26 : vector<1x128xf32> to vector<2x128xf32>
    %28 = arith.addf %24, %27 : vector<2x128xf32>
    %29 = arith.negf %28 : vector<2x128xf32>
    %30 = math.exp %29 : vector<2x128xf32>
    %cst_21 = arith.constant 1.000000e+00 : f32
    %31 = vector.broadcast %cst_21 : f32 to vector<2x128xf32>
    %32 = arith.addf %31, %30 : vector<2x128xf32>
    %33 = arith.divf %31, %32 : vector<2x128xf32>
    %34 = math.tanh %28 : vector<2x128xf32>
    %35 = arith.select %0, %33, %34 : vector<2x128xf32>
    %c0_22 = arith.constant 0 : index
    %c0_23 = arith.constant 0 : index
    %c0_24 = arith.constant 0 : index
    %36 = vector.load %arg8[%c0_22, %c0_23, %c0_24] : memref<1x2x128xf32, #tpu.memory_space<vmem>>, vector<1x2x128xf32>
    %37 = vector.shape_cast %36 : vector<1x2x128xf32> to vector<2x128xf32>
    %38 = vector.shape_cast %35 : vector<2x128xf32> to vector<1x2x128xf32>
    tpu.vector_store %arg8[%c0_22, %c0_23, %c0_24], %38 {strides = array<i32>} : memref<1x2x128xf32, #tpu.memory_space<vmem>>, vector<1x2x128xf32>,
    return
  }
  func.func @transform_0(%arg0: i32) -> (i32, i32) {
    %c0_i32 = arith.constant 0 : i32
    %c0_i32_0 = arith.constant 0 : i32
    %c0_i32_1 = arith.constant 0 : i32
    return %c0_i32, %c0_i32_0 : i32, i32
  }
  func.func @transform_1(%arg0: i32) -> (i32, i32, i32) {
    %c0_i32 = arith.constant 0 : i32
    %c0_i32_0 = arith.constant 0 : i32
    %c0_i32_1 = arith.constant 0 : i32
    return %arg0, %c0_i32, %c0_i32_0 : i32, i32, i32
  }
  func.func @transform_2(%arg0: i32) -> (i32, i32, i32) {
    %c0_i32 = arith.constant 0 : i32
    %c0_i32_0 = arith.constant 0 : i32
    %c0_i32_1 = arith.constant 0 : i32
    return %arg0, %c0_i32, %c0_i32_0 : i32, i32, i32
  }
  func.func @transform_3(%arg0: i32) -> (i32, i32, i32) {
    %c0_i32 = arith.constant 0 : i32
    %c0_i32_0 = arith.constant 0 : i32
    %c0_i32_1 = arith.constant 0 : i32
    return %arg0, %c0_i32, %c0_i32_0 : i32, i32, i32
  }
  func.func @transform_4(%arg0: i32) -> (i32, i32, i32) {
    %c0_i32 = arith.constant 0 : i32
    %c0_i32_0 = arith.constant 0 : i32
    %c0_i32_1 = arith.constant 0 : i32
    return %arg0, %c0_i32, %c0_i32_0 : i32, i32, i32
  }
  func.func @transform_5(%arg0: i32) -> (i32, i32, i32) {
    %c0_i32 = arith.constant 0 : i32
    %c0_i32_0 = arith.constant 0 : i32
    %c0_i32_1 = arith.constant 0 : i32
    return %arg0, %c0_i32, %c0_i32_0 : i32, i32, i32
  }
  func.func @transform_6(%arg0: i32) -> (i32, i32, i32) {
    %c0_i32 = arith.constant 0 : i32
    %c0_i32_0 = arith.constant 0 : i32
    %c0_i32_1 = arith.constant 0 : i32
    return %arg0, %c0_i32, %c0_i32_0 : i32, i32, i32
  }
  func.func @transform_7(%arg0: i32) -> (i32, i32, i32) {
    %c0_i32 = arith.constant 0 : i32
    %c0_i32_0 = arith.constant 0 : i32
    %c0_i32_1 = arith.constant 0 : i32
    return %arg0, %c0_i32, %c0_i32_0 : i32, i32, i32
  }
}

</mosaic_0001>

<bundles_post_ra>
// kernel: squeeze.3
= control target key start
LH: loop header
LB: loop body
LE: loop exit
PB: predicated region body
PF: predicated region fallthrough
CT: control target
= control target key end

     0   :  { %s82_s8 = smov 122   ;;  %vm7_vm0 = vcmask 15360   ;;  %s83_s11 = smov 124   ;;  %s143_s0 = inlined_call_operand.vmem [shape: f32[1,2,20], index: 0, kind: input, shape index: {}]   ;;  %s144_s1 = inlined_call_operand.vmem [shape: f32[2,10,2], index: 1, kind: output, shape index: {}]  }
   0x1   :  { %v4_v0 = vld [vmem:[%s143_s0] sm:$0x3]  ;;  %s81_s0 = smov 126   ;;  %s84_s12 = smov 120  }
   0x2   :  { %5 = vst [vmem:[#allocation0] sm:$0x3] %v4_v0  ;;  %s85_s13 = smov 118   ;;  %s86_s14 = smov 116  }
   0x3   :  { %s87_s15 = smov 114   ;;  %s88_s16 = smov 112  }
   0x4   :  { %s89_s17 = smov 110  }
   0x9   :  { %v9_v1 = vld [vmem:[#allocation0] sm:$0x3]  }
   0xa   :  { %v21_v2 = vld [vmem:[#allocation0] sm:$0x3]   ;;  %10 = vrot.lane.b32.xlu0 %v9_v1, %s81_s0 }
   0xb   :  { %22 = vrot.lane.b32.xlu1 %v21_v2, %s82_s8  ;;  %v15_v3 = vld [vmem:[#allocation0] sm:$0x3]  }
   0xc   :  { %v27_v4 = vld [vmem:[#allocation0] sm:$0x3]  }
   0xd   :  { %v6_v5 = vld [vmem:[#allocation0] sm:$0x3]  }
   0xe   :  { %8 = vst.msk [vmem:[%s144_s1] ss:$16 sm:$0x3] %vm7_vm0, %v6_v5   ;;  %16 = vrot.lane.b32.xlu0 %v15_v3, %s83_s11  ;;  %v33_v6 = vld [vmem:[#allocation0] sm:$0x3]  }
   0xf   :  { %28 = vrot.lane.b32.xlu1 %v27_v4, %s84_s12  ;;  %v39_v7 = vld [vmem:[#allocation0] sm:$0x3]  }
  0x10   :  { %v45_v8 = vld [vmem:[#allocation0] sm:$0x3]  }
  0x11   :  { %v51_v9 = vld [vmem:[#allocation0] sm:$0x3]  }
  0x12   :  { %34 = vrot.lane.b32.xlu0 %v33_v6, %s85_s13  ;;  %v57_v10 = vld [vmem:[#allocation0] sm:$0x3]  }
  0x13   :  { %40 = vrot.lane.b32.xlu1 %v39_v7, %s86_s14 }
  0x16   :  { %46 = vrot.lane.b32.xlu0 %v45_v8, %s87_s15 }
  0x17   :  { %52 = vrot.lane.b32.xlu1 %v51_v9, %s88_s16 }
  0x1a   :  { %58 = vrot.lane.b32.xlu0 %v57_v10, %s89_s17 }
  0x7c   :  { %v11_v11 = vpop.permute.xlu0 %10  }
  0x7d   :  { %v23_v12 = vpop.permute.xlu1 %22   ;;  %63 = vst.msk [vmem:[%s144_s1 + $0x1] ss:$16 sm:$0x3] %vm7_vm0, %v11_v11  }
  0x7e   :  { %65 = vst.msk [vmem:[%s144_s1 + $0x3] ss:$16 sm:$0x3] %vm7_vm0, %v23_v12  }
  0x80   :  { %v17_v13 = vpop.permute.xlu0 %16  }
  0x81   :  { %v29_v14 = vpop.permute.xlu1 %28   ;;  %64 = vst.msk [vmem:[%s144_s1 + $0x2] ss:$16 sm:$0x3] %vm7_vm0, %v17_v13  }
  0x82   :  { %66 = vst.msk [vmem:[%s144_s1 + $0x4] ss:$16 sm:$0x3] %vm7_vm0, %v29_v14  }
  0x84   :  { %v35_v15 = vpop.permute.xlu0 %34  }
  0x85   :  { %v41_v16 = vpop.permute.xlu1 %40   ;;  %67 = vst.msk [vmem:[%s144_s1 + $0x5] ss:$16 sm:$0x3] %vm7_vm0, %v35_v15  }
  0x86   :  { %68 = vst.msk [vmem:[%s144_s1 + $0x6] ss:$16 sm:$0x3] %vm7_vm0, %v41_v16  }
  0x88   :  { %v47_v17 = vpop.permute.xlu0 %46  }
  0x89   :  { %v53_v18 = vpop.permute.xlu1 %52   ;;  %69 = vst.msk [vmem:[%s144_s1 + $0x7] ss:$16 sm:$0x3] %vm7_vm0, %v47_v17  }
  0x8a   :  { %70 = vst.msk [vmem:[%s144_s1 + $0x8] ss:$16 sm:$0x3] %vm7_vm0, %v53_v18  }
  0x8c   :  { %v59_v19 = vpop.permute.xlu0 %58  }
  0x8d   :  { %71 = vst.msk [vmem:[%s144_s1 + $0x9] ss:$16 sm:$0x3] %vm7_vm0, %v59_v19  }

// kernel: squeeze.2
= control target key start
LH: loop header
LB: loop body
LE: loop exit
PB: predicated region body
PF: predicated region fallthrough
CT: control target
= control target key end

     0   :  { %s82_s8 = smov 98   ;;  %vm7_vm0 = vcmask 80896   ;;  %s83_s11 = smov 108   ;;  %s143_s0 = inlined_call_operand.vmem [shape: f32[1,2,100], index: 0, kind: input, shape index: {}]   ;;  %s144_s1 = inlined_call_operand.vmem [shape: f32[2,10,10], index: 1, kind: output, shape index: {}]  }
   0x1   :  { %v4_v0 = vld [vmem:[%s143_s0] sm:$0x3]  ;;  %s81_s0 = smov 118   ;;  %s84_s12 = smov 88  }
   0x2   :  { %5 = vst [vmem:[#allocation0] sm:$0x3] %v4_v0  ;;  %s85_s13 = smov 78   ;;  %s86_s14 = smov 68  }
   0x3   :  { %s87_s15 = smov 58   ;;  %s88_s16 = smov 48  }
   0x4   :  { %s89_s17 = smov 38  }
   0x9   :  { %v9_v1 = vld [vmem:[#allocation0] sm:$0x3]  }
   0xa   :  { %v21_v2 = vld [vmem:[#allocation0] sm:$0x3]   ;;  %10 = vrot.lane.b32.xlu0 %v9_v1, %s81_s0 }
   0xb   :  { %22 = vrot.lane.b32.xlu1 %v21_v2, %s82_s8  ;;  %v15_v3 = vld [vmem:[#allocation0] sm:$0x3]  }
   0xc   :  { %v27_v4 = vld [vmem:[#allocation0] sm:$0x3]  }
   0xd   :  { %v6_v5 = vld [vmem:[#allocation0] sm:$0x3]  }
   0xe   :  { %8 = vst.msk [vmem:[%s144_s1] ss:$16 sm:$0x3] %vm7_vm0, %v6_v5   ;;  %16 = vrot.lane.b32.xlu0 %v15_v3, %s83_s11  ;;  %v33_v6 = vld [vmem:[#allocation0] sm:$0x3]  }
   0xf   :  { %28 = vrot.lane.b32.xlu1 %v27_v4, %s84_s12  ;;  %v39_v7 = vld [vmem:[#allocation0] sm:$0x3]  }
  0x10   :  { %v45_v8 = vld [vmem:[#allocation0] sm:$0x3]  }
  0x11   :  { %v51_v9 = vld [vmem:[#allocation0] sm:$0x3]  }
  0x12   :  { %34 = vrot.lane.b32.xlu0 %v33_v6, %s85_s13  ;;  %v57_v10 = vld [vmem:[#allocation0] sm:$0x3]  }
  0x13   :  { %40 = vrot.lane.b32.xlu1 %v39_v7, %s86_s14 }
  0x16   :  { %46 = vrot.lane.b32.xlu0 %v45_v8, %s87_s15 }
  0x17   :  { %52 = vrot.lane.b32.xlu1 %v51_v9, %s88_s16 }
  0x1a   :  { %58 = vrot.lane.b32.xlu0 %v57_v10, %s89_s17 }
  0x7c   :  { %v11_v11 = vpop.permute.xlu0 %10  }
  0x7d   :  { %v23_v12 = vpop.permute.xlu1 %22   ;;  %63 = vst.msk [vmem:[%s144_s1 + $0x1] ss:$16 sm:$0x3] %vm7_vm0, %v11_v11  }
  0x7e   :  { %65 = vst.msk [vmem:[%s144_s1 + $0x3] ss:$16 sm:$0x3] %vm7_vm0, %v23_v12  }
  0x80   :  { %v17_v13 = vpop.permute.xlu0 %16  }
  0x81   :  { %v29_v14 = vpop.permute.xlu1 %28   ;;  %64 = vst.msk [vmem:[%s144_s1 + $0x2] ss:$16 sm:$0x3] %vm7_vm0, %v17_v13  }
  0x82   :  { %66 = vst.msk [vmem:[%s144_s1 + $0x4] ss:$16 sm:$0x3] %vm7_vm0, %v29_v14  }
  0x84   :  { %v35_v15 = vpop.permute.xlu0 %34  }
  0x85   :  { %v41_v16 = vpop.permute.xlu1 %40   ;;  %67 = vst.msk [vmem:[%s144_s1 + $0x5] ss:$16 sm:$0x3] %vm7_vm0, %v35_v15  }
  0x86   :  { %68 = vst.msk [vmem:[%s144_s1 + $0x6] ss:$16 sm:$0x3] %vm7_vm0, %v41_v16  }
  0x88   :  { %v47_v17 = vpop.permute.xlu0 %46  }
  0x89   :  { %v53_v18 = vpop.permute.xlu1 %52   ;;  %69 = vst.msk [vmem:[%s144_s1 + $0x7] ss:$16 sm:$0x3] %vm7_vm0, %v47_v17  }
  0x8a   :  { %70 = vst.msk [vmem:[%s144_s1 + $0x8] ss:$16 sm:$0x3] %vm7_vm0, %v53_v18  }
  0x8c   :  { %v59_v19 = vpop.permute.xlu0 %58  }
  0x8d   :  { %71 = vst.msk [vmem:[%s144_s1 + $0x9] ss:$16 sm:$0x3] %vm7_vm0, %v59_v19  }

// kernel: decoder_mlp_forward.1
= control target key start
LH: loop header
LB: loop body
LE: loop exit
PB: predicated region body
PF: predicated region fallthrough
CT: control target
= control target key end

     0   :  { %s10014_s0 = inlined_call_operand.vmem [shape: bf16[2,900], index: 0, kind: input, shape index: {}]   ;;  %s10015_s1 = inlined_call_operand.hbm [shape: s8[2,900,1664], index: 1, kind: input, shape index: {}]   ;;  %s10016_s2 = inlined_call_operand.hbm [shape: f32[2,1,1664], index: 2, kind: input, shape index: {}]   ;;  %s10017_s3 = inlined_call_operand.hbm [shape: f32[2,1,1664], index: 3, kind: input, shape index: {}]   ;;  %s10018_s4 = inlined_call_operand.hbm [shape: s8[2,1664,128], index: 4, kind: input, shape index: {}]   ;;  %s10019_s5 = inlined_call_operand.hbm [shape: f32[2,1,128], index: 5, kind: input, shape index: {}]   ;;  %s10020_s6 = inlined_call_operand.hbm [shape: f32[2,1,128], index: 6, kind: input, shape index: {}]   ;;  %s10021_s7 = inlined_call_operand.vmem [shape: f32[2,2,128], index: 7, kind: output, shape index: {}]  }
   0x1   :  { %10028 = sst [smem:[#allocation17_spill]] %s10016_s2 }
   0x2   :  { %10029 = sst [smem:[#allocation18_spill]] %s10018_s4 }
   0x3   :  { %12 = vsyncpa [#allocation3], 0 }
   0x4   :  { %14 = vsyncpa [#allocation3 + $0x1], 0 }
   0x5   :  { %15 = vsyncpa [#allocation5], 0 }
   0x6   :  { %17 = vsyncpa [#allocation5 + $0x1], 0 }
   0x7   :  { %18 = vsyncpa [#allocation8], 0 }
   0x8   :  { %20 = vsyncpa [#allocation8 + $0x1], 0 }
   0x9   :  { %21 = vsyncpa [#allocation11], 0 }
   0xa   :  { %23 = vsyncpa [#allocation11 + $0x1], 0  ;;  %s8958_s24 = smov 0   ;;  %s8960_s25 = smov 0  }
   0xb   :  { %s8962_s26 = smov 0   ;;  %s8964_s27 = smov 0  }
   0xc LB: > { %s8977_s28 = sadd.s32 4294967295, %s8902_s27   ;;  %s8980_s29 = sadd.s32 1, %s8902_s27   ;;  %s8902_s27 = sphi %s8964_s27, %s10050_s27   ;;  %s8898_s26 = sphi %s8962_s26, %s10049_s26   ;;  %s8894_s25 = sphi %s8960_s25, %s10048_s25   ;;  %s8890_s24 = sphi %s8958_s24, %s10047_s24  }
   0xd   : > { %s54_s30 = ssub.s32 %s8902_s27, %s8980_s29  ;;  %s57_s8 = sadd.s32 1, %s8898_s26 }
   0xe   : > { %p55_p0 = scmp.eq.s32.totalorder %s54_s30, 0  ;;  %p64_p1 = scmp.ne.s32.totalorder %s8898_s26, %s8894_s25 }
   0xf   : > { %p65_p2 = scmp.eq.s32.totalorder %s8902_s27, 0  ;;  %p70_p3 = scmp.ne.s32.totalorder %s8894_s25, %s8890_s24 }
  0x10   : > { %s8990_s9 = scalar_select %p55_p0, %s8898_s26, %s57_s8  }
  0x11   : > { %p66_p4 = por %p65_p2, %p64_p1  ;;  %p10022_p5 = scmp.eq.s32.totalorder %s8977_s28, 0 }
  0x12   : > { %10030 = sst [smem:[#allocation16_spill]] %s8990_s9  ;;  %p8628_p6 = scmp.lt.s32.totalorder %s8902_s27, 2 }
  0x13   : > { %p8996_p7 = por %p10022_p5, %p70_p3  ;;  %s9001_s11 = sand.u32 1, %s8898_s26  }
  0x14   : > { %p9003_p8 = pnand %p8628_p6, %p66_p4  ;;  %s274_s13 = sand.u32 1, %s8902_s27  }
  0x15   : > { %s10031_s10 = scalar_select %p8996_p7, 1, 0 }
  0x16   : > { %s10032_s12 = scalar_select %p9003_p8, 1, 0 }
  0x17   : > { %s10024_s14 = smul.u32 13, %s9001_s11  ;;  %s10033_s2 = sld [smem:[#allocation17_spill]] }
  0x18   : > { %s10025_s15 = smul.u32 208, %s8902_s27  ;;  %s9024_s21 = scalar_lea.sflag [#allocation5], %s274_s13 }
  0x19   : > { %s278_s19 = scalar_lea.vmem [#allocation4], %s10024_s14  ;;  %p9030_p11 = pneg %p9003_p8 }
  0x1a   : > { %s286_s20 = sshll.u32 %s278_s19, 4  ;;  %s9019_s20 = int_to_ptr.vmem [resolvable:$true] %s286_s20 }
  0x1d   : > { %s9015_s18 = scalar_lea.hbm %s10033_s2, %s10025_s15  ;;  %s8681_s8 = scalar_lea.hbm %s10033_s2, 416 }
  0x1e   : > { %s8676_s22 = scalar_lea.hbm %s9015_s18, 208  ;;  %p8682_p0 = scmp.lt.u32.totalorder %s9015_s18, %s10033_s2 }
  0x1f   : > { %p8677_p10 = scmp.ne.s32.totalorder %s9015_s18, %s8676_s22  ;;  %p8683_p1 = scmp.lt.u32.totalorder %s8681_s8, %s8676_s22 }
  0x20   : > { %p8685_p3 = scmp.lt.u32.totalorder %s8676_s22, %s9015_s18 }
  0x21   : > { %p8679_p12 = pnand %p9030_p11, %p8677_p10  ;;  %p8684_p2 = por %p8683_p1, %p8682_p0 }
  0x23   : > { %p8680_p13 = pneg %p8679_p12  ;;  %p8686_p4 = por %p8685_p3, %p8684_p2 }
  0x25   : > { %p8687_p6 = pnand %p8686_p4, %p8680_p13 }
  0x27   : > { %8690 = shalt.err (!%p8687_p6)
}
  0x28   : > { %s8691_s19 = scalar_lea.vmem %s9019_s20, 208  ;;  %s8904_s24 = smov [#allocation4]  }
  0x29   : > { %p8692_p10 = scmp.ne.s32.totalorder %s9019_s20, %s8691_s19  ;;  %s8696_s30 = sshll.u32 %s8904_s24, 4  ;;  %s8697_s30 = int_to_ptr.vmem [resolvable:$false] %s8696_s30 }
  0x2a   : > { %s8698_s16 = scalar_lea.vmem %s8697_s30, 416  ;;  %p8699_p9 = scmp.lt.s32.totalorder %s9019_s20, %s8697_s30 }
  0x2b   : > { %p8694_p12 = pnand %p8692_p10, %p9030_p11  ;;  %p8700_p7 = scmp.lt.s32.totalorder %s8698_s16, %s8691_s19 }
  0x2d   : > { %p8695_p5 = pneg %p8694_p12  ;;  %p8701_p0 = por %p8700_p7, %p8699_p9 }
  0x2f   : > { %p8702_p1 = pnand %p8701_p0, %p8695_p5 }
  0x31   : > { %8705 = shalt.err (!%p8702_p1)
}
  0x32   : > { %8615 = dma.hbm_to_vmem [thread:$0]  (!%p9003_p8), %s9015_s18, 208, %s9019_s20, %s9024_s21  }
  0x33   : > { %p365_p13 = scmp.lt.s32.totalorder %s8902_s27, 3  ;;  %s8592_s22 = smul.u32 416, %s9001_s11 }
  0x34   : > { %s8593_s8 = smul.u32 6656, %s8902_s27  ;;  %p10035_p2 = scmp.ge.s32.totalorder %s8902_s27, 1 }
  0x35   : > { %s10037_s4 = sld [smem:[#allocation18_spill]]  ;;  %s316_s16 = scalar_lea.vmem [#allocation7], %s8592_s22 }
  0x36   : > { %p9059_p3 = pnand %p10035_p2, %p365_p13  ;;  %s323_s14 = sshll.u32 %s316_s16, 4  ;;  %s9068_s14 = int_to_ptr.vmem [resolvable:$true] %s323_s14 }
  0x37   : > { %s9072_s18 = scalar_lea.sflag [#allocation8], %s274_s13 }
  0x38   : > { %s10036_s17 = scalar_select %p9059_p3, 1, 0 }
  0x3b   : > { %s9066_s30 = scalar_lea.hbm %s10037_s4, %s8593_s8  ;;  %s8711_s8 = scalar_lea.hbm %s10037_s4, 13312 }
  0x3c   : > { %s8706_s20 = scalar_lea.hbm %s9066_s30, 6656  ;;  %p8712_p4 = scmp.lt.u32.totalorder %s9066_s30, %s10037_s4 }
  0x3d   : > { %p8707_p5 = scmp.ne.s32.totalorder %s9066_s30, %s8706_s20  ;;  %p8713_p6 = scmp.lt.u32.totalorder %s8711_s8, %s8706_s20 }
  0x3e   : > { %p8715_p12 = scmp.lt.u32.totalorder %s8706_s20, %s9066_s30 }
  0x3f   : > { %p8709_p7 = pnand %p8707_p5, %p9030_p11  ;;  %p8714_p10 = por %p8713_p6, %p8712_p4 }
  0x41   : > { %p8710_p9 = pneg %p8709_p7  ;;  %p8716_p0 = por %p8715_p12, %p8714_p10 }
  0x43   : > { %p8717_p1 = pnand %p8716_p0, %p8710_p9 }
  0x45   : > { %8720 = shalt.err (!%p8717_p1)
}
  0x46   : > { %s8721_s13 = scalar_lea.vmem %s9068_s14, 6656  ;;  %s8905_s15 = smov [#allocation7]  }
  0x47   : > { %p8722_p13 = scmp.ne.s32.totalorder %s9068_s14, %s8721_s13  ;;  %s8726_s22 = sshll.u32 %s8905_s15, 4  ;;  %s8727_s22 = int_to_ptr.vmem [resolvable:$false] %s8726_s22 }
  0x48   : > { %s8728_s2 = scalar_lea.vmem %s8727_s22, 13312  ;;  %p8729_p7 = scmp.lt.s32.totalorder %s9068_s14, %s8727_s22 }
  0x49   : > { %p8724_p2 = pnand %p8722_p13, %p9030_p11  ;;  %p8730_p3 = scmp.lt.s32.totalorder %s8728_s2, %s8721_s13 }
  0x4b   : > { %p8725_p5 = pneg %p8724_p2  ;;  %p8731_p4 = por %p8730_p3, %p8729_p7 }
  0x4d   : > { %p8732_p6 = pnand %p8731_p4, %p8725_p5 }
  0x4f   : > { %8735 = shalt.err (!%p8732_p6)
}
  0x50   : > { %s8906_s16 = smov 128   ;;  %s8907_s20 = smov 8  }
  0x51   : > { %8621 = dma.hbm_to_vmem [thread:$0]  (!%p9003_p8), %s9066_s30, 6656, %s9068_s14, %s9072_s18, %s8906_s16, %s8906_s16, %s8907_s20  }
  0x52   : > { %s8586_s19 = smul.u32 2938, %s9001_s11  ;;  %s254_s4 = scalar_lea.sflag [#allocation3], %s9001_s11 }
  0x53   : > { %s8587_s8 = smul.u32 47008, %s8902_s27  ;;  %s8741_s16 = scalar_lea.hbm %s10015_s1, 94016 }
  0x54   : > { %s257_s22 = scalar_lea.vmem [#allocation2], %s8586_s19 }
  0x55   : > { %s9101_s13 = scalar_lea.hbm %s10015_s1, %s8587_s8  ;;  %s264_s2 = sshll.u32 %s257_s22, 4  ;;  %s9103_s2 = int_to_ptr.vmem [resolvable:$true] %s264_s2 }
  0x56   : > { %s8736_s9 = scalar_lea.hbm %s9101_s13, 47008  ;;  %p8742_p12 = scmp.lt.u32.totalorder %s9101_s13, %s10015_s1 }
  0x57   : > { %p8737_p3 = scmp.ne.s32.totalorder %s9101_s13, %s8736_s9  ;;  %p8743_p0 = scmp.lt.u32.totalorder %s8741_s16, %s8736_s9 }
  0x58   : > { %p8745_p13 = scmp.lt.u32.totalorder %s8736_s9, %s9101_s13 }
  0x59   : > { %p8739_p9 = pnand %p8737_p3, %p9030_p11  ;;  %p8744_p1 = por %p8743_p0, %p8742_p12 }
  0x5b   : > { %p8740_p10 = pneg %p8739_p9  ;;  %p8746_p2 = por %p8745_p13, %p8744_p1 }
  0x5d   : > { %p8747_p5 = pnand %p8746_p2, %p8740_p10 }
  0x5f   : > { %8750 = shalt.err (!%p8747_p5)
}
  0x60   : > { %s8751_s19 = scalar_lea.vmem %s9103_s2, 47008  ;;  %s8908_s24 = smov [#allocation2]  }
  0x61   : > { %p8752_p7 = scmp.ne.s32.totalorder %s9103_s2, %s8751_s19  ;;  %s8756_s15 = sshll.u32 %s8908_s24, 4  ;;  %s8757_s15 = int_to_ptr.vmem [resolvable:$false] %s8756_s15 }
  0x62   : > { %s8758_s22 = scalar_lea.vmem %s8757_s15, 94016  ;;  %p8759_p3 = scmp.lt.s32.totalorder %s9103_s2, %s8757_s15 }
  0x63   : > { %p8754_p4 = pnand %p8752_p7, %p9030_p11  ;;  %p8760_p9 = scmp.lt.s32.totalorder %s8758_s22, %s8751_s19 }
  0x65   : > { %p8755_p6 = pneg %p8754_p4  ;;  %p8761_p12 = por %p8760_p9, %p8759_p3 }
  0x67   : > { %p8762_p0 = pnand %p8761_p12, %p8755_p6 }
  0x69   : > { %8765 = shalt.err (!%p8762_p0)
}
  0x6a   : > { %s8909_s9 = smov 416   ;;  %s8910_s14 = smov 26  }
  0x6b   : > { %8612 = dma.hbm_to_vmem [thread:$0]  (!%p9003_p8), %s9101_s13, 47008, %s9103_s2, %s254_s4, %s8909_s9, %s8909_s9, %s8910_s14  }
  0x6c   : > { %s10038_s30 = smul.u32 208, %s8902_s27  ;;  %s8771_s2 = scalar_lea.hbm %s10017_s3, 416 }
  0x6d   : > { %s10039_s19 = smul.u32 13, %s9001_s11 }
  0x6e   : > { %s9134_s8 = scalar_lea.hbm %s10017_s3, %s10038_s30 }
  0x6f   : > { %s297_s24 = scalar_lea.vmem [#allocation6], %s10039_s19  ;;  %s8766_s22 = scalar_lea.hbm %s9134_s8, 208 }
  0x70   : > { %s305_s15 = sshll.u32 %s297_s24, 4  ;;  %p8767_p10 = scmp.ne.s32.totalorder %s9134_s8, %s8766_s22  ;;  %s306_s15 = int_to_ptr.vmem [resolvable:$true] %s305_s15 }
  0x71   : > { %p8772_p2 = scmp.lt.u32.totalorder %s9134_s8, %s10017_s3  ;;  %p8773_p5 = scmp.lt.u32.totalorder %s8771_s2, %s8766_s22 }
  0x72   : > { %p8769_p1 = pnand %p8767_p10, %p9030_p11  ;;  %p8775_p4 = scmp.lt.u32.totalorder %s8766_s22, %s9134_s8 }
  0x73   : > { %p8774_p7 = por %p8773_p5, %p8772_p2 }
  0x74   : > { %p8770_p13 = pneg %p8769_p1 }
  0x75   : > { %p8776_p6 = por %p8775_p4, %p8774_p7 }
  0x77   : > { %p8777_p3 = pnand %p8776_p6, %p8770_p13 }
  0x79   : > { %8780 = shalt.err (!%p8777_p3)
}
  0x7a   : > { %s8781_s30 = scalar_lea.vmem %s306_s15, 208  ;;  %s8911_s16 = smov [#allocation6]  }
  0x7b   : > { %p8782_p9 = scmp.ne.s32.totalorder %s306_s15, %s8781_s30  ;;  %s8786_s20 = sshll.u32 %s8911_s16, 4  ;;  %s8787_s20 = int_to_ptr.vmem [resolvable:$false] %s8786_s20 }
  0x7c   : > { %s8788_s19 = scalar_lea.vmem %s8787_s20, 416  ;;  %p8789_p10 = scmp.lt.s32.totalorder %s306_s15, %s8787_s20 }
  0x7d   : > { %p8784_p12 = pnand %p8782_p9, %p9030_p11  ;;  %p8790_p1 = scmp.lt.s32.totalorder %s8788_s19, %s8781_s30 }
  0x7f   : > { %p8785_p0 = pneg %p8784_p12  ;;  %p8791_p8 = por %p8790_p1, %p8789_p10 }
  0x81   : > { %p8792_p2 = pnand %p8791_p8, %p8785_p0 }
  0x83   : > { %8795 = shalt.err (!%p8792_p2)
}
  0x84   : > { %p10040_p5 = scmp.ne.s32.totalorder %s10032_s12, 0  ;;  %s7524_s24 = sshll.u32 %s8902_s27, 4 }
  0x85   : > { %s336_s22 = scalar_lea.vmem [#allocation9], %s9001_s11  ;;  %s341_s9 = scalar_lea.hbm %s10019_s5, %s7524_s24 }
  0x86   : > { %8618 = dma.hbm_to_vmem [thread:$0]  (!%p10040_p5), %s9134_s8, 208, %s306_s15, %s9024_s21  }
  0x87   : > { %s343_s4 = sshll.u32 %s336_s22, 4  ;;  %s8796_s14 = scalar_lea.hbm %s341_s9, 16  ;;  %s344_s4 = int_to_ptr.vmem [resolvable:$true] %s343_s4 }
  0x88   : > { %p8797_p8 = scmp.ne.s32.totalorder %s341_s9, %s8796_s14  ;;  %s8801_s20 = scalar_lea.hbm %s10019_s5, 32 }
  0x89   : > { %p8802_p4 = scmp.lt.u32.totalorder %s341_s9, %s10019_s5  ;;  %p8803_p6 = scmp.lt.u32.totalorder %s8801_s20, %s8796_s14 }
  0x8a   : > { %p8799_p13 = pnand %p8797_p8, %p9030_p11  ;;  %p8805_p9 = scmp.lt.u32.totalorder %s8796_s14, %s341_s9 }
  0x8b   : > { %p8804_p3 = por %p8803_p6, %p8802_p4 }
  0x8c   : > { %p8800_p7 = pneg %p8799_p13 }
  0x8d   : > { %p8806_p12 = por %p8805_p9, %p8804_p3 }
  0x8f   : > { %p8807_p0 = pnand %p8806_p12, %p8800_p7 }
  0x91   : > { %8810 = shalt.err (!%p8807_p0)
}
  0x92   : > { %s8811_s8 = scalar_lea.vmem %s344_s4, 16  ;;  %s8912_s15 = smov [#allocation9]  }
  0x93   : > { %p8812_p10 = scmp.ne.s32.totalorder %s344_s4, %s8811_s8  ;;  %s8816_s22 = sshll.u32 %s8912_s15, 4  ;;  %s8817_s22 = int_to_ptr.vmem [resolvable:$false] %s8816_s22 }
  0x94   : > { %s8818_s13 = scalar_lea.vmem %s8817_s22, 32  ;;  %p8819_p8 = scmp.lt.s32.totalorder %s344_s4, %s8817_s22 }
  0x95   : > { %p8814_p1 = pnand %p8812_p10, %p9030_p11  ;;  %p8820_p13 = scmp.lt.s32.totalorder %s8818_s13, %s8811_s8 }
  0x97   : > { %p8815_p2 = pneg %p8814_p1  ;;  %p8821_p5 = por %p8820_p13, %p8819_p8 }
  0x99   : > { %p8822_p4 = pnand %p8821_p5, %p8815_p2 }
  0x9b   : > { %8825 = shalt.err (!%p8822_p4)
}
  0x9c   : > { %p10041_p6 = scmp.ne.s32.totalorder %s10032_s12, 0  ;;  %s9181_s30 = scalar_lea.hbm %s10020_s6, %s7524_s24 }
  0x9d   : > { %s353_s16 = scalar_lea.vmem [#allocation10], %s9001_s11  ;;  %s351_s19 = scalar_lea.sflag [#allocation11], %s9001_s11 }
  0x9e   : > { %8624 = dma.hbm_to_vmem [thread:$0]  (!%p10041_p6), %s341_s9, 16, %s344_s4, %s9072_s18  }
  0x9f   : > { %s360_s20 = sshll.u32 %s353_s16, 4  ;;  %s8826_s21 = scalar_lea.hbm %s9181_s30, 16  ;;  %s361_s20 = int_to_ptr.vmem [resolvable:$true] %s360_s20 }
  0xa0   : > { %p8827_p5 = scmp.ne.s32.totalorder %s9181_s30, %s8826_s21  ;;  %s8831_s4 = scalar_lea.hbm %s10020_s6, 32 }
  0xa1   : > { %p8832_p9 = scmp.lt.u32.totalorder %s9181_s30, %s10020_s6  ;;  %p8833_p12 = scmp.lt.u32.totalorder %s8831_s4, %s8826_s21 }
  0xa2   : > { %p8829_p7 = pnand %p8827_p5, %p9030_p11  ;;  %p8835_p10 = scmp.lt.u32.totalorder %s8826_s21, %s9181_s30 }
  0xa3   : > { %p8834_p0 = por %p8833_p12, %p8832_p9 }
  0xa4   : > { %p8830_p3 = pneg %p8829_p7 }
  0xa5   : > { %p8836_p1 = por %p8835_p10, %p8834_p0 }
  0xa7   : > { %p8837_p2 = pnand %p8836_p1, %p8830_p3 }
  0xa9   : > { %8840 = shalt.err (!%p8837_p2)
}
  0xaa   : > { %s8841_s11 = scalar_lea.vmem %s361_s20, 16  ;;  %s8913_s8 = smov [#allocation10]  }
  0xab   : > { %p8842_p8 = scmp.ne.s32.totalorder %s361_s20, %s8841_s11  ;;  %s8846_s15 = sshll.u32 %s8913_s8, 4  ;;  %s8847_s15 = int_to_ptr.vmem [resolvable:$false] %s8846_s15 }
  0xac   : > { %s8848_s22 = scalar_lea.vmem %s8847_s15, 32  ;;  %p8849_p5 = scmp.lt.s32.totalorder %s361_s20, %s8847_s15 }
  0xad   : > { %p8844_p13 = pnand %p8842_p8, %p9030_p11  ;;  %p8850_p7 = scmp.lt.s32.totalorder %s8848_s22, %s8841_s11 }
  0xaf   : > { %p8845_p4 = pneg %p8844_p13  ;;  %p8851_p6 = por %p8850_p7, %p8849_p5 }
  0xb1   : > { %p8852_p9 = pnand %p8851_p6, %p8845_p4 }
  0xb3   : > { %8855 = shalt.err (!%p8852_p9)
}
  0xb4   : > { %p10042_p12 = scmp.ne.s32.totalorder %s10032_s12, 0  ;;  %p10043_p3 = scmp.ne.s32.totalorder %s10036_s17, 0 }
  0xb5   : > { %s9205_s23 = sand.u32 (!%p10043_p3), 1, %s8894_s25   ;;  %p10044_p11 = scmp.ne.s32.totalorder (!%p10043_p3), %s10031_s10, 0 }
  0xb6   : > { %8627 = dma.hbm_to_vmem [thread:$0]  (!%p10042_p12), %s9181_s30, 16, %s361_s20, %s351_s19  }
  0xb7   : > { %369 = sbr.rel (%p10043_p3) target bundleno = 1429 (0x595), region = 48  ;;  %s372_s2 = scalar_lea.sflag (!%p10043_p3), [#allocation3], %s9205_s23 }
  0xb8   : > { %s8594_s13 = smul.u32 (!%p10043_p3), 2938, %s9205_s23 }
  0xba   : > { %s9209_s14 = scalar_lea.vmem (!%p10043_p3), [#allocation2], %s8594_s13 }
  0xbe   : > { %8873 = dma.done.wait (%p10044_p11), %s372_s2, 47008  }
  0xbf   : > { %8875 = vsyncadd (%p10044_p11), %s372_s2, 4294920288  ;;  %s380_s12 = sand.u32 1, %s8977_s28   ;;  %s8595_s17 = smul.u32 13, %s9205_s23 }
  0xc0   : > { %s381_s30 = scalar_lea.sflag [#allocation5], %s380_s12 }
  0xc1   : > { %s9217_s16 = scalar_lea.vmem [#allocation4], %s8595_s17 }
  0xc2   : > { %8877 = dma.done.wait (%p10044_p11), %s381_s30, 416  }
  0xc3   : > { %8879 = vsyncadd (%p10044_p11), %s381_s30, 4294966880  ;;  %s8596_s20 = smul.u32 416, %s9205_s23  ;;  %s9224_s19 = scalar_lea.vmem [#allocation6], %s8595_s17 }
  0xc4   : > { %s399_s21 = scalar_lea.sflag [#allocation8], %s380_s12 }
  0xc5   : > { %s9226_s18 = scalar_lea.vmem [#allocation7], %s8596_s20 }
  0xc6   : > { %8881 = dma.done.wait (%p10044_p11), %s399_s21, 6672  }
  0xc7   : > { %8883 = vsyncadd (%p10044_p11), %s399_s21, 4294960624  ;;  %s410_s27 = scalar_lea.vmem [#allocation9], %s9205_s23  ;;  %s416_s4 = scalar_lea.sflag [#allocation11], %s9205_s23 }
  0xc8   : > { %s418_s9 = scalar_lea.vmem [#allocation10], %s9205_s23 }
  0xc9   : > { %8885 = dma.done.wait (%p10044_p11), %s416_s4, 16  }
  0xca   : > { %8887 = vsyncadd (%p10044_p11), %s416_s4, 4294967280  ;;  %v478_v0 = vld [vmem:[%s9209_s14] sm:$0xff]  ;;  %v486_v2 = vld [vmem:[%s9209_s14 + $0x34] sm:$0xff]  ;;  %vm5507_vm0 = vcmask 31744   ;;  %vm5511_vm1 = vcmask 1041408   ;;  %vm8917_vm2 = vmmov 0  }
  0xcb   : > { %v482_v1 = vld [vmem:[%s9209_s14 + $0x1a] sm:$0xff]  ;;  %v930_v3 = vunpack.c.l.s8.bf16 %v478_v0  ;;  %v931_v5 = vunpack.c.h.s8.bf16 %v478_v0  ;;  %v490_v7 = vld [vmem:[%s9209_s14 + $0x4e] sm:$0xff]  ;;  %v944_v8 = vunpack.c.l.s8.bf16 %v486_v2  ;;  %v945_v10 = vunpack.c.h.s8.bf16 %v486_v2  ;;  %v498_v13 = vld [vmem:[%s9209_s14 + $0x82] sm:$0xff]  ;;  %p471_p6 = scmp.lt.s32.totalorder %s8977_s28, 1  ;;  %p10045_p0 = scmp.eq.s32.totalorder %s8977_s28, 0 }
  0xcc   : > { %v937_v4 = vunpack.c.l.s8.bf16 %v482_v1  ;;  %v938_v6 = vunpack.c.h.s8.bf16 %v482_v1  ;;  %v951_v9 = vunpack.c.l.s8.bf16 %v490_v7  ;;  %v952_v11 = vunpack.c.h.s8.bf16 %v490_v7  ;;  %v494_v12 = vld [vmem:[%s9209_s14 + $0x68] sm:$0xff]  ;;  %v502_v18 = vld [vmem:[%s9209_s14 + $0x9c] sm:$0xff]  ;;  %v510_v34 = vld [vmem:[%s9209_s14 + $0xd0] sm:$0xff] }
  0xcd   : > { %v506_v19 = vld [vmem:[%s9209_s14 + $0xb6] sm:$0xff]  ;;  %v958_v22 = vunpack.c.l.s8.bf16 %v494_v12  ;;  %v965_v23 = vunpack.c.l.s8.bf16 %v498_v13  ;;  %v959_v24 = vunpack.c.h.s8.bf16 %v494_v12  ;;  %v966_v25 = vunpack.c.h.s8.bf16 %v498_v13  ;;  %v514_v35 = vld [vmem:[%s9209_s14 + $0xea] sm:$0xff]  ;;  %v522_v45 = vld [vmem:[%s9209_s14 + $0x11e] sm:$0xff]  ;;  %s7344_s11 = scalar_select %p10045_p0, 1, 0 }
  0xce   : > { %v7529_v14 = vcombine.high %v930_v3, %v937_v4  ;;  %v7531_v15 = vcombine.high %v931_v5, %v938_v6  ;;  %v7528_v16 = vcombine.low %v930_v3, %v937_v4  ;;  %v7530_v17 = vcombine.low %v931_v5, %v938_v6  ;;  %v518_v44 = vld [vmem:[%s9209_s14 + $0x104] sm:$0xff]  ;;  %v526_v54 = vld [vmem:[%s9209_s14 + $0x138] sm:$0xff]  ;;  %v534_v0 = vld [vmem:[%s9209_s14 + $0x16c] sm:$0xff]  ;;  %s10052_s28 = smov (!%p471_p6, %s8977_s28), 1 }
  0xcf   : > { %v7542_v20 = vcombine.high %v944_v8, %v951_v9  ;;  %v7544_v21 = vcombine.high %v945_v10, %v952_v11  ;;  %v7541_v26 = vcombine.low %v944_v8, %v951_v9  ;;  %v7543_v27 = vcombine.low %v945_v10, %v952_v11  ;;  %v530_v55 = vld [vmem:[%s9209_s14 + $0x152] sm:$0xff]  ;;  %v538_v1 = vld [vmem:[%s9209_s14 + $0x186] sm:$0xff]  ;;  %s7527_s8 = sshll.u32 %s10052_s28, 1 }
  0xd0   : > { %5551 = vmatprep.subr.bf16.mxu0 %v7529_v14  ;;  %5715 = vmatprep.subr.bf16.mxu1 %v7531_v15  ;;  %v972_v28 = vunpack.c.l.s8.bf16 %v502_v18  ;;  %v979_v29 = vunpack.c.l.s8.bf16 %v506_v19  ;;  %v7555_v30 = vcombine.high %v958_v22, %v965_v23  ;;  %v7557_v31 = vcombine.high %v959_v24, %v966_v25  ;;  %v542_v13 = vld [vmem:[%s9209_s14 + $0x1a0] sm:$0xff]  ;;  %s474_s23 = scalar_lea.vmem %s10021_s7, %s7527_s8 }
  0xd1   : > { %5552 = vmatpush1.bf16.msra.mxu0 %v7528_v16  ;;  %5716 = vmatpush1.bf16.msra.mxu1 %v7530_v17  ;;  %v973_v32 = vunpack.c.h.s8.bf16 %v502_v18  ;;  %v980_v33 = vunpack.c.h.s8.bf16 %v506_v19  ;;  %v7554_v36 = vcombine.low %v958_v22, %v965_v23  ;;  %v7556_v37 = vcombine.low %v959_v24, %v966_v25  ;;  %v546_v14 = vld [vmem:[%s9209_s14 + $0x1ba] sm:$0xff] }
  0xd2   : > { %5553 = vmatprep.subr.bf16.mxu0 %v7542_v20  ;;  %5717 = vmatprep.subr.bf16.mxu1 %v7544_v21  ;;  %v7568_v38 = vcombine.high %v972_v28, %v979_v29  ;;  %v986_v39 = vunpack.c.l.s8.bf16 %v510_v34  ;;  %v993_v41 = vunpack.c.l.s8.bf16 %v514_v35  ;;  %v987_v42 = vunpack.c.h.s8.bf16 %v510_v34  ;;  %v550_v25 = vld [vmem:[%s9209_s14 + $0x1d4] sm:$0xff]  ;;  %v9267_v34 = vld [vmem:[%s10014_s0] sm:$0xff] }
  0xd3   : > { %v7570_v40 = vcombine.high %v973_v32, %v980_v33  ;;  %v994_v43 = vunpack.c.h.s8.bf16 %v514_v35  ;;  %v7567_v46 = vcombine.low %v972_v28, %v979_v29  ;;  %v7569_v47 = vcombine.low %v973_v32, %v980_v33 }
  0xd4   : > { %v1000_v48 = vunpack.c.l.s8.bf16 %v518_v44  ;;  %v1007_v49 = vunpack.c.l.s8.bf16 %v522_v45  ;;  %v7581_v50 = vcombine.high %v986_v39, %v993_v41  ;;  %v1001_v52 = vunpack.c.h.s8.bf16 %v518_v44 }
  0xd5   : > { %5554 = vmatpush1.bf16.msra.mxu0 %v7541_v26  ;;  %5718 = vmatpush1.bf16.msra.mxu1 %v7543_v27  ;;  %v7583_v51 = vcombine.high %v987_v42, %v994_v43  ;;  %v1008_v53 = vunpack.c.h.s8.bf16 %v522_v45  ;;  %v7580_v56 = vcombine.low %v986_v39, %v993_v41  ;;  %v7582_v57 = vcombine.low %v987_v42, %v994_v43  ;;  %v554_v26 = vld [vmem:[%s9209_s14 + $0x1ee] sm:$0xff] }
  0xd6   : > { %5555 = vmatprep.subr.bf16.mxu0 %v7555_v30  ;;  %5719 = vmatprep.subr.bf16.mxu1 %v7557_v31  ;;  %v7594_v58 = vcombine.high %v1000_v48, %v1007_v49  ;;  %v1014_v59 = vunpack.c.l.s8.bf16 %v526_v54  ;;  %v1021_v61 = vunpack.c.l.s8.bf16 %v530_v55  ;;  %v1015_v62 = vunpack.c.h.s8.bf16 %v526_v54 }
  0xd7   : > { %v7596_v60 = vcombine.high %v1001_v52, %v1008_v53  ;;  %v1022_v63 = vunpack.c.h.s8.bf16 %v530_v55  ;;  %v8914_v2 = vmov 1966171168   ;;  %v1726_v4 = vlaneseq }
  0xd8   : > { %v1724_v3 = vunpack.c.l.s4 %v8914_v2  ;;  %v7593_v5 = vcombine.low %v1000_v48, %v1007_v49  ;;  %v7595_v6 = vcombine.low %v1001_v52, %v1008_v53  ;;  %v1028_v7 = vunpack.c.l.s8.bf16 %v534_v0  ;;  %v566_v48 = vld [vmem:[%s9209_s14 + $0x23c] sm:$0xff] }
  0xd9   : > { %5556 = vmatpush1.bf16.msra.mxu0 %v7554_v36  ;;  %5720 = vmatpush1.bf16.msra.mxu1 %v7556_v37  ;;  %v1035_v8 = vunpack.c.l.s8.bf16 %v538_v1  ;;  %v7607_v9 = vcombine.high %v1014_v59, %v1021_v61  ;;  %v7609_v10 = vcombine.high %v1015_v62, %v1022_v63  ;;  %v1029_v11 = vunpack.c.h.s8.bf16 %v534_v0  ;;  %v558_v37 = vld [vmem:[%s9209_s14 + $0x208] sm:$0xff]  ;;  %v570_v49 = vld [vmem:[%s9209_s14 + $0x256] sm:$0xff] }
  0xda   : > { %5557 = vmatprep.subr.bf16.mxu0 %v7568_v38  ;;  %5721 = vmatprep.subr.bf16.mxu1 %v7570_v40  ;;  %v1036_v12 = vunpack.c.h.s8.bf16 %v538_v1  ;;  %v1725_v15 = vunpack.c.0.s8 %v1724_v3  ;;  %v9257_v16 = vshrl.u32 %v1726_v4, 7  ;;  %v7606_v17 = vcombine.low %v1014_v59, %v1021_v61  ;;  %v562_v38 = vld [vmem:[%s9209_s14 + $0x222] sm:$0xff]  ;;  %v578_v61 = vld [vmem:[%s9209_s14 + $0x28a] sm:$0xff] }
  0xdb   : > { %v7608_v18 = vcombine.low %v1015_v62, %v1022_v63  ;;  %v7620_v19 = vcombine.high %v1028_v7, %v1035_v8  ;;  %v1042_v20 = vunpack.c.l.s8.bf16 %v542_v13  ;;  %v1049_v22 = vunpack.c.l.s8.bf16 %v546_v14 }
  0xdc   : > { %v7622_v21 = vcombine.high %v1029_v11, %v1036_v12  ;;  %v1043_v23 = vunpack.c.h.s8.bf16 %v542_v13  ;;  %v1050_v24 = vunpack.c.h.s8.bf16 %v546_v14  ;;  %v7619_v27 = vcombine.low %v1028_v7, %v1035_v8  ;;  %v586_v7 = vld [vmem:[%s9209_s14 + $0x2be] sm:$0xff] }
  0xdd   : > { %5558 = vmatpush1.bf16.msra.mxu0 %v7567_v46  ;;  %5722 = vmatpush1.bf16.msra.mxu1 %v7569_v47  ;;  %v7621_v28 = vcombine.low %v1029_v11, %v1036_v12  ;;  %v9262_v29 = vsub.s32 %v1725_v15, %v9257_v16  ;;  %v1056_v30 = vunpack.c.l.s8.bf16 %v550_v25  ;;  %v1063_v31 = vunpack.c.l.s8.bf16 %v554_v26 }
  0xde   : > { %5559 = vmatprep.subr.bf16.mxu0 %v7581_v50  ;;  %5723 = vmatprep.subr.bf16.mxu1 %v7583_v51  ;;  %v1057_v32 = vunpack.c.h.s8.bf16 %v550_v25  ;;  %v1064_v33 = vunpack.c.h.s8.bf16 %v554_v26  ;;  %v7633_v35 = vcombine.high %v1042_v20, %v1049_v22  ;;  %v7635_v36 = vcombine.high %v1043_v23, %v1050_v24 }
  0xdf   : > { %v7632_v39 = vcombine.low %v1042_v20, %v1049_v22  ;;  %v9273_v40 = vrot.slane %v9267_v34, %v9262_v29  ;;  %v7634_v41 = vcombine.low %v1043_v23, %v1050_v24  ;;  %v7646_v42 = vcombine.high %v1056_v30, %v1063_v31 }
  0xe0   : > { %v7648_v43 = vcombine.high %v1057_v32, %v1064_v33  ;;  %v1070_v44 = vunpack.c.l.s8.bf16 %v558_v37  ;;  %v1077_v45 = vunpack.c.l.s8.bf16 %v562_v38  ;;  %v1071_v46 = vunpack.c.h.s8.bf16 %v558_v37 }
  0xe1   : > { %5560 = vmatpush1.bf16.msra.mxu0 %v7580_v56  ;;  %5724 = vmatpush1.bf16.msra.mxu1 %v7582_v57  ;;  %v1078_v47 = vunpack.c.h.s8.bf16 %v562_v38  ;;  %v1737_v50 = vcombine.high %v9273_v40, %v9273_v40  ;;  %v7645_v52 = vcombine.low %v1056_v30, %v1063_v31  ;;  %v7647_v53 = vcombine.low %v1057_v32, %v1064_v33 }
  0xe2   : > { %5561 = vmatprep.subr.bf16.mxu0 %v7594_v58  ;;  %5725 = vmatprep.subr.bf16.mxu1 %v7596_v60  ;;  %v1084_v54 = vunpack.c.l.s8.bf16 %v566_v48  ;;  %v1091_v55 = vunpack.c.l.s8.bf16 %v570_v49  ;;  %v7659_v56 = vcombine.high %v1070_v44, %v1077_v45  ;;  %v1085_v58 = vunpack.c.h.s8.bf16 %v566_v48  ;;  %v574_v60 = vld [vmem:[%s9209_s14 + $0x270] sm:$0xff] }
  0xe3   : > { %v9280_v51 = vrot.slane %v1737_v50, %v9262_v29  ;;  %v7661_v57 = vcombine.high %v1071_v46, %v1078_v47  ;;  %v1092_v59 = vunpack.c.h.s8.bf16 %v570_v49  ;;  %v7658_v62 = vcombine.low %v1070_v44, %v1077_v45  ;;  %v614_v50 = vld [vmem:[%s9209_s14 + $0x374] sm:$0xff] }
  0xe4   : > { %v7660_v63 = vcombine.low %v1071_v46, %v1078_v47  ;;  %v7672_v0 = vcombine.high %v1084_v54, %v1091_v55  ;;  %v1098_v1 = vunpack.c.l.s8.bf16 %v574_v60  ;;  %v1105_v3 = vunpack.c.l.s8.bf16 %v578_v61 }
  0xe5   : > { %5562 = vmatpush1.bf16.msra.mxu0 %v7593_v5  ;;  %5726 = vmatpush1.bf16.msra.mxu1 %v7595_v6  ;;  %v7674_v2 = vcombine.high %v1085_v58, %v1092_v59  ;;  %v1099_v4 = vunpack.c.h.s8.bf16 %v574_v60  ;;  %v1106_v5 = vunpack.c.h.s8.bf16 %v578_v61  ;;  %v582_v6 = vld [vmem:[%s9209_s14 + $0x2a4] sm:$0xff]  ;;  %v7671_v8 = vcombine.low %v1084_v54, %v1091_v55 }
  0xe6   : > { %5563 = vmatprep.subr.bf16.mxu0 %v7607_v9  ;;  %5727 = vmatprep.subr.bf16.mxu1 %v7609_v10  ;;  %v7673_v9 = vcombine.low %v1085_v58, %v1092_v59  ;;  %v1112_v10 = vunpack.c.l.s8.bf16 %v582_v6  ;;  %v1119_v11 = vunpack.c.l.s8.bf16 %v586_v7  ;;  %v7685_v12 = vcombine.high %v1098_v1, %v1105_v3  ;;  %v622_v61 = vld [vmem:[%s9209_s14 + $0x3a8] sm:$0xff] }
  0xe7   : > { %5583 = vmatprep.mubr.bf16.mxu0 %v9280_v51  ;;  %5747 = vmatprep.mubr.bf16.mxu1 %v9280_v51  ;;  %v7687_v13 = vcombine.high %v1099_v4, %v1106_v5  ;;  %v1113_v14 = vunpack.c.h.s8.bf16 %v582_v6  ;;  %v1120_v15 = vunpack.c.h.s8.bf16 %v586_v7  ;;  %v7686_v20 = vcombine.low %v1099_v4, %v1106_v5 }
  0xe8   : > { %v7697_v30 = vcombine.low %v1112_v10, %v1119_v11  ;;  %v1168_v55 = vunpack.c.l.s8.bf16 %v614_v50  ;;  %v1182_v4 = vunpack.c.l.s8.bf16 %v622_v61  ;;  %v1183_v6 = vunpack.c.h.s8.bf16 %v622_v61 }
  0xe9   : > { %5564 = vmatpush1.bf16.msra.mxu0 %v7606_v17  ;;  %5728 = vmatpush1.bf16.msra.mxu1 %v7608_v18  ;;  %v590_v17 = vld [vmem:[%s9209_s14 + $0x2d8] sm:$0xff]  ;;  %v7700_v23 = vcombine.high %v1113_v14, %v1120_v15  ;;  %v7699_v31 = vcombine.low %v1113_v14, %v1120_v15 }
  0xea   : > { %5565 = vmatprep.subr.bf16.mxu0 %v7620_v19  ;;  %5729 = vmatprep.subr.bf16.mxu1 %v7622_v21  ;;  %v594_v18 = vld [vmem:[%s9209_s14 + $0x2f2] sm:$0xff]  ;;  %v7684_v19 = vcombine.low %v1098_v1, %v1105_v3  ;;  %v7698_v21 = vcombine.high %v1112_v10, %v1119_v11  ;;  %v1126_v22 = vunpack.c.l.s8.bf16 %v590_v17  ;;  %v1127_v25 = vunpack.c.h.s8.bf16 %v590_v17 }
  0xeb   : > { %v1133_v24 = vunpack.c.l.s8.bf16 %v594_v18  ;;  %v1134_v26 = vunpack.c.h.s8.bf16 %v594_v18  ;;  %v9306_v10 = vcombine.high %v9280_v51, %v9280_v51 }
  0xed   : > { %5566 = vmatpush1.bf16.msra.mxu0 %v7619_v27  ;;  %5730 = vmatpush1.bf16.msra.mxu1 %v7621_v28  ;;  %v598_v27 = vld [vmem:[%s9209_s14 + $0x30c] sm:$0xff] }
  0xee   : > { %5567 = vmatprep.subr.bf16.mxu0 %v7633_v35  ;;  %5731 = vmatprep.subr.bf16.mxu1 %v7635_v36  ;;  %v602_v28 = vld [vmem:[%s9209_s14 + $0x326] sm:$0xff]  ;;  %v1140_v32 = vunpack.c.l.s8.bf16 %v598_v27  ;;  %v7711_v35 = vcombine.high %v1126_v22, %v1133_v24  ;;  %v7713_v36 = vcombine.high %v1127_v25, %v1134_v26  ;;  %v1141_v37 = vunpack.c.h.s8.bf16 %v598_v27 }
  0xef   : > { %v1147_v33 = vunpack.c.l.s8.bf16 %v602_v28  ;;  %v1148_v38 = vunpack.c.h.s8.bf16 %v602_v28 }
  0xf1   : > { %5568 = vmatpush1.bf16.msra.mxu0 %v7632_v39  ;;  %5732 = vmatpush1.bf16.msra.mxu1 %v7634_v41  ;;  %v606_v39 = vld [vmem:[%s9209_s14 + $0x340] sm:$0xff]  ;;  %v7724_v44 = vcombine.high %v1140_v32, %v1147_v33  ;;  %v7726_v46 = vcombine.high %v1141_v37, %v1148_v38  ;;  %v7725_v54 = vcombine.low %v1141_v37, %v1148_v38 }
  0xf2   : > { %5569 = vmatprep.subr.bf16.mxu0 %v7646_v42  ;;  %5733 = vmatprep.subr.bf16.mxu1 %v7648_v43  ;;  %v610_v41 = vld [vmem:[%s9209_s14 + $0x35a] sm:$0xff]  ;;  %v7710_v42 = vcombine.low %v1126_v22, %v1133_v24  ;;  %v7712_v43 = vcombine.low %v1127_v25, %v1134_v26  ;;  %v1154_v45 = vunpack.c.l.s8.bf16 %v606_v39  ;;  %v1155_v48 = vunpack.c.h.s8.bf16 %v606_v39 }
  0xf3   : > { %v1161_v47 = vunpack.c.l.s8.bf16 %v610_v41  ;;  %v1162_v49 = vunpack.c.h.s8.bf16 %v610_v41 }
  0xf5   : > { %5570 = vmatpush1.bf16.msra.mxu0 %v7645_v52  ;;  %5734 = vmatpush1.bf16.msra.mxu1 %v7647_v53  ;;  %v618_v52 = vld [vmem:[%s9209_s14 + $0x38e] sm:$0xff]  ;;  %v7723_v53 = vcombine.low %v1140_v32, %v1147_v33  ;;  %v7737_v59 = vcombine.high %v1154_v45, %v1161_v47  ;;  %v7739_v60 = vcombine.high %v1155_v48, %v1162_v49 }
  0xf6   : > { %5571 = vmatprep.subr.bf16.mxu0 %v7659_v56  ;;  %5735 = vmatprep.subr.bf16.mxu1 %v7661_v57  ;;  %v1175_v56 = vunpack.c.l.s8.bf16 %v618_v52  ;;  %v1169_v57 = vunpack.c.h.s8.bf16 %v614_v50  ;;  %v1176_v58 = vunpack.c.h.s8.bf16 %v618_v52  ;;  %v7738_v1 = vcombine.low %v1155_v48, %v1162_v49 }
  0xf8   : > { %v7752_v3 = vcombine.high %v1169_v57, %v1176_v58  ;;  %v7751_v11 = vcombine.low %v1169_v57, %v1176_v58 }
  0xf9   : > { %5572 = vmatpush1.bf16.msra.mxu0 %v7658_v62  ;;  %5736 = vmatpush1.bf16.msra.mxu1 %v7660_v63  ;;  %v626_v62 = vld [vmem:[%s9209_s14 + $0x3c2] sm:$0xff]  ;;  %v9300_v63 = vrot.slane %v9273_v40, %v9262_v29  ;;  %v7749_v40 = vcombine.low %v1168_v55, %v1175_v56 }
  0xfa   : > { %5573 = vmatprep.subr.bf16.mxu0 %v7672_v0  ;;  %5737 = vmatprep.subr.bf16.mxu1 %v7674_v2  ;;  %v7736_v0 = vcombine.low %v1154_v45, %v1161_v47  ;;  %v7750_v2 = vcombine.high %v1168_v55, %v1175_v56  ;;  %v1189_v5 = vunpack.c.l.s8.bf16 %v626_v62  ;;  %v1190_v7 = vunpack.c.h.s8.bf16 %v626_v62 }
  0xfc   : > { %v7763_v14 = vcombine.high %v1182_v4, %v1189_v5  ;;  %v7765_v15 = vcombine.high %v1183_v6, %v1190_v7  ;;  %v7764_v22 = vcombine.low %v1183_v6, %v1190_v7 }
  0xfd   : > { %5574 = vmatpush1.bf16.msra.mxu0 %v7671_v8  ;;  %5738 = vmatpush1.bf16.msra.mxu1 %v7673_v9  ;;  %v630_v8 = vld [vmem:[%s9209_s14 + $0x3dc] sm:$0xff] }
  0xfe   : > { %5575 = vmatprep.subr.bf16.mxu0 %v7685_v12  ;;  %5739 = vmatprep.subr.bf16.mxu1 %v7687_v13  ;;  %v634_v9 = vld [vmem:[%s9209_s14 + $0x3f6] sm:$0xff]  ;;  %v1196_v12 = vunpack.c.l.s8.bf16 %v630_v8  ;;  %v1197_v17 = vunpack.c.h.s8.bf16 %v630_v8 }
  0xff   : > { %v1203_v13 = vunpack.c.l.s8.bf16 %v634_v9  ;;  %v1204_v18 = vunpack.c.h.s8.bf16 %v634_v9 }
 0x101   : > { %5576 = vmatpush1.bf16.msra.mxu0 %v7684_v19  ;;  %5740 = vmatpush1.bf16.msra.mxu1 %v7686_v20  ;;  %v638_v19 = vld [vmem:[%s9209_s14 + $0x410] sm:$0xff]  ;;  %v7778_v25 = vcombine.high %v1197_v17, %v1204_v18  ;;  %v7775_v32 = vcombine.low %v1196_v12, %v1203_v13  ;;  %v7777_v33 = vcombine.low %v1197_v17, %v1204_v18 }
 0x102   : > { %5577 = vmatprep.subr.bf16.mxu0 %v7698_v21  ;;  %5741 = vmatprep.subr.bf16.mxu1 %v7700_v23  ;;  %v642_v20 = vld [vmem:[%s9209_s14 + $0x42a] sm:$0xff]  ;;  %v7762_v21 = vcombine.low %v1182_v4, %v1189_v5  ;;  %v7776_v23 = vcombine.high %v1196_v12, %v1203_v13  ;;  %v1210_v24 = vunpack.c.l.s8.bf16 %v638_v19  ;;  %v1211_v27 = vunpack.c.h.s8.bf16 %v638_v19 }
 0x103   : > { %v1217_v26 = vunpack.c.l.s8.bf16 %v642_v20  ;;  %v1218_v28 = vunpack.c.h.s8.bf16 %v642_v20 }
 0x105   : > { %5578 = vmatpush1.bf16.msra.mxu0 %v7697_v30  ;;  %5742 = vmatpush1.bf16.msra.mxu1 %v7699_v31  ;;  %v646_v30 = vld [vmem:[%s9209_s14 + $0x444] sm:$0xff]  ;;  %v7789_v39 = vcombine.high %v1210_v24, %v1217_v26  ;;  %v7791_v41 = vcombine.high %v1211_v27, %v1218_v28  ;;  %v7790_v45 = vcombine.low %v1211_v27, %v1218_v28 }
 0x106   : > { %5579 = vmatprep.subr.bf16.mxu0 %v7711_v35  ;;  %5743 = vmatprep.subr.bf16.mxu1 %v7713_v36  ;;  %v650_v31 = vld [vmem:[%s9209_s14 + $0x45e] sm:$0xff]  ;;  %v1224_v35 = vunpack.c.l.s8.bf16 %v646_v30  ;;  %v1225_v37 = vunpack.c.h.s8.bf16 %v646_v30 }
 0x107   : > { %v1231_v36 = vunpack.c.l.s8.bf16 %v650_v31  ;;  %v1232_v38 = vunpack.c.h.s8.bf16 %v650_v31 }
 0x109   : > { %5580 = vmatpush1.bf16.msra.mxu0 %v7710_v42  ;;  %5744 = vmatpush1.bf16.msra.mxu1 %v7712_v43  ;;  %v654_v42 = vld [vmem:[%s9209_s14 + $0x478] sm:$0xff]  ;;  %v7804_v47 = vcombine.high %v1225_v37, %v1232_v38  ;;  %v7801_v55 = vcombine.low %v1224_v35, %v1231_v36  ;;  %v7803_v56 = vcombine.low %v1225_v37, %v1232_v38 }
 0x10a   : > { %5581 = vmatprep.subr.bf16.mxu0 %v7724_v44  ;;  %5745 = vmatprep.subr.bf16.mxu1 %v7726_v46  ;;  %v658_v43 = vld [vmem:[%s9209_s14 + $0x492] sm:$0xff]  ;;  %v7788_v44 = vcombine.low %v1210_v24, %v1217_v26  ;;  %v7802_v46 = vcombine.high %v1224_v35, %v1231_v36  ;;  %v1238_v48 = vunpack.c.l.s8.bf16 %v654_v42  ;;  %v1239_v50 = vunpack.c.h.s8.bf16 %v654_v42 }
 0x10b   : > { %v1245_v49 = vunpack.c.l.s8.bf16 %v658_v43  ;;  %v1246_v52 = vunpack.c.h.s8.bf16 %v658_v43 }
 0x10d   : > { %5582 = vmatpush1.bf16.msra.mxu0 %v7723_v53  ;;  %5746 = vmatpush1.bf16.msra.mxu1 %v7725_v54  ;;  %v662_v53 = vld [vmem:[%s9209_s14 + $0x4ac] sm:$0xff]  ;;  %v7815_v61 = vcombine.high %v1238_v48, %v1245_v49  ;;  %v7817_v62 = vcombine.high %v1239_v50, %v1246_v52 }
 0x10e   : > { %5592 = vmatprep.subr.bf16.mxu0 %v7737_v59  ;;  %5756 = vmatprep.subr.bf16.mxu1 %v7739_v60  ;;  %v666_v54 = vld [vmem:[%s9209_s14 + $0x4c6] sm:$0xff]  ;;  %v1252_v57 = vunpack.c.l.s8.bf16 %v662_v53  ;;  %v1253_v59 = vunpack.c.h.s8.bf16 %v662_v53 }
 0x10f   : > { %v1259_v58 = vunpack.c.l.s8.bf16 %v666_v54  ;;  %v1260_v60 = vunpack.c.h.s8.bf16 %v666_v54 }
 0x110   : > { %5584 = vmatmul.mubr.bf16.vlgmr.msra.gmra.mrb[0].mxu0 %v9300_v63  ;;  %5748 = vmatmul.mubr.bf16.vlgmr.msra.gmra.mrb[0].mxu1 %v9300_v63 }
 0x111   : > { %5593 = vmatpush1.bf16.msra.mxu0 %v7736_v0  ;;  %5757 = vmatpush1.bf16.msra.mxu1 %v7738_v1  ;;  %v670_v0 = vld [vmem:[%s9209_s14 + $0x4e0] sm:$0xff]  ;;  %v7828_v4 = vcombine.high %v1252_v57, %v1259_v58  ;;  %v7830_v5 = vcombine.high %v1253_v59, %v1260_v60  ;;  %v7827_v12 = vcombine.low %v1252_v57, %v1259_v58 }
 0x112   : > { %5594 = vmatprep.subr.bf16.mxu0 %v7750_v2  ;;  %5758 = vmatprep.subr.bf16.mxu1 %v7752_v3  ;;  %v674_v1 = vld [vmem:[%s9209_s14 + $0x4fa] sm:$0xff]  ;;  %v7814_v2 = vcombine.low %v1238_v48, %v1245_v49  ;;  %v7816_v3 = vcombine.low %v1239_v50, %v1246_v52  ;;  %v1266_v6 = vunpack.c.l.s8.bf16 %v670_v0  ;;  %v1267_v8 = vunpack.c.h.s8.bf16 %v670_v0 }
 0x113   : > { %5624 = vmatprep.mubr.bf16.mxu0 %v9306_v10  ;;  %5788 = vmatprep.mubr.bf16.mxu1 %v9306_v10  ;;  %v1273_v7 = vunpack.c.l.s8.bf16 %v674_v1  ;;  %v1274_v9 = vunpack.c.h.s8.bf16 %v674_v1  ;;  %v7829_v13 = vcombine.low %v1253_v59, %v1260_v60 }
 0x115   : > { %5595 = vmatpush1.bf16.msra.mxu0 %v7749_v40  ;;  %5759 = vmatpush1.bf16.msra.mxu1 %v7751_v11  ;;  %v678_v40 = vld [vmem:[%s9209_s14 + $0x514] sm:$0xff]  ;;  %v7841_v19 = vcombine.high %v1266_v6, %v1273_v7  ;;  %v7843_v20 = vcombine.high %v1267_v8, %v1274_v9  ;;  %v7842_v24 = vcombine.low %v1267_v8, %v1274_v9 }
 0x116   : > { %5596 = vmatprep.subr.bf16.mxu0 %v7763_v14  ;;  %5760 = vmatprep.subr.bf16.mxu1 %v7765_v15  ;;  %v682_v11 = vld [vmem:[%s9209_s14 + $0x52e] sm:$0xff]  ;;  %v1280_v14 = vunpack.c.l.s8.bf16 %v678_v40  ;;  %v1281_v17 = vunpack.c.h.s8.bf16 %v678_v40 }
 0x117   : > { %v1287_v15 = vunpack.c.l.s8.bf16 %v682_v11  ;;  %v1288_v18 = vunpack.c.h.s8.bf16 %v682_v11 }
 0x119   : > { %5597 = vmatpush1.bf16.msra.mxu0 %v7762_v21  ;;  %5761 = vmatpush1.bf16.msra.mxu1 %v7764_v22  ;;  %v686_v21 = vld [vmem:[%s9209_s14 + $0x548] sm:$0xff]  ;;  %v7856_v26 = vcombine.high %v1281_v17, %v1288_v18  ;;  %v7853_v35 = vcombine.low %v1280_v14, %v1287_v15  ;;  %v7855_v36 = vcombine.low %v1281_v17, %v1288_v18 }
 0x11a   : > { %5598 = vmatprep.subr.bf16.mxu0 %v7776_v23  ;;  %5762 = vmatprep.subr.bf16.mxu1 %v7778_v25  ;;  %v690_v22 = vld [vmem:[%s9209_s14 + $0x562] sm:$0xff]  ;;  %v7840_v23 = vcombine.low %v1266_v6, %v1273_v7  ;;  %v7854_v25 = vcombine.high %v1280_v14, %v1287_v15  ;;  %v1294_v27 = vunpack.c.l.s8.bf16 %v686_v21  ;;  %v1295_v30 = vunpack.c.h.s8.bf16 %v686_v21 }
 0x11b   : > { %v1301_v28 = vunpack.c.l.s8.bf16 %v690_v22  ;;  %v1302_v31 = vunpack.c.h.s8.bf16 %v690_v22 }
 0x11d   : > { %5599 = vmatpush1.bf16.msra.mxu0 %v7775_v32  ;;  %5763 = vmatpush1.bf16.msra.mxu1 %v7777_v33  ;;  %v694_v32 = vld [vmem:[%s9209_s14 + $0x57c] sm:$0xff]  ;;  %v7867_v42 = vcombine.high %v1294_v27, %v1301_v28  ;;  %v7869_v43 = vcombine.high %v1295_v30, %v1302_v31 }
 0x11e   : > { %5600 = vmatprep.subr.bf16.mxu0 %v7789_v39  ;;  %5764 = vmatprep.subr.bf16.mxu1 %v7791_v41  ;;  %v698_v33 = vld [vmem:[%s9209_s14 + $0x596] sm:$0xff]  ;;  %v1308_v37 = vunpack.c.l.s8.bf16 %v694_v32  ;;  %v1309_v39 = vunpack.c.h.s8.bf16 %v694_v32 }
 0x11f   : > { %v1315_v38 = vunpack.c.l.s8.bf16 %v698_v33  ;;  %v1316_v41 = vunpack.c.h.s8.bf16 %v698_v33 }
 0x121   : > { %5601 = vmatpush1.bf16.msra.mxu0 %v7788_v44  ;;  %5765 = vmatpush1.bf16.msra.mxu1 %v7790_v45  ;;  %v702_v44 = vld [vmem:[%s9209_s14 + $0x5b0] sm:$0xff]  ;;  %v7880_v48 = vcombine.high %v1308_v37, %v1315_v38  ;;  %v7882_v49 = vcombine.high %v1309_v39, %v1316_v41  ;;  %v7879_v57 = vcombine.low %v1308_v37, %v1315_v38 }
 0x122   : > { %5602 = vmatprep.subr.bf16.mxu0 %v7802_v46  ;;  %5766 = vmatprep.subr.bf16.mxu1 %v7804_v47  ;;  %v706_v45 = vld [vmem:[%s9209_s14 + $0x5ca] sm:$0xff]  ;;  %v7866_v46 = vcombine.low %v1294_v27, %v1301_v28  ;;  %v7868_v47 = vcombine.low %v1295_v30, %v1302_v31  ;;  %v1322_v50 = vunpack.c.l.s8.bf16 %v702_v44  ;;  %v1323_v53 = vunpack.c.h.s8.bf16 %v702_v44 }
 0x123   : > { %v1329_v52 = vunpack.c.l.s8.bf16 %v706_v45  ;;  %v1330_v54 = vunpack.c.h.s8.bf16 %v706_v45  ;;  %v7881_v58 = vcombine.low %v1309_v39, %v1316_v41  ;;  %v746_v37 = vld [vmem:[%s9209_s14 + $0x6ce] sm:$0xff] }
 0x125   : > { %5603 = vmatpush1.bf16.msra.mxu0 %v7801_v55  ;;  %5767 = vmatpush1.bf16.msra.mxu1 %v7803_v56  ;;  %v710_v55 = vld [vmem:[%s9209_s14 + $0x5e4] sm:$0xff]  ;;  %v7893_v0 = vcombine.high %v1322_v50, %v1329_v52  ;;  %v7895_v1 = vcombine.high %v1323_v53, %v1330_v54 }
 0x126   : > { %5604 = vmatprep.subr.bf16.mxu0 %v7815_v61  ;;  %5768 = vmatprep.subr.bf16.mxu1 %v7817_v62  ;;  %v714_v56 = vld [vmem:[%s9209_s14 + $0x5fe] sm:$0xff]  ;;  %v1336_v59 = vunpack.c.l.s8.bf16 %v710_v55  ;;  %v1337_v61 = vunpack.c.h.s8.bf16 %v710_v55 }
 0x127   : > { %v1343_v60 = vunpack.c.l.s8.bf16 %v714_v56  ;;  %v1344_v62 = vunpack.c.h.s8.bf16 %v714_v56 }
 0x129   : > { %5605 = vmatpush1.bf16.msra.mxu0 %v7814_v2  ;;  %5769 = vmatpush1.bf16.msra.mxu1 %v7816_v3  ;;  %v718_v2 = vld [vmem:[%s9209_s14 + $0x618] sm:$0xff]  ;;  %v7906_v6 = vcombine.high %v1336_v59, %v1343_v60  ;;  %v7908_v7 = vcombine.high %v1337_v61, %v1344_v62  ;;  %v7905_v14 = vcombine.low %v1336_v59, %v1343_v60 }
 0x12a   : > { %5606 = vmatprep.subr.bf16.mxu0 %v7828_v4  ;;  %5770 = vmatprep.subr.bf16.mxu1 %v7830_v5  ;;  %v722_v3 = vld [vmem:[%s9209_s14 + $0x632] sm:$0xff]  ;;  %v7892_v4 = vcombine.low %v1322_v50, %v1329_v52  ;;  %v7894_v5 = vcombine.low %v1323_v53, %v1330_v54  ;;  %v1350_v8 = vunpack.c.l.s8.bf16 %v718_v2  ;;  %v1351_v40 = vunpack.c.h.s8.bf16 %v718_v2  ;;  %v758_v60 = vld [vmem:[%s9209_s14 + $0x71c] sm:$0xff] }
 0x12b   : > { %v1357_v9 = vunpack.c.l.s8.bf16 %v722_v3  ;;  %v1358_v11 = vunpack.c.h.s8.bf16 %v722_v3  ;;  %v7907_v15 = vcombine.low %v1337_v61, %v1344_v62  ;;  %v9351_v50 = vcombine.high %v9300_v63, %v9300_v63  ;;  %v762_v61 = vld [vmem:[%s9209_s14 + $0x736] sm:$0xff] }
 0x12c   : > { %v1420_v2 = vunpack.c.l.s8.bf16 %v758_v60  ;;  %v1427_v3 = vunpack.c.l.s8.bf16 %v762_v61 }
 0x12d   : > { %5607 = vmatpush1.bf16.msra.mxu0 %v7827_v12  ;;  %5771 = vmatpush1.bf16.msra.mxu1 %v7829_v13  ;;  %v726_v12 = vld [vmem:[%s9209_s14 + $0x64c] sm:$0xff]  ;;  %v7919_v21 = vcombine.high %v1350_v8, %v1357_v9  ;;  %v7921_v22 = vcombine.high %v1351_v40, %v1358_v11  ;;  %v7920_v27 = vcombine.low %v1351_v40, %v1358_v11 }
 0x12e   : > { %5608 = vmatprep.subr.bf16.mxu0 %v7841_v19  ;;  %5772 = vmatprep.subr.bf16.mxu1 %v7843_v20  ;;  %v730_v13 = vld [vmem:[%s9209_s14 + $0x666] sm:$0xff]  ;;  %v1364_v17 = vunpack.c.l.s8.bf16 %v726_v12  ;;  %v1365_v19 = vunpack.c.h.s8.bf16 %v726_v12  ;;  %v7984_v12 = vcombine.high %v1420_v2, %v1427_v3 }
 0x12f   : > { %v1371_v18 = vunpack.c.l.s8.bf16 %v730_v13  ;;  %v1372_v20 = vunpack.c.h.s8.bf16 %v730_v13 }
 0x131   : > { %5609 = vmatpush1.bf16.msra.mxu0 %v7840_v23  ;;  %5773 = vmatpush1.bf16.msra.mxu1 %v7842_v24  ;;  %v734_v23 = vld [vmem:[%s9209_s14 + $0x680] sm:$0xff]  ;;  %v7932_v28 = vcombine.high %v1364_v17, %v1371_v18  ;;  %v7934_v30 = vcombine.high %v1365_v19, %v1372_v20  ;;  %v7933_v39 = vcombine.low %v1365_v19, %v1372_v20 }
 0x132   : > { %5610 = vmatprep.subr.bf16.mxu0 %v7854_v25  ;;  %5774 = vmatprep.subr.bf16.mxu1 %v7856_v26  ;;  %v738_v24 = vld [vmem:[%s9209_s14 + $0x69a] sm:$0xff]  ;;  %v1722_v25 = vcombine.high %v9267_v34, %v9267_v34  ;;  %v7918_v26 = vcombine.low %v1350_v8, %v1357_v9  ;;  %v1378_v31 = vunpack.c.l.s8.bf16 %v734_v23  ;;  %v1379_v33 = vunpack.c.h.s8.bf16 %v734_v23  ;;  %v766_v8 = vld [vmem:[%s9209_s14 + $0x750] sm:$0xff]  ;;  %v774_v19 = vld [vmem:[%s9209_s14 + $0x784] sm:$0xff] }
 0x133   : > { %v1385_v32 = vunpack.c.l.s8.bf16 %v738_v24  ;;  %v7931_v34 = vcombine.low %v1364_v17, %v1371_v18  ;;  %v770_v9 = vld [vmem:[%s9209_s14 + $0x76a] sm:$0xff]  ;;  %v1435_v17 = vunpack.c.h.s8.bf16 %v766_v8  ;;  %v778_v20 = vld [vmem:[%s9209_s14 + $0x79e] sm:$0xff]  ;;  %v1448_v23 = vunpack.c.l.s8.bf16 %v774_v19 }
 0x134   : > { %v9343_v38 = vrot.slane %v1722_v25, %v9262_v29  ;;  %v1442_v18 = vunpack.c.h.s8.bf16 %v770_v9  ;;  %v1449_v25 = vunpack.c.h.s8.bf16 %v774_v19 }
 0x135   : > { %5611 = vmatpush1.bf16.msra.mxu0 %v7853_v35  ;;  %5775 = vmatpush1.bf16.msra.mxu1 %v7855_v36  ;;  %v1386_v35 = vunpack.c.h.s8.bf16 %v738_v24  ;;  %v742_v36 = vld [vmem:[%s9209_s14 + $0x6b4] sm:$0xff]  ;;  %v7944_v52 = vcombine.low %v1378_v31, %v1385_v32  ;;  %v1455_v24 = vunpack.c.l.s8.bf16 %v778_v20 }
 0x136   : > { %5612 = vmatprep.subr.bf16.mxu0 %v7867_v42  ;;  %5776 = vmatprep.subr.bf16.mxu1 %v7869_v43  ;;  %v1392_v41 = vunpack.c.l.s8.bf16 %v742_v36  ;;  %v1399_v42 = vunpack.c.l.s8.bf16 %v746_v37  ;;  %v7945_v43 = vcombine.high %v1378_v31, %v1385_v32  ;;  %v1393_v45 = vunpack.c.h.s8.bf16 %v742_v36  ;;  %v786_v31 = vld [vmem:[%s9209_s14 + $0x7d2] sm:$0xff] }
 0x137   : > { %v7947_v44 = vcombine.high %v1379_v33, %v1386_v35  ;;  %v7946_v53 = vcombine.low %v1379_v33, %v1386_v35  ;;  %v7998_v33 = vcombine.low %v1435_v17, %v1442_v18  ;;  %v8010_v35 = vcombine.high %v1448_v23, %v1455_v24 }
 0x138   : > { %v7958_v54 = vcombine.high %v1392_v41, %v1399_v42 }
 0x139   : > { %5613 = vmatpush1.bf16.msra.mxu0 %v7866_v46  ;;  %5777 = vmatpush1.bf16.msra.mxu1 %v7868_v47  ;;  %v1400_v46 = vunpack.c.h.s8.bf16 %v746_v37  ;;  %v750_v47 = vld [vmem:[%s9209_s14 + $0x6e8] sm:$0xff] }
 0x13a   : > { %5614 = vmatprep.subr.bf16.mxu0 %v7880_v48  ;;  %5778 = vmatprep.subr.bf16.mxu1 %v7882_v49  ;;  %v754_v48 = vld [vmem:[%s9209_s14 + $0x702] sm:$0xff]  ;;  %v1738_v49 = vcombine.high %v9343_v38, %v9343_v38  ;;  %v1406_v55 = vunpack.c.l.s8.bf16 %v750_v47 }
 0x13b   : > { %v7960_v56 = vcombine.high %v1393_v45, %v1400_v46  ;;  %v1414_v59 = vunpack.c.h.s8.bf16 %v754_v48 }
 0x13c   : > { %v9356_v62 = vrot.slane %v1738_v49, %v9262_v29 }
 0x13d   : > { %5615 = vmatpush1.bf16.msra.mxu0 %v7879_v57  ;;  %5779 = vmatpush1.bf16.msra.mxu1 %v7881_v58  ;;  %v1413_v57 = vunpack.c.l.s8.bf16 %v754_v48  ;;  %v1407_v58 = vunpack.c.h.s8.bf16 %v750_v47 }
 0x13e   : > { %5616 = vmatprep.subr.bf16.mxu0 %v7893_v0  ;;  %5780 = vmatprep.subr.bf16.mxu1 %v7895_v1  ;;  %v7957_v0 = vcombine.low %v1392_v41, %v1399_v42  ;;  %v7959_v1 = vcombine.low %v1393_v45, %v1400_v46  ;;  %v1470_v41 = vunpack.c.h.s8.bf16 %v786_v31  ;;  %v790_v42 = vld [vmem:[%s9209_s14 + $0x7ec] sm:$0xff] }
 0x13f   : > { %v7970_v40 = vcombine.low %v1406_v55, %v1413_v57  ;;  %v7972_v11 = vcombine.low %v1407_v58, %v1414_v59  ;;  %v1476_v46 = vunpack.c.l.s8.bf16 %v790_v42  ;;  %v1477_v48 = vunpack.c.h.s8.bf16 %v790_v42 }
 0x141   : > { %5617 = vmatpush1.bf16.msra.mxu0 %v7892_v4  ;;  %5781 = vmatpush1.bf16.msra.mxu1 %v7894_v5  ;;  %v1421_v4 = vunpack.c.h.s8.bf16 %v758_v60  ;;  %v1428_v5 = vunpack.c.h.s8.bf16 %v762_v61 }
 0x142   : > { %5618 = vmatprep.subr.bf16.mxu0 %v7906_v6  ;;  %5782 = vmatprep.subr.bf16.mxu1 %v7908_v7  ;;  %v7971_v6 = vcombine.high %v1406_v55, %v1413_v57  ;;  %v7973_v7 = vcombine.high %v1407_v58, %v1414_v59  ;;  %v802_v55 = vld [vmem:[%s9209_s14 + $0x83a] sm:$0xff] }
 0x143   : > { %v7986_v13 = vcombine.high %v1421_v4, %v1428_v5  ;;  %v1497_v61 = vunpack.c.l.s8.bf16 %v802_v55 }
 0x145   : > { %5619 = vmatpush1.bf16.msra.mxu0 %v7905_v14  ;;  %5783 = vmatpush1.bf16.msra.mxu1 %v7907_v15  ;;  %v1434_v14 = vunpack.c.l.s8.bf16 %v766_v8  ;;  %v1441_v15 = vunpack.c.l.s8.bf16 %v770_v9 }
 0x146   : > { %5620 = vmatprep.subr.bf16.mxu0 %v7919_v21  ;;  %5784 = vmatprep.subr.bf16.mxu1 %v7921_v22  ;;  %v7983_v21 = vcombine.low %v1420_v2, %v1427_v3  ;;  %v7985_v22 = vcombine.low %v1421_v4, %v1428_v5  ;;  %v806_v2 = vld [vmem:[%s9209_s14 + $0x854] sm:$0xff] }
 0x147   : > { %v7996_v32 = vcombine.low %v1434_v14, %v1441_v15  ;;  %v810_v3 = vld [vmem:[%s9209_s14 + $0x86e] sm:$0xff]  ;;  %v1505_v8 = vunpack.c.h.s8.bf16 %v806_v2 }
 0x148   : > { %v1512_v9 = vunpack.c.h.s8.bf16 %v810_v3 }
 0x149   : > { %5621 = vmatpush1.bf16.msra.mxu0 %v7918_v26  ;;  %5785 = vmatpush1.bf16.msra.mxu1 %v7920_v27  ;;  %v1456_v26 = vunpack.c.h.s8.bf16 %v778_v20  ;;  %v7997_v27 = vcombine.high %v1434_v14, %v1441_v15 }
 0x14a   : > { %5622 = vmatprep.subr.bf16.mxu0 %v7932_v28  ;;  %5786 = vmatprep.subr.bf16.mxu1 %v7934_v30  ;;  %v7999_v28 = vcombine.high %v1435_v17, %v1442_v18  ;;  %v782_v30 = vld [vmem:[%s9209_s14 + $0x7b8] sm:$0xff]  ;;  %v8064_v18 = vcombine.high %v1505_v8, %v1512_v9 }
 0x14b   : > { %v8012_v36 = vcombine.high %v1449_v25, %v1456_v26  ;;  %v1462_v37 = vunpack.c.l.s8.bf16 %v782_v30  ;;  %v8011_v45 = vcombine.low %v1449_v25, %v1456_v26  ;;  %v8063_v26 = vcombine.low %v1505_v8, %v1512_v9 }
 0x14d   : > { %5623 = vmatpush1.bf16.msra.mxu0 %v7931_v34  ;;  %5787 = vmatpush1.bf16.msra.mxu1 %v7933_v39  ;;  %v1469_v34 = vunpack.c.l.s8.bf16 %v786_v31  ;;  %v1463_v39 = vunpack.c.h.s8.bf16 %v782_v30 }
 0x14e   : > { %5633 = vmatprep.subr.bf16.mxu0 %v7945_v43  ;;  %5797 = vmatprep.subr.bf16.mxu1 %v7947_v44  ;;  %v794_v43 = vld [vmem:[%s9209_s14 + $0x806] sm:$0xff]  ;;  %v8009_v44 = vcombine.low %v1448_v23, %v1455_v24  ;;  %v822_v23 = vld [vmem:[%s9209_s14 + $0x8bc] sm:$0xff] }
 0x14f   : > { %v1483_v47 = vunpack.c.l.s8.bf16 %v794_v43  ;;  %v1484_v49 = vunpack.c.h.s8.bf16 %v794_v43  ;;  %v8024_v57 = vcombine.low %v1463_v39, %v1470_v41  ;;  %v826_v24 = vld [vmem:[%s9209_s14 + $0x8d6] sm:$0xff]  ;;  %v1533_v30 = vunpack.c.h.s8.bf16 %v822_v23 }
 0x150   : > { %5625 = vmatmul.mubr.bf16.vlgmr.msra.gmra.mrb[0].mxu0 %v9351_v50  ;;  %5789 = vmatmul.mubr.bf16.vlgmr.msra.gmra.mrb[0].mxu1 %v9351_v50  ;;  %v1540_v31 = vunpack.c.h.s8.bf16 %v826_v24 }
 0x151   : > { %5634 = vmatpush1.bf16.msra.mxu0 %v7944_v52  ;;  %5798 = vmatpush1.bf16.msra.mxu1 %v7946_v53  ;;  %v8023_v52 = vcombine.high %v1462_v37, %v1469_v34  ;;  %v8025_v53 = vcombine.high %v1463_v39, %v1470_v41  ;;  %v8036_v58 = vcombine.high %v1476_v46, %v1483_v47 }
 0x152   : > { %5635 = vmatprep.subr.bf16.mxu0 %v7958_v54  ;;  %5799 = vmatprep.subr.bf16.mxu1 %v7960_v56  ;;  %v798_v54 = vld [vmem:[%s9209_s14 + $0x820] sm:$0xff]  ;;  %v8022_v56 = vcombine.low %v1462_v37, %v1469_v34  ;;  %v8038_v59 = vcombine.high %v1477_v48, %v1484_v49  ;;  %v8035_v4 = vcombine.low %v1476_v46, %v1483_v47 }
 0x153   : > { %5665 = vmatprep.mubr.bf16.mxu0 %v9356_v62  ;;  %5829 = vmatprep.mubr.bf16.mxu1 %v9356_v62  ;;  %v1490_v60 = vunpack.c.l.s8.bf16 %v798_v54  ;;  %v8037_v5 = vcombine.low %v1477_v48, %v1484_v49  ;;  %v8090_v41 = vcombine.high %v1533_v30, %v1540_v31  ;;  %v838_v46 = vld [vmem:[%s9209_s14 + $0x924] sm:$0xff]  ;;  %v8089_v49 = vcombine.low %v1533_v30, %v1540_v31 }
 0x154   : > { %v842_v47 = vld [vmem:[%s9209_s14 + $0x93e] sm:$0xff] }
 0x155   : > { %5636 = vmatpush1.bf16.msra.mxu0 %v7957_v0  ;;  %5800 = vmatpush1.bf16.msra.mxu1 %v7959_v1  ;;  %v1491_v0 = vunpack.c.h.s8.bf16 %v798_v54  ;;  %v1498_v1 = vunpack.c.h.s8.bf16 %v802_v55  ;;  %v8048_v14 = vcombine.low %v1490_v60, %v1497_v61  ;;  %v1561_v54 = vunpack.c.h.s8.bf16 %v838_v46 }
 0x156   : > { %5637 = vmatprep.subr.bf16.mxu0 %v7971_v6  ;;  %5801 = vmatprep.subr.bf16.mxu1 %v7973_v7  ;;  %v1504_v6 = vunpack.c.l.s8.bf16 %v806_v2  ;;  %v1511_v7 = vunpack.c.l.s8.bf16 %v810_v3  ;;  %v1568_v55 = vunpack.c.h.s8.bf16 %v842_v47 }
 0x157   : > { %v8050_v15 = vcombine.low %v1491_v0, %v1498_v1 }
 0x158   : > { %v8062_v17 = vcombine.high %v1504_v6, %v1511_v7  ;;  %v8061_v25 = vcombine.low %v1504_v6, %v1511_v7  ;;  %v854_v6 = vld [vmem:[%s9209_s14 + $0x98c] sm:$0xff]  ;;  %v8115_v9 = vcombine.low %v1561_v54, %v1568_v55 }
 0x159   : > { %5638 = vmatpush1.bf16.msra.mxu0 %v7970_v40  ;;  %5802 = vmatpush1.bf16.msra.mxu1 %v7972_v11  ;;  %v8049_v40 = vcombine.high %v1490_v60, %v1497_v61  ;;  %v8051_v11 = vcombine.high %v1491_v0, %v1498_v1  ;;  %v8116_v1 = vcombine.high %v1561_v54, %v1568_v55  ;;  %v858_v7 = vld [vmem:[%s9209_s14 + $0x9a6] sm:$0xff]  ;;  %v890_v54 = vld [vmem:[%s9209_s14 + $0xa76] sm:$0xff] }
 0x15a   : > { %5639 = vmatprep.subr.bf16.mxu0 %v7984_v12  ;;  %5803 = vmatprep.subr.bf16.mxu1 %v7986_v13  ;;  %v814_v12 = vld [vmem:[%s9209_s14 + $0x888] sm:$0xff]  ;;  %v9400_v55 = vcombine.high %v9356_v62, %v9356_v62 }
 0x15b   : > { %v818_v13 = vld [vmem:[%s9209_s14 + $0x8a2] sm:$0xff]  ;;  %v1518_v19 = vunpack.c.l.s8.bf16 %v814_v12 }
 0x15c   : > { %v1525_v20 = vunpack.c.l.s8.bf16 %v818_v13 }
 0x15d   : > { %5640 = vmatpush1.bf16.msra.mxu0 %v7983_v21  ;;  %5804 = vmatpush1.bf16.msra.mxu1 %v7985_v22  ;;  %v1519_v21 = vunpack.c.h.s8.bf16 %v814_v12  ;;  %v1526_v22 = vunpack.c.h.s8.bf16 %v818_v13  ;;  %v1589_v12 = vunpack.c.h.s8.bf16 %v854_v6  ;;  %v1596_v13 = vunpack.c.h.s8.bf16 %v858_v7 }
 0x15e   : > { %5641 = vmatprep.subr.bf16.mxu0 %v7997_v27  ;;  %5805 = vmatprep.subr.bf16.mxu1 %v7999_v28  ;;  %v1532_v27 = vunpack.c.l.s8.bf16 %v822_v23  ;;  %v1539_v28 = vunpack.c.l.s8.bf16 %v826_v24  ;;  %v8074_v37 = vcombine.low %v1518_v19, %v1525_v20 }
 0x15f   : > { %v8076_v34 = vcombine.low %v1519_v21, %v1526_v22  ;;  %v8141_v31 = vcombine.low %v1589_v12, %v1596_v13 }
 0x160   : > { %v8088_v39 = vcombine.high %v1532_v27, %v1539_v28  ;;  %v8087_v48 = vcombine.low %v1532_v27, %v1539_v28  ;;  %v870_v27 = vld [vmem:[%s9209_s14 + $0x9f4] sm:$0xff] }
 0x161   : > { %5642 = vmatpush1.bf16.msra.mxu0 %v7996_v32  ;;  %5806 = vmatpush1.bf16.msra.mxu1 %v7998_v33  ;;  %v8075_v32 = vcombine.high %v1518_v19, %v1525_v20  ;;  %v8077_v33 = vcombine.high %v1519_v21, %v1526_v22  ;;  %v8142_v22 = vcombine.high %v1589_v12, %v1596_v13  ;;  %v874_v28 = vld [vmem:[%s9209_s14 + $0xa0e] sm:$0xff] }
 0x162   : > { %5643 = vmatprep.subr.bf16.mxu0 %v8010_v35  ;;  %5807 = vmatprep.subr.bf16.mxu1 %v8012_v36  ;;  %v830_v35 = vld [vmem:[%s9209_s14 + $0x8f0] sm:$0xff] }
 0x163   : > { %v834_v36 = vld [vmem:[%s9209_s14 + $0x90a] sm:$0xff]  ;;  %v1546_v42 = vunpack.c.l.s8.bf16 %v830_v35 }
 0x164   : > { %v1553_v43 = vunpack.c.l.s8.bf16 %v834_v36 }
 0x165   : > { %5644 = vmatpush1.bf16.msra.mxu0 %v8009_v44  ;;  %5808 = vmatpush1.bf16.msra.mxu1 %v8011_v45  ;;  %v1547_v44 = vunpack.c.h.s8.bf16 %v830_v35  ;;  %v1554_v45 = vunpack.c.h.s8.bf16 %v834_v36 }
 0x166   : > { %5645 = vmatprep.subr.bf16.mxu0 %v8023_v52  ;;  %5809 = vmatprep.subr.bf16.mxu1 %v8025_v53  ;;  %v1560_v52 = vunpack.c.l.s8.bf16 %v838_v46  ;;  %v1567_v53 = vunpack.c.l.s8.bf16 %v842_v47  ;;  %v8100_v60 = vcombine.low %v1546_v42, %v1553_v43 }
 0x167   : > { %v8102_v61 = vcombine.low %v1547_v44, %v1554_v45 }
 0x168   : > { %v8114_v0 = vcombine.high %v1560_v52, %v1567_v53  ;;  %v8113_v8 = vcombine.low %v1560_v52, %v1567_v53  ;;  %v886_v53 = vld [vmem:[%s9209_s14 + $0xa5c] sm:$0xff] }
 0x169   : > { %5646 = vmatpush1.bf16.msra.mxu0 %v8022_v56  ;;  %5810 = vmatpush1.bf16.msra.mxu1 %v8024_v57  ;;  %v8101_v56 = vcombine.high %v1546_v42, %v1553_v43  ;;  %v8103_v57 = vcombine.high %v1547_v44, %v1554_v45  ;;  %v9394_v42 = vrot.slane %v9343_v38, %v9262_v29 }
 0x16a   : > { %5647 = vmatprep.subr.bf16.mxu0 %v8036_v58  ;;  %5811 = vmatprep.subr.bf16.mxu1 %v8038_v59  ;;  %v846_v58 = vld [vmem:[%s9209_s14 + $0x958] sm:$0xff] }
 0x16b   : > { %v850_v59 = vld [vmem:[%s9209_s14 + $0x972] sm:$0xff]  ;;  %v1574_v2 = vunpack.c.l.s8.bf16 %v846_v58 }
 0x16c   : > { %v1581_v3 = vunpack.c.l.s8.bf16 %v850_v59 }
 0x16d   : > { %5648 = vmatpush1.bf16.msra.mxu0 %v8035_v4  ;;  %5812 = vmatpush1.bf16.msra.mxu1 %v8037_v5  ;;  %v1575_v4 = vunpack.c.h.s8.bf16 %v846_v58  ;;  %v1582_v5 = vunpack.c.h.s8.bf16 %v850_v59  ;;  %v1651_v59 = vunpack.c.l.s8.bf16 %v890_v54 }
 0x16e   : > { %5649 = vmatprep.subr.bf16.mxu0 %v8049_v40  ;;  %5813 = vmatprep.subr.bf16.mxu1 %v8051_v11  ;;  %v1588_v40 = vunpack.c.l.s8.bf16 %v854_v6  ;;  %v1595_v11 = vunpack.c.l.s8.bf16 %v858_v7  ;;  %v8126_v19 = vcombine.low %v1574_v2, %v1581_v3 }
 0x16f   : > { %v8128_v20 = vcombine.low %v1575_v4, %v1582_v5 }
 0x170   : > { %v8140_v21 = vcombine.high %v1588_v40, %v1595_v11  ;;  %v8139_v30 = vcombine.low %v1588_v40, %v1595_v11  ;;  %v902_v40 = vld [vmem:[%s9209_s14 + $0xac4] sm:$0xff] }
 0x171   : > { %5650 = vmatpush1.bf16.msra.mxu0 %v8048_v14  ;;  %5814 = vmatpush1.bf16.msra.mxu1 %v8050_v15  ;;  %v8127_v14 = vcombine.high %v1574_v2, %v1581_v3  ;;  %v8129_v15 = vcombine.high %v1575_v4, %v1582_v5  ;;  %v906_v11 = vld [vmem:[%s9209_s14 + $0xade] sm:$0xff] }
 0x172   : > { %5651 = vmatprep.subr.bf16.mxu0 %v8062_v17  ;;  %5815 = vmatprep.subr.bf16.mxu1 %v8064_v18  ;;  %v862_v17 = vld [vmem:[%s9209_s14 + $0x9c0] sm:$0xff] }
 0x173   : > { %v866_v18 = vld [vmem:[%s9209_s14 + $0x9da] sm:$0xff]  ;;  %v1602_v23 = vunpack.c.l.s8.bf16 %v862_v17 }
 0x174   : > { %v1609_v24 = vunpack.c.l.s8.bf16 %v866_v18 }
 0x175   : > { %5652 = vmatpush1.bf16.msra.mxu0 %v8061_v25  ;;  %5816 = vmatpush1.bf16.msra.mxu1 %v8063_v26  ;;  %v1603_v25 = vunpack.c.h.s8.bf16 %v862_v17  ;;  %v1610_v26 = vunpack.c.h.s8.bf16 %v866_v18  ;;  %v1679_v18 = vunpack.c.l.s8.bf16 %v906_v11 }
 0x176   : > { %5653 = vmatprep.subr.bf16.mxu0 %v8075_v32  ;;  %5817 = vmatprep.subr.bf16.mxu1 %v8077_v33  ;;  %v1616_v32 = vunpack.c.l.s8.bf16 %v870_v27  ;;  %v1623_v33 = vunpack.c.l.s8.bf16 %v874_v28  ;;  %v8153_v35 = vcombine.high %v1602_v23, %v1609_v24  ;;  %v8152_v43 = vcombine.low %v1602_v23, %v1609_v24 }
 0x177   : > { %v8155_v36 = vcombine.high %v1603_v25, %v1610_v26  ;;  %v8154_v44 = vcombine.low %v1603_v25, %v1610_v26 }
 0x178   : > { %v8166_v47 = vcombine.high %v1616_v32, %v1623_v33  ;;  %v8165_v29 = vcombine.low %v1616_v32, %v1623_v33  ;;  %v918_v32 = vld [vmem:[%s9209_s14 + $0xb2c] sm:$0xff] }
 0x179   : > { %5654 = vmatpush1.bf16.msra.mxu0 %v8074_v37  ;;  %5818 = vmatpush1.bf16.msra.mxu1 %v8076_v34  ;;  %v1617_v37 = vunpack.c.h.s8.bf16 %v870_v27  ;;  %v1624_v34 = vunpack.c.h.s8.bf16 %v874_v28  ;;  %v922_v33 = vld [vmem:[%s9209_s14 + $0xb46] sm:$0xff] }
 0x17a   : > { %5655 = vmatprep.subr.bf16.mxu0 %v8088_v39  ;;  %5819 = vmatprep.subr.bf16.mxu1 %v8090_v41  ;;  %v878_v39 = vld [vmem:[%s9209_s14 + $0xa28] sm:$0xff] }
 0x17b   : > { %v882_v41 = vld [vmem:[%s9209_s14 + $0xa42] sm:$0xff]  ;;  %v1630_v45 = vunpack.c.l.s8.bf16 %v878_v39  ;;  %v8167_v38 = vcombine.low %v1617_v37, %v1624_v34 }
 0x17c   : > { %v1637_v46 = vunpack.c.l.s8.bf16 %v882_v41  ;;  %v1638_v52 = vunpack.c.h.s8.bf16 %v882_v41  ;;  %v1707_v41 = vunpack.c.l.s8.bf16 %v922_v33 }
 0x17d   : > { %5656 = vmatpush1.bf16.msra.mxu0 %v8087_v48  ;;  %5820 = vmatpush1.bf16.msra.mxu1 %v8089_v49  ;;  %v8168_v48 = vcombine.high %v1617_v37, %v1624_v34  ;;  %v1631_v49 = vunpack.c.h.s8.bf16 %v878_v39  ;;  %v1700_v34 = vunpack.c.l.s8.bf16 %v918_v32 }
 0x17e   : > { %5657 = vmatprep.subr.bf16.mxu0 %v8101_v56  ;;  %5821 = vmatprep.subr.bf16.mxu1 %v8103_v57  ;;  %v8179_v56 = vcombine.high %v1630_v45, %v1637_v46  ;;  %v1644_v57 = vunpack.c.l.s8.bf16 %v886_v53  ;;  %v8178_v2 = vcombine.low %v1630_v45, %v1637_v46  ;;  %v926_v45 = vld [vmem:[%s9209_s14 + $0xb60] sm:$0x55] }
 0x17f   : > { %v8181_v58 = vcombine.high %v1631_v49, %v1638_v52  ;;  %v8180_v3 = vcombine.low %v1631_v49, %v1638_v52  ;;  %v1715_v49 = vunpack.c.h.s8.bf16 %v926_v45  ;;  %v8244_v52 = vcombine.high %v1700_v34, %v1707_v41 }
 0x180   : > { %v8192_v6 = vcombine.high %v1644_v57, %v1651_v59  ;;  %v8191_v12 = vcombine.low %v1644_v57, %v1651_v59 }
 0x181   : > { %5658 = vmatpush1.bf16.msra.mxu0 %v8100_v60  ;;  %5822 = vmatpush1.bf16.msra.mxu1 %v8102_v61  ;;  %v1645_v60 = vunpack.c.h.s8.bf16 %v886_v53  ;;  %v1652_v61 = vunpack.c.h.s8.bf16 %v890_v54  ;;  %v479_v54 = vld [vmem:[%s9209_s14 + $0x8] sm:$0xff] }
 0x182   : > { %5659 = vmatprep.subr.bf16.mxu0 %v8114_v0  ;;  %5823 = vmatprep.subr.bf16.mxu1 %v8116_v1  ;;  %v894_v0 = vld [vmem:[%s9209_s14 + $0xa90] sm:$0xff]  ;;  %v932_v59 = vunpack.c.l.s8.bf16 %v479_v54 }
 0x183   : > { %v898_v1 = vld [vmem:[%s9209_s14 + $0xaaa] sm:$0xff]  ;;  %v1658_v4 = vunpack.c.l.s8.bf16 %v894_v0  ;;  %v8194_v7 = vcombine.high %v1645_v60, %v1652_v61  ;;  %v8193_v13 = vcombine.low %v1645_v60, %v1652_v61 }
 0x184   : > { %v1665_v5 = vunpack.c.l.s8.bf16 %v898_v1 }
 0x185   : > { %5660 = vmatpush1.bf16.msra.mxu0 %v8113_v8  ;;  %5824 = vmatpush1.bf16.msra.mxu1 %v8115_v9  ;;  %v1659_v8 = vunpack.c.h.s8.bf16 %v894_v0  ;;  %v1666_v9 = vunpack.c.h.s8.bf16 %v898_v1  ;;  %v8259_v0 = vcombine.high %v1715_v49, %v1715_v49  ;;  %v933_v1 = vunpack.c.h.s8.bf16 %v479_v54 }
 0x186   : > { %5661 = vmatprep.subr.bf16.mxu0 %v8127_v14  ;;  %5825 = vmatprep.subr.bf16.mxu1 %v8129_v15  ;;  %v8205_v14 = vcombine.high %v1658_v4, %v1665_v5  ;;  %v1672_v15 = vunpack.c.l.s8.bf16 %v902_v40  ;;  %v8204_v23 = vcombine.low %v1658_v4, %v1665_v5  ;;  %v491_v4 = vld [vmem:[%s9209_s14 + $0x56] sm:$0xff] }
 0x187   : > { %v8207_v17 = vcombine.high %v1659_v8, %v1666_v9  ;;  %v8206_v24 = vcombine.low %v1659_v8, %v1666_v9 }
 0x188   : > { %v8218_v27 = vcombine.high %v1672_v15, %v1679_v18 }
 0x189   : > { %5662 = vmatpush1.bf16.msra.mxu0 %v8126_v19  ;;  %5826 = vmatpush1.bf16.msra.mxu1 %v8128_v20  ;;  %v1673_v19 = vunpack.c.h.s8.bf16 %v902_v40  ;;  %v1680_v20 = vunpack.c.h.s8.bf16 %v906_v11  ;;  %v953_v40 = vunpack.c.l.s8.bf16 %v491_v4 }
 0x18a   : > { %5663 = vmatprep.subr.bf16.mxu0 %v8140_v21  ;;  %5827 = vmatprep.subr.bf16.mxu1 %v8142_v22  ;;  %v910_v21 = vld [vmem:[%s9209_s14 + $0xaf8] sm:$0xff] }
 0x18b   : > { %v914_v22 = vld [vmem:[%s9209_s14 + $0xb12] sm:$0xff]  ;;  %v1686_v25 = vunpack.c.l.s8.bf16 %v910_v21  ;;  %v8220_v28 = vcombine.high %v1673_v19, %v1680_v20 }
 0x18c   : > { %v1693_v26 = vunpack.c.l.s8.bf16 %v914_v22 }
 0x18d   : > { %5664 = vmatpush1.bf16.msra.mxu0 %v8139_v30  ;;  %5828 = vmatpush1.bf16.msra.mxu1 %v8141_v31  ;;  %v1687_v30 = vunpack.c.h.s8.bf16 %v910_v21  ;;  %v1694_v31 = vunpack.c.h.s8.bf16 %v914_v22 }
 0x18e   : > { %5674 = vmatprep.subr.bf16.mxu0 %v8153_v35  ;;  %5838 = vmatprep.subr.bf16.mxu1 %v8155_v36  ;;  %v8217_v35 = vcombine.low %v1672_v15, %v1679_v18  ;;  %v8219_v36 = vcombine.low %v1673_v19, %v1680_v20  ;;  %v8231_v37 = vcombine.high %v1686_v25, %v1693_v26 }
 0x18f   : > { %v8233_v39 = vcombine.high %v1687_v30, %v1694_v31  ;;  %v8230_v46 = vcombine.low %v1686_v25, %v1693_v26  ;;  %v9429_v15 = vcombine.high %v9394_v42, %v9394_v42  ;;  %v503_v25 = vld [vmem:[%s9209_s14 + $0xa4] sm:$0xff] }
 0x190   : > { %5666 = vmatmul.mubr.bf16.vlgmr.msra.gmra.mrb[0].mxu0 %v9394_v42  ;;  %5830 = vmatmul.mubr.bf16.vlgmr.msra.gmra.mrb[0].mxu1 %v9394_v42  ;;  %v507_v26 = vld [vmem:[%s9209_s14 + $0xbe] sm:$0xff] }
 0x191   : > { %5675 = vmatpush1.bf16.msra.mxu0 %v8152_v43  ;;  %5839 = vmatpush1.bf16.msra.mxu1 %v8154_v44  ;;  %v1701_v43 = vunpack.c.h.s8.bf16 %v918_v32  ;;  %v1708_v44 = vunpack.c.h.s8.bf16 %v922_v33  ;;  %v981_v33 = vunpack.c.l.s8.bf16 %v507_v26 }
 0x192   : > { %5676 = vmatprep.subr.bf16.mxu0 %v8166_v47  ;;  %5840 = vmatprep.subr.bf16.mxu1 %v8168_v48  ;;  %v8232_v47 = vcombine.low %v1687_v30, %v1694_v31  ;;  %v1714_v48 = vunpack.c.l.s8.bf16 %v926_v45  ;;  %v974_v31 = vunpack.c.l.s8.bf16 %v503_v25 }
 0x193   : > { %8270 = vmatprep.mubr.msk.bf16.mxu0 %vm5507_vm0, %v9400_v55  ;;  %8272 = vmatprep.mubr.msk.bf16.mxu1 %vm5507_vm0, %v9400_v55  ;;  %v8246_v53 = vcombine.high %v1701_v43, %v1708_v44 }
 0x194   : > { %v8256_v57 = vcombine.low %v1714_v48, %v1714_v48  ;;  %v8257_v61 = vcombine.high %v1714_v48, %v1714_v48  ;;  %v7572_v45 = vcombine.high %v974_v31, %v981_v33 }
 0x195   : > { %5677 = vmatpush1.bf16.msra.mxu0 %v8165_v29  ;;  %5841 = vmatpush1.bf16.msra.mxu1 %v8167_v38  ;;  %v483_v29 = vld [vmem:[%s9209_s14 + $0x22] sm:$0xff]  ;;  %v8243_v38 = vcombine.low %v1700_v34, %v1707_v41  ;;  %v515_v34 = vld [vmem:[%s9209_s14 + $0xf2] sm:$0xff] }
 0x196   : > { %5678 = vmatprep.subr.bf16.mxu0 %v8179_v56  ;;  %5842 = vmatprep.subr.bf16.mxu1 %v8181_v58  ;;  %v8245_v56 = vcombine.low %v1701_v43, %v1708_v44  ;;  %v8258_v58 = vcombine.low %v1715_v49, %v1715_v49  ;;  %v939_v60 = vunpack.c.l.s8.bf16 %v483_v29  ;;  %v5513_v5 = vsel %vm5511_vm1, %v8256_v57, 0  ;;  %v519_v49 = vld [vmem:[%s9209_s14 + $0x10c] sm:$0xff] }
 0x197   : > { %v995_v44 = vunpack.c.l.s8.bf16 %v515_v34  ;;  %v996_v48 = vunpack.c.h.s8.bf16 %v515_v34 }
 0x199   : > { %5679 = vmatpush1.bf16.msra.mxu0 %v8178_v2  ;;  %5843 = vmatpush1.bf16.msra.mxu1 %v8180_v3  ;;  %v940_v2 = vunpack.c.h.s8.bf16 %v483_v29  ;;  %v487_v3 = vld [vmem:[%s9209_s14 + $0x3c] sm:$0xff] }
 0x19a   : > { %5680 = vmatprep.subr.bf16.mxu0 %v8192_v6  ;;  %5844 = vmatprep.subr.bf16.mxu1 %v8194_v7  ;;  %v5519_v6 = vsel %vm5511_vm1, %v8258_v58, 0  ;;  %v7533_v7 = vcombine.high %v932_v59, %v939_v60  ;;  %v946_v8 = vunpack.c.l.s8.bf16 %v487_v3  ;;  %v947_v11 = vunpack.c.h.s8.bf16 %v487_v3 }
 0x19b   : > { %v7535_v9 = vcombine.high %v933_v1, %v940_v2  ;;  %v7534_v18 = vcombine.low %v933_v1, %v940_v2  ;;  %v1003_v58 = vunpack.c.h.s8.bf16 %v519_v49 }
 0x19c   : > { %v7546_v21 = vcombine.high %v946_v8, %v953_v40 }
 0x19d   : > { %5681 = vmatpush1.bf16.msra.mxu0 %v8191_v12  ;;  %5845 = vmatpush1.bf16.msra.mxu1 %v8193_v13  ;;  %v954_v12 = vunpack.c.h.s8.bf16 %v491_v4  ;;  %v495_v13 = vld [vmem:[%s9209_s14 + $0x70] sm:$0xff] }
 0x19e   : > { %5682 = vmatprep.subr.bf16.mxu0 %v8205_v14  ;;  %5846 = vmatprep.subr.bf16.mxu1 %v8207_v17  ;;  %v499_v14 = vld [vmem:[%s9209_s14 + $0x8a] sm:$0xff]  ;;  %v7532_v17 = vcombine.low %v932_v59, %v939_v60  ;;  %v960_v19 = vunpack.c.l.s8.bf16 %v495_v13  ;;  %v527_v60 = vld [vmem:[%s9209_s14 + $0x140] sm:$0xff] }
 0x19f   : > { %v967_v20 = vunpack.c.l.s8.bf16 %v499_v14  ;;  %v7548_v22 = vcombine.high %v947_v11, %v954_v12  ;;  %v1016_v2 = vunpack.c.l.s8.bf16 %v527_v60 }
 0x1a1   : > { %5683 = vmatpush1.bf16.msra.mxu0 %v8204_v23  ;;  %5847 = vmatpush1.bf16.msra.mxu1 %v8206_v24  ;;  %v961_v23 = vunpack.c.h.s8.bf16 %v495_v13  ;;  %v968_v24 = vunpack.c.h.s8.bf16 %v499_v14  ;;  %v7559_v30 = vcombine.high %v960_v19, %v967_v20 }
 0x1a2   : > { %5684 = vmatprep.subr.bf16.mxu0 %v8218_v27  ;;  %5848 = vmatprep.subr.bf16.mxu1 %v8220_v28  ;;  %v7545_v27 = vcombine.low %v946_v8, %v953_v40  ;;  %v7547_v28 = vcombine.low %v947_v11, %v954_v12  ;;  %v535_v8 = vld [vmem:[%s9209_s14 + $0x174] sm:$0xff] }
 0x1a3   : > { %v7561_v32 = vcombine.high %v961_v23, %v968_v24  ;;  %v7560_v41 = vcombine.low %v961_v23, %v968_v24  ;;  %v1030_v13 = vunpack.c.l.s8.bf16 %v535_v8 }
 0x1a5   : > { %5685 = vmatpush1.bf16.msra.mxu0 %v8217_v35  ;;  %5849 = vmatpush1.bf16.msra.mxu1 %v8219_v36  ;;  %v975_v35 = vunpack.c.h.s8.bf16 %v503_v25  ;;  %v982_v36 = vunpack.c.h.s8.bf16 %v507_v26 }
 0x1a6   : > { %5686 = vmatprep.subr.bf16.mxu0 %v8231_v37  ;;  %5850 = vmatprep.subr.bf16.mxu1 %v8233_v39  ;;  %v511_v37 = vld [vmem:[%s9209_s14 + $0xd8] sm:$0xff]  ;;  %v7558_v39 = vcombine.low %v960_v19, %v967_v20  ;;  %v543_v20 = vld [vmem:[%s9209_s14 + $0x1a8] sm:$0xff] }
 0x1a7   : > { %v988_v43 = vunpack.c.l.s8.bf16 %v511_v37  ;;  %v7573_v54 = vcombine.low %v975_v35, %v982_v36  ;;  %v1044_v24 = vunpack.c.l.s8.bf16 %v543_v20  ;;  %v1045_v26 = vunpack.c.h.s8.bf16 %v543_v20 }
 0x1a9   : > { %5687 = vmatpush1.bf16.msra.mxu0 %v8230_v46  ;;  %5851 = vmatpush1.bf16.msra.mxu1 %v8232_v47  ;;  %v7574_v46 = vcombine.high %v975_v35, %v982_v36  ;;  %v989_v47 = vunpack.c.h.s8.bf16 %v511_v37  ;;  %v7585_v29 = vcombine.high %v988_v43, %v995_v44 }
 0x1aa   : > { %5688 = vmatprep.subr.bf16.mxu0 %v8244_v52  ;;  %5852 = vmatprep.subr.bf16.mxu1 %v8246_v53  ;;  %v523_v52 = vld [vmem:[%s9209_s14 + $0x126] sm:$0xff]  ;;  %v7571_v53 = vcombine.low %v974_v31, %v981_v33  ;;  %v551_v31 = vld [vmem:[%s9209_s14 + $0x1dc] sm:$0xff] }
 0x1ab   : > { %v1009_v57 = vunpack.c.l.s8.bf16 %v523_v52  ;;  %v1010_v59 = vunpack.c.h.s8.bf16 %v523_v52  ;;  %v7586_v1 = vcombine.low %v989_v47, %v996_v48  ;;  %v1058_v34 = vunpack.c.l.s8.bf16 %v551_v31 }
 0x1ad   : > { %5689 = vmatpush1.bf16.msra.mxu0 %v8243_v38  ;;  %5853 = vmatpush1.bf16.msra.mxu1 %v8245_v56  ;;  %v1002_v38 = vunpack.c.l.s8.bf16 %v519_v49  ;;  %v7587_v56 = vcombine.high %v989_v47, %v996_v48  ;;  %v7599_v11 = vcombine.low %v1003_v58, %v1010_v59 }
 0x1ae   : > { %8269 = vmatprep.subr.msk.bf16.mxu0 %vm5511_vm1, %v8257_v61  ;;  %8271 = vmatprep.subr.msk.bf16.mxu1 %vm5511_vm1, %v8259_v0  ;;  %v531_v61 = vld [vmem:[%s9209_s14 + $0x15a] sm:$0xff]  ;;  %v7584_v0 = vcombine.low %v988_v43, %v995_v44  ;;  %v559_v44 = vld [vmem:[%s9209_s14 + $0x210] sm:$0xff] }
 0x1af   : > { %v1023_v3 = vunpack.c.l.s8.bf16 %v531_v61  ;;  %v7598_v4 = vcombine.high %v1002_v38, %v1009_v57  ;;  %v7597_v40 = vcombine.low %v1002_v38, %v1009_v57  ;;  %v1072_v48 = vunpack.c.l.s8.bf16 %v559_v44  ;;  %v567_v38 = vld [vmem:[%s9209_s14 + $0x244] sm:$0xff] }
 0x1b0   : > { %v1073_v52 = vunpack.c.h.s8.bf16 %v559_v44 }
 0x1b1   : > { %5691 = vmatpush1.bf16.msra.mxu0 %v5513_v5  ;;  %5855 = vmatpush1.bf16.msra.mxu1 %v5519_v6  ;;  %v7600_v5 = vcombine.high %v1003_v58, %v1010_v59  ;;  %v1017_v6 = vunpack.c.h.s8.bf16 %v527_v60  ;;  %v7611_v12 = vcombine.high %v1016_v2, %v1023_v3 }
 0x1b2   : > { %5879 = vmatprep.subr.bf16.mxu0 %v7533_v7  ;;  %6043 = vmatprep.subr.bf16.mxu1 %v7535_v9  ;;  %v1024_v7 = vunpack.c.h.s8.bf16 %v531_v61  ;;  %v539_v9 = vld [vmem:[%s9209_s14 + $0x18e] sm:$0xff]  ;;  %v1086_v61 = vunpack.c.l.s8.bf16 %v567_v38 }
 0x1b3   : > { %v1038_v19 = vunpack.c.h.s8.bf16 %v539_v9 }
 0x1b4   : > { %5707 = vmatmul.mubr.bf16.vlgmr.msra.gmra.mrb[0].mxu0 %v9429_v15  ;;  %5871 = vmatmul.mubr.bf16.vlgmr.msra.gmra.mrb[0].mxu1 %v9429_v15  ;;  %v7613_v14 = vcombine.high %v1017_v6, %v1024_v7  ;;  %v7612_v23 = vcombine.low %v1017_v6, %v1024_v7 }
 0x1b5   : > { %5880 = vmatpush1.bf16.msra.mxu0 %v7532_v17  ;;  %6044 = vmatpush1.bf16.msra.mxu1 %v7534_v18  ;;  %v1037_v17 = vunpack.c.l.s8.bf16 %v539_v9  ;;  %v1031_v18 = vunpack.c.h.s8.bf16 %v535_v8 }
 0x1b6   : > { %5881 = vmatprep.subr.bf16.mxu0 %v7546_v21  ;;  %6045 = vmatprep.subr.bf16.mxu1 %v7548_v22  ;;  %v547_v21 = vld [vmem:[%s9209_s14 + $0x1c2] sm:$0xff]  ;;  %v7610_v22 = vcombine.low %v1016_v2, %v1023_v3  ;;  %v575_v3 = vld [vmem:[%s9209_s14 + $0x278] sm:$0xff] }
 0x1b7   : > { %5911 = vmatprep.mubr.bf16.mxu0 %v9280_v51  ;;  %6075 = vmatprep.mubr.bf16.mxu1 %v9280_v51  ;;  %v1051_v25 = vunpack.c.l.s8.bf16 %v547_v21  ;;  %v7623_v33 = vcombine.low %v1030_v13, %v1037_v17  ;;  %v7625_v35 = vcombine.low %v1031_v18, %v1038_v19  ;;  %v1100_v7 = vunpack.c.l.s8.bf16 %v575_v3 }
 0x1b8   : > { %v1101_v9 = vunpack.c.h.s8.bf16 %v575_v3 }
 0x1b9   : > { %5882 = vmatpush1.bf16.msra.mxu0 %v7545_v27  ;;  %6046 = vmatpush1.bf16.msra.mxu1 %v7547_v28  ;;  %v1052_v27 = vunpack.c.h.s8.bf16 %v547_v21  ;;  %v7624_v28 = vcombine.high %v1030_v13, %v1037_v17  ;;  %v7637_v36 = vcombine.high %v1044_v24, %v1051_v25  ;;  %v583_v13 = vld [vmem:[%s9209_s14 + $0x2ac] sm:$0xff] }
 0x1ba   : > { %5883 = vmatprep.subr.bf16.mxu0 %v7559_v30  ;;  %6047 = vmatprep.subr.bf16.mxu1 %v7561_v32  ;;  %v7626_v30 = vcombine.high %v1031_v18, %v1038_v19  ;;  %v555_v32 = vld [vmem:[%s9209_s14 + $0x1f6] sm:$0xff]  ;;  %v1114_v21 = vunpack.c.l.s8.bf16 %v583_v13 }
 0x1bb   : > { %v7639_v37 = vcombine.high %v1045_v26, %v1052_v27  ;;  %v1066_v43 = vunpack.c.h.s8.bf16 %v555_v32  ;;  %v7638_v47 = vcombine.low %v1045_v26, %v1052_v27  ;;  %v595_v26 = vld [vmem:[%s9209_s14 + $0x2fa] sm:$0xff] }
 0x1bd   : > { %5884 = vmatpush1.bf16.msra.mxu0 %v7558_v39  ;;  %6048 = vmatpush1.bf16.msra.mxu1 %v7560_v41  ;;  %v1065_v39 = vunpack.c.l.s8.bf16 %v555_v32  ;;  %v1059_v41 = vunpack.c.h.s8.bf16 %v551_v31  ;;  %v1135_v31 = vunpack.c.l.s8.bf16 %v595_v26 }
 0x1be   : > { %5885 = vmatprep.subr.bf16.mxu0 %v7572_v45  ;;  %6049 = vmatprep.subr.bf16.mxu1 %v7574_v46  ;;  %v563_v45 = vld [vmem:[%s9209_s14 + $0x22a] sm:$0xff]  ;;  %v7636_v46 = vcombine.low %v1044_v24, %v1051_v25  ;;  %v591_v25 = vld [vmem:[%s9209_s14 + $0x2e0] sm:$0xff] }
 0x1bf   : > { %v1079_v49 = vunpack.c.l.s8.bf16 %v563_v45  ;;  %v7649_v57 = vcombine.low %v1058_v34, %v1065_v39  ;;  %v7651_v58 = vcombine.low %v1059_v41, %v1066_v43  ;;  %v1129_v32 = vunpack.c.h.s8.bf16 %v591_v25 }
 0x1c1   : > { %5886 = vmatpush1.bf16.msra.mxu0 %v7571_v53  ;;  %6050 = vmatpush1.bf16.msra.mxu1 %v7573_v54  ;;  %v1080_v53 = vunpack.c.h.s8.bf16 %v563_v45  ;;  %v7650_v54 = vcombine.high %v1058_v34, %v1065_v39  ;;  %v7663_v59 = vcombine.high %v1072_v48, %v1079_v49  ;;  %v603_v34 = vld [vmem:[%s9209_s14 + $0x32e] sm:$0xff] }
 0x1c2   : > { %5887 = vmatprep.subr.bf16.mxu0 %v7585_v29  ;;  %6051 = vmatprep.subr.bf16.mxu1 %v7587_v56  ;;  %v7652_v29 = vcombine.high %v1059_v41, %v1066_v43  ;;  %v571_v56 = vld [vmem:[%s9209_s14 + $0x25e] sm:$0xff] }
 0x1c3   : > { %v7665_v60 = vcombine.high %v1073_v52, %v1080_v53  ;;  %v1094_v2 = vunpack.c.h.s8.bf16 %v571_v56  ;;  %v7664_v6 = vcombine.low %v1073_v52, %v1080_v53  ;;  %v611_v52 = vld [vmem:[%s9209_s14 + $0x362] sm:$0xff] }
 0x1c5   : > { %5888 = vmatpush1.bf16.msra.mxu0 %v7584_v0  ;;  %6052 = vmatpush1.bf16.msra.mxu1 %v7586_v1  ;;  %v1093_v0 = vunpack.c.l.s8.bf16 %v571_v56  ;;  %v1087_v1 = vunpack.c.h.s8.bf16 %v567_v38  ;;  %v1163_v38 = vunpack.c.l.s8.bf16 %v611_v52 }
 0x1c6   : > { %5889 = vmatprep.subr.bf16.mxu0 %v7598_v4  ;;  %6053 = vmatprep.subr.bf16.mxu1 %v7600_v5  ;;  %v579_v4 = vld [vmem:[%s9209_s14 + $0x292] sm:$0xff]  ;;  %v7662_v5 = vcombine.low %v1072_v48, %v1079_v49  ;;  %v1150_v48 = vunpack.c.h.s8.bf16 %v603_v34  ;;  %v607_v49 = vld [vmem:[%s9209_s14 + $0x348] sm:$0xff] }
 0x1c7   : > { %v1107_v8 = vunpack.c.l.s8.bf16 %v579_v4  ;;  %v7675_v17 = vcombine.low %v1086_v61, %v1093_v0  ;;  %v7677_v18 = vcombine.low %v1087_v1, %v1094_v2  ;;  %v1157_v56 = vunpack.c.h.s8.bf16 %v607_v49 }
 0x1c9   : > { %5890 = vmatpush1.bf16.msra.mxu0 %v7597_v40  ;;  %6054 = vmatpush1.bf16.msra.mxu1 %v7599_v11  ;;  %v1108_v40 = vunpack.c.h.s8.bf16 %v579_v4  ;;  %v7676_v11 = vcombine.high %v1086_v61, %v1093_v0  ;;  %v7689_v19 = vcombine.high %v1100_v7, %v1107_v8  ;;  %v7688_v27 = vcombine.low %v1100_v7, %v1107_v8  ;;  %v619_v61 = vld [vmem:[%s9209_s14 + $0x396] sm:$0xff] }
 0x1ca   : > { %5891 = vmatprep.subr.bf16.mxu0 %v7611_v12  ;;  %6055 = vmatprep.subr.bf16.mxu1 %v7613_v14  ;;  %v7678_v12 = vcombine.high %v1087_v1, %v1094_v2  ;;  %v587_v14 = vld [vmem:[%s9209_s14 + $0x2c6] sm:$0xff]  ;;  %v1178_v7 = vunpack.c.h.s8.bf16 %v619_v61  ;;  %v623_v8 = vld [vmem:[%s9209_s14 + $0x3b0] sm:$0xff] }
 0x1cb   : > { %v7691_v20 = vcombine.high %v1101_v9, %v1108_v40  ;;  %v1122_v24 = vunpack.c.h.s8.bf16 %v587_v14 }
 0x1cd   : > { %5892 = vmatpush1.bf16.msra.mxu0 %v7610_v22  ;;  %6056 = vmatpush1.bf16.msra.mxu1 %v7612_v23  ;;  %v1121_v22 = vunpack.c.l.s8.bf16 %v587_v14  ;;  %v1115_v23 = vunpack.c.h.s8.bf16 %v583_v13  ;;  %v1185_v14 = vunpack.c.h.s8.bf16 %v623_v8 }
 0x1ce   : > { %5893 = vmatprep.subr.bf16.mxu0 %v7624_v28  ;;  %6057 = vmatprep.subr.bf16.mxu1 %v7626_v30  ;;  %v7690_v28 = vcombine.low %v1101_v9, %v1108_v40  ;;  %v1128_v30 = vunpack.c.l.s8.bf16 %v591_v25  ;;  %v627_v9 = vld [vmem:[%s9209_s14 + $0x3ca] sm:$0xff] }
 0x1cf   : > { %v7701_v39 = vcombine.low %v1114_v21, %v1121_v22  ;;  %v7703_v41 = vcombine.low %v1115_v23, %v1122_v24  ;;  %v1191_v13 = vunpack.c.l.s8.bf16 %v627_v9 }
 0x1d0   : > { %v7715_v43 = vcombine.high %v1128_v30, %v1135_v31  ;;  %v7714_v53 = vcombine.low %v1128_v30, %v1135_v31  ;;  %v639_v31 = vld [vmem:[%s9209_s14 + $0x418] sm:$0xff] }
 0x1d1   : > { %5894 = vmatpush1.bf16.msra.mxu0 %v7623_v33  ;;  %6058 = vmatpush1.bf16.msra.mxu1 %v7625_v35  ;;  %v1136_v33 = vunpack.c.h.s8.bf16 %v595_v26  ;;  %v7702_v35 = vcombine.high %v1114_v21, %v1121_v22  ;;  %v635_v21 = vld [vmem:[%s9209_s14 + $0x3fe] sm:$0xff] }
 0x1d2   : > { %5895 = vmatprep.subr.bf16.mxu0 %v7637_v36  ;;  %6059 = vmatprep.subr.bf16.mxu1 %v7639_v37  ;;  %v7704_v36 = vcombine.high %v1115_v23, %v1122_v24  ;;  %v599_v37 = vld [vmem:[%s9209_s14 + $0x314] sm:$0xff]  ;;  %v1206_v30 = vunpack.c.h.s8.bf16 %v635_v21 }
 0x1d3   : > { %v7717_v44 = vcombine.high %v1129_v32, %v1136_v33  ;;  %v1142_v45 = vunpack.c.l.s8.bf16 %v599_v37 }
 0x1d5   : > { %5896 = vmatpush1.bf16.msra.mxu0 %v7636_v46  ;;  %6060 = vmatpush1.bf16.msra.mxu1 %v7638_v47  ;;  %v1149_v46 = vunpack.c.l.s8.bf16 %v603_v34  ;;  %v1143_v47 = vunpack.c.h.s8.bf16 %v599_v37  ;;  %v1213_v34 = vunpack.c.h.s8.bf16 %v639_v31 }
 0x1d6   : > { %5897 = vmatprep.subr.bf16.mxu0 %v7650_v54  ;;  %6061 = vmatprep.subr.bf16.mxu1 %v7652_v29  ;;  %v7716_v54 = vcombine.low %v1129_v32, %v1136_v33  ;;  %v1156_v29 = vunpack.c.l.s8.bf16 %v607_v49  ;;  %v643_v32 = vld [vmem:[%s9209_s14 + $0x432] sm:$0xff] }
 0x1d7   : > { %v7727_v0 = vcombine.low %v1142_v45, %v1149_v46  ;;  %v7729_v1 = vcombine.low %v1143_v47, %v1150_v48  ;;  %v1219_v37 = vunpack.c.l.s8.bf16 %v643_v32 }
 0x1d8   : > { %v7741_v2 = vcombine.high %v1156_v29, %v1163_v38  ;;  %v7740_v40 = vcombine.low %v1156_v29, %v1163_v38  ;;  %v655_v38 = vld [vmem:[%s9209_s14 + $0x480] sm:$0xff] }
 0x1d9   : > { %5898 = vmatpush1.bf16.msra.mxu0 %v7649_v57  ;;  %6062 = vmatpush1.bf16.msra.mxu1 %v7651_v58  ;;  %v1164_v57 = vunpack.c.h.s8.bf16 %v611_v52  ;;  %v7728_v58 = vcombine.high %v1142_v45, %v1149_v46  ;;  %v651_v45 = vld [vmem:[%s9209_s14 + $0x466] sm:$0xff] }
 0x1da   : > { %5899 = vmatprep.subr.bf16.mxu0 %v7663_v59  ;;  %6063 = vmatprep.subr.bf16.mxu1 %v7665_v60  ;;  %v7730_v59 = vcombine.high %v1143_v47, %v1150_v48  ;;  %v615_v60 = vld [vmem:[%s9209_s14 + $0x37c] sm:$0xff]  ;;  %v1234_v29 = vunpack.c.h.s8.bf16 %v651_v45 }
 0x1db   : > { %v7743_v3 = vcombine.high %v1157_v56, %v1164_v57  ;;  %v1170_v4 = vunpack.c.l.s8.bf16 %v615_v60 }
 0x1dd   : > { %5900 = vmatpush1.bf16.msra.mxu0 %v7662_v5  ;;  %6064 = vmatpush1.bf16.msra.mxu1 %v7664_v6  ;;  %v1177_v5 = vunpack.c.l.s8.bf16 %v619_v61  ;;  %v1171_v6 = vunpack.c.h.s8.bf16 %v615_v60  ;;  %v1241_v61 = vunpack.c.h.s8.bf16 %v655_v38 }
 0x1de   : > { %5901 = vmatprep.subr.bf16.mxu0 %v7676_v11  ;;  %6065 = vmatprep.subr.bf16.mxu1 %v7678_v12  ;;  %v7742_v11 = vcombine.low %v1157_v56, %v1164_v57  ;;  %v1184_v12 = vunpack.c.l.s8.bf16 %v623_v8  ;;  %v659_v56 = vld [vmem:[%s9209_s14 + $0x49a] sm:$0xff] }
 0x1df   : > { %v7753_v22 = vcombine.low %v1170_v4, %v1177_v5  ;;  %v7755_v23 = vcombine.low %v1171_v6, %v1178_v7  ;;  %v1247_v60 = vunpack.c.l.s8.bf16 %v659_v56 }
 0x1e0   : > { %v7767_v24 = vcombine.high %v1184_v12, %v1191_v13  ;;  %v7766_v33 = vcombine.low %v1184_v12, %v1191_v13  ;;  %v671_v13 = vld [vmem:[%s9209_s14 + $0x4e8] sm:$0xff] }
 0x1e1   : > { %5902 = vmatpush1.bf16.msra.mxu0 %v7675_v17  ;;  %6066 = vmatpush1.bf16.msra.mxu1 %v7677_v18  ;;  %v1192_v17 = vunpack.c.h.s8.bf16 %v627_v9  ;;  %v7754_v18 = vcombine.high %v1170_v4, %v1177_v5  ;;  %v667_v4 = vld [vmem:[%s9209_s14 + $0x4ce] sm:$0xff] }
 0x1e2   : > { %5903 = vmatprep.subr.bf16.mxu0 %v7689_v19  ;;  %6067 = vmatprep.subr.bf16.mxu1 %v7691_v20  ;;  %v7756_v19 = vcombine.high %v1171_v6, %v1178_v7  ;;  %v631_v20 = vld [vmem:[%s9209_s14 + $0x3e4] sm:$0xff]  ;;  %v1262_v12 = vunpack.c.h.s8.bf16 %v667_v4 }
 0x1e3   : > { %v7769_v25 = vcombine.high %v1185_v14, %v1192_v17  ;;  %v1198_v26 = vunpack.c.l.s8.bf16 %v631_v20 }
 0x1e5   : > { %5904 = vmatpush1.bf16.msra.mxu0 %v7688_v27  ;;  %6068 = vmatpush1.bf16.msra.mxu1 %v7690_v28  ;;  %v1205_v27 = vunpack.c.l.s8.bf16 %v635_v21  ;;  %v1199_v28 = vunpack.c.h.s8.bf16 %v631_v20  ;;  %v1269_v21 = vunpack.c.h.s8.bf16 %v671_v13 }
 0x1e6   : > { %5905 = vmatprep.subr.bf16.mxu0 %v7702_v35  ;;  %6069 = vmatprep.subr.bf16.mxu1 %v7704_v36  ;;  %v7768_v35 = vcombine.low %v1185_v14, %v1192_v17  ;;  %v1212_v36 = vunpack.c.l.s8.bf16 %v639_v31  ;;  %v675_v14 = vld [vmem:[%s9209_s14 + $0x502] sm:$0xff] }
 0x1e7   : > { %v7779_v46 = vcombine.low %v1198_v26, %v1205_v27  ;;  %v7781_v47 = vcombine.low %v1199_v28, %v1206_v30  ;;  %v1275_v20 = vunpack.c.l.s8.bf16 %v675_v14 }
 0x1e8   : > { %v7793_v48 = vcombine.high %v1212_v36, %v1219_v37  ;;  %v7792_v57 = vcombine.low %v1212_v36, %v1219_v37  ;;  %v687_v37 = vld [vmem:[%s9209_s14 + $0x550] sm:$0xff] }
 0x1e9   : > { %5906 = vmatpush1.bf16.msra.mxu0 %v7701_v39  ;;  %6070 = vmatpush1.bf16.msra.mxu1 %v7703_v41  ;;  %v1220_v39 = vunpack.c.h.s8.bf16 %v643_v32  ;;  %v7780_v41 = vcombine.high %v1198_v26, %v1205_v27  ;;  %v683_v26 = vld [vmem:[%s9209_s14 + $0x536] sm:$0xff] }
 0x1ea   : > { %5907 = vmatprep.subr.bf16.mxu0 %v7715_v43  ;;  %6071 = vmatprep.subr.bf16.mxu1 %v7717_v44  ;;  %v7782_v43 = vcombine.high %v1199_v28, %v1206_v30  ;;  %v647_v44 = vld [vmem:[%s9209_s14 + $0x44c] sm:$0xff]  ;;  %v1290_v36 = vunpack.c.h.s8.bf16 %v683_v26 }
 0x1eb   : > { %v7795_v49 = vcombine.high %v1213_v34, %v1220_v39  ;;  %v1226_v52 = vunpack.c.l.s8.bf16 %v647_v44 }
 0x1ed   : > { %5908 = vmatpush1.bf16.msra.mxu0 %v7714_v53  ;;  %6072 = vmatpush1.bf16.msra.mxu1 %v7716_v54  ;;  %v1233_v53 = vunpack.c.l.s8.bf16 %v651_v45  ;;  %v1227_v54 = vunpack.c.h.s8.bf16 %v647_v44  ;;  %v1297_v45 = vunpack.c.h.s8.bf16 %v687_v37 }
 0x1ee   : > { %5909 = vmatprep.subr.bf16.mxu0 %v7728_v58  ;;  %6073 = vmatprep.subr.bf16.mxu1 %v7730_v59  ;;  %v7794_v58 = vcombine.low %v1213_v34, %v1220_v39  ;;  %v1240_v59 = vunpack.c.l.s8.bf16 %v655_v38  ;;  %v691_v34 = vld [vmem:[%s9209_s14 + $0x56a] sm:$0xff] }
 0x1ef   : > { %v7805_v5 = vcombine.low %v1226_v52, %v1233_v53  ;;  %v7807_v6 = vcombine.low %v1227_v54, %v1234_v29  ;;  %v1303_v44 = vunpack.c.l.s8.bf16 %v691_v34 }
 0x1f0   : > { %v7819_v7 = vcombine.high %v1240_v59, %v1247_v60  ;;  %v7818_v17 = vcombine.low %v1240_v59, %v1247_v60  ;;  %v703_v60 = vld [vmem:[%s9209_s14 + $0x5b8] sm:$0xff] }
 0x1f1   : > { %5910 = vmatpush1.bf16.msra.mxu0 %v7727_v0  ;;  %6074 = vmatpush1.bf16.msra.mxu1 %v7729_v1  ;;  %v1248_v0 = vunpack.c.h.s8.bf16 %v659_v56  ;;  %v7806_v1 = vcombine.high %v1226_v52, %v1233_v53  ;;  %v699_v52 = vld [vmem:[%s9209_s14 + $0x59e] sm:$0xff] }
 0x1f2   : > { %5920 = vmatprep.subr.bf16.mxu0 %v7741_v2  ;;  %6084 = vmatprep.subr.bf16.mxu1 %v7743_v3  ;;  %v7808_v2 = vcombine.high %v1227_v54, %v1234_v29  ;;  %v663_v3 = vld [vmem:[%s9209_s14 + $0x4b4] sm:$0xff]  ;;  %v1318_v59 = vunpack.c.h.s8.bf16 %v699_v52 }
 0x1f3   : > { %v7821_v8 = vcombine.high %v1241_v61, %v1248_v0  ;;  %v1254_v9 = vunpack.c.l.s8.bf16 %v663_v3 }
 0x1f4   : > { %5912 = vmatmul.mubr.bf16.vlgmr.msra.gmra.mrb[4].mxu0 %v9300_v63  ;;  %6076 = vmatmul.mubr.bf16.vlgmr.msra.gmra.mrb[4].mxu1 %v9300_v63 }
 0x1f5   : > { %5921 = vmatpush1.bf16.msra.mxu0 %v7740_v40  ;;  %6085 = vmatpush1.bf16.msra.mxu1 %v7742_v11  ;;  %v1261_v40 = vunpack.c.l.s8.bf16 %v667_v4  ;;  %v1255_v11 = vunpack.c.h.s8.bf16 %v663_v3  ;;  %v1325_v4 = vunpack.c.h.s8.bf16 %v703_v60 }
 0x1f6   : > { %5922 = vmatprep.subr.bf16.mxu0 %v7754_v18  ;;  %6086 = vmatprep.subr.bf16.mxu1 %v7756_v19  ;;  %v7820_v18 = vcombine.low %v1241_v61, %v1248_v0  ;;  %v1268_v19 = vunpack.c.l.s8.bf16 %v671_v13  ;;  %v707_v61 = vld [vmem:[%s9209_s14 + $0x5d2] sm:$0xff] }
 0x1f7   : > { %5952 = vmatprep.mubr.bf16.mxu0 %v9306_v10  ;;  %6116 = vmatprep.mubr.bf16.mxu1 %v9306_v10  ;;  %v7831_v27 = vcombine.low %v1254_v9, %v1261_v40  ;;  %v7833_v28 = vcombine.low %v1255_v11, %v1262_v12  ;;  %v1331_v3 = vunpack.c.l.s8.bf16 %v707_v61 }
 0x1f8   : > { %v7845_v30 = vcombine.high %v1268_v19, %v1275_v20  ;;  %v7844_v39 = vcombine.low %v1268_v19, %v1275_v20  ;;  %v719_v20 = vld [vmem:[%s9209_s14 + $0x620] sm:$0xff] }
 0x1f9   : > { %5923 = vmatpush1.bf16.msra.mxu0 %v7753_v22  ;;  %6087 = vmatpush1.bf16.msra.mxu1 %v7755_v23  ;;  %v1276_v22 = vunpack.c.h.s8.bf16 %v675_v14  ;;  %v7832_v23 = vcombine.high %v1254_v9, %v1261_v40  ;;  %v715_v9 = vld [vmem:[%s9209_s14 + $0x606] sm:$0xff] }
 0x1fa   : > { %5924 = vmatprep.subr.bf16.mxu0 %v7767_v24  ;;  %6088 = vmatprep.subr.bf16.mxu1 %v7769_v25  ;;  %v7834_v24 = vcombine.high %v1255_v11, %v1262_v12  ;;  %v679_v25 = vld [vmem:[%s9209_s14 + $0x51c] sm:$0xff]  ;;  %v1346_v19 = vunpack.c.h.s8.bf16 %v715_v9 }
 0x1fb   : > { %v7847_v31 = vcombine.high %v1269_v21, %v1276_v22  ;;  %v1282_v32 = vunpack.c.l.s8.bf16 %v679_v25 }
 0x1fd   : > { %5925 = vmatpush1.bf16.msra.mxu0 %v7766_v33  ;;  %6089 = vmatpush1.bf16.msra.mxu1 %v7768_v35  ;;  %v1289_v33 = vunpack.c.l.s8.bf16 %v683_v26  ;;  %v1283_v35 = vunpack.c.h.s8.bf16 %v679_v25  ;;  %v1353_v26 = vunpack.c.h.s8.bf16 %v719_v20 }
 0x1fe   : > { %5926 = vmatprep.subr.bf16.mxu0 %v7780_v41  ;;  %6090 = vmatprep.subr.bf16.mxu1 %v7782_v43  ;;  %v7846_v41 = vcombine.low %v1269_v21, %v1276_v22  ;;  %v1296_v43 = vunpack.c.l.s8.bf16 %v687_v37  ;;  %v723_v21 = vld [vmem:[%s9209_s14 + $0x63a] sm:$0xff] }
 0x1ff   : > { %v7857_v53 = vcombine.low %v1282_v32, %v1289_v33  ;;  %v7859_v54 = vcombine.low %v1283_v35, %v1290_v36  ;;  %v1359_v25 = vunpack.c.l.s8.bf16 %v723_v21 }
 0x200   : > { %v7871_v29 = vcombine.high %v1296_v43, %v1303_v44  ;;  %v7870_v0 = vcombine.low %v1296_v43, %v1303_v44  ;;  %v735_v44 = vld [vmem:[%s9209_s14 + $0x688] sm:$0xff] }
 0x201   : > { %5927 = vmatpush1.bf16.msra.mxu0 %v7779_v46  ;;  %6091 = vmatpush1.bf16.msra.mxu1 %v7781_v47  ;;  %v1304_v46 = vunpack.c.h.s8.bf16 %v691_v34  ;;  %v7858_v47 = vcombine.high %v1282_v32, %v1289_v33  ;;  %v731_v32 = vld [vmem:[%s9209_s14 + $0x66e] sm:$0xff] }
 0x202   : > { %5928 = vmatprep.subr.bf16.mxu0 %v7793_v48  ;;  %6092 = vmatprep.subr.bf16.mxu1 %v7795_v49  ;;  %v7860_v48 = vcombine.high %v1283_v35, %v1290_v36  ;;  %v695_v49 = vld [vmem:[%s9209_s14 + $0x584] sm:$0xff]  ;;  %v1374_v43 = vunpack.c.h.s8.bf16 %v731_v32 }
 0x203   : > { %v7873_v38 = vcombine.high %v1297_v45, %v1304_v46  ;;  %v1310_v56 = vunpack.c.l.s8.bf16 %v695_v49 }
 0x205   : > { %5929 = vmatpush1.bf16.msra.mxu0 %v7792_v57  ;;  %6093 = vmatpush1.bf16.msra.mxu1 %v7794_v58  ;;  %v1317_v57 = vunpack.c.l.s8.bf16 %v699_v52  ;;  %v1311_v58 = vunpack.c.h.s8.bf16 %v695_v49  ;;  %v1381_v52 = vunpack.c.h.s8.bf16 %v735_v44 }
 0x206   : > { %5930 = vmatprep.subr.bf16.mxu0 %v7806_v1  ;;  %6094 = vmatprep.subr.bf16.mxu1 %v7808_v2  ;;  %v7872_v1 = vcombine.low %v1297_v45, %v1304_v46  ;;  %v1324_v2 = vunpack.c.l.s8.bf16 %v703_v60  ;;  %v739_v45 = vld [vmem:[%s9209_s14 + $0x6a2] sm:$0xff] }
 0x207   : > { %v7883_v40 = vcombine.low %v1310_v56, %v1317_v57  ;;  %v7885_v11 = vcombine.low %v1311_v58, %v1318_v59  ;;  %v1387_v49 = vunpack.c.l.s8.bf16 %v739_v45 }
 0x208   : > { %v7897_v12 = vcombine.high %v1324_v2, %v1331_v3  ;;  %v7896_v22 = vcombine.low %v1324_v2, %v1331_v3  ;;  %v751_v3 = vld [vmem:[%s9209_s14 + $0x6f0] sm:$0xff] }
 0x209   : > { %5931 = vmatpush1.bf16.msra.mxu0 %v7805_v5  ;;  %6095 = vmatpush1.bf16.msra.mxu1 %v7807_v6  ;;  %v1332_v5 = vunpack.c.h.s8.bf16 %v707_v61  ;;  %v7884_v6 = vcombine.high %v1310_v56, %v1317_v57  ;;  %v747_v56 = vld [vmem:[%s9209_s14 + $0x6d6] sm:$0xff] }
 0x20a   : > { %5932 = vmatprep.subr.bf16.mxu0 %v7819_v7  ;;  %6096 = vmatprep.subr.bf16.mxu1 %v7821_v8  ;;  %v7886_v7 = vcombine.high %v1311_v58, %v1318_v59  ;;  %v711_v8 = vld [vmem:[%s9209_s14 + $0x5ec] sm:$0xff]  ;;  %v1402_v2 = vunpack.c.h.s8.bf16 %v747_v56 }
 0x20b   : > { %v7899_v13 = vcombine.high %v1325_v4, %v1332_v5  ;;  %v1338_v14 = vunpack.c.l.s8.bf16 %v711_v8 }
 0x20d   : > { %5933 = vmatpush1.bf16.msra.mxu0 %v7818_v17  ;;  %6097 = vmatpush1.bf16.msra.mxu1 %v7820_v18  ;;  %v1345_v17 = vunpack.c.l.s8.bf16 %v715_v9  ;;  %v1339_v18 = vunpack.c.h.s8.bf16 %v711_v8  ;;  %v1409_v9 = vunpack.c.h.s8.bf16 %v751_v3 }
 0x20e   : > { %5934 = vmatprep.subr.bf16.mxu0 %v7832_v23  ;;  %6098 = vmatprep.subr.bf16.mxu1 %v7834_v24  ;;  %v7898_v23 = vcombine.low %v1325_v4, %v1332_v5  ;;  %v1352_v24 = vunpack.c.l.s8.bf16 %v719_v20  ;;  %v755_v4 = vld [vmem:[%s9209_s14 + $0x70a] sm:$0xff] }
 0x20f   : > { %v7909_v33 = vcombine.low %v1338_v14, %v1345_v17  ;;  %v7911_v35 = vcombine.low %v1339_v18, %v1346_v19  ;;  %v1415_v8 = vunpack.c.l.s8.bf16 %v755_v4 }
 0x210   : > { %v7923_v36 = vcombine.high %v1352_v24, %v1359_v25  ;;  %v7922_v46 = vcombine.low %v1352_v24, %v1359_v25  ;;  %v767_v25 = vld [vmem:[%s9209_s14 + $0x758] sm:$0xff] }
 0x211   : > { %5935 = vmatpush1.bf16.msra.mxu0 %v7831_v27  ;;  %6099 = vmatpush1.bf16.msra.mxu1 %v7833_v28  ;;  %v1360_v27 = vunpack.c.h.s8.bf16 %v723_v21  ;;  %v7910_v28 = vcombine.high %v1338_v14, %v1345_v17  ;;  %v763_v14 = vld [vmem:[%s9209_s14 + $0x73e] sm:$0xff] }
 0x212   : > { %5936 = vmatprep.subr.bf16.mxu0 %v7845_v30  ;;  %6100 = vmatprep.subr.bf16.mxu1 %v7847_v31  ;;  %v7912_v30 = vcombine.high %v1339_v18, %v1346_v19  ;;  %v727_v31 = vld [vmem:[%s9209_s14 + $0x654] sm:$0xff]  ;;  %v1430_v24 = vunpack.c.h.s8.bf16 %v763_v14 }
 0x213   : > { %v7925_v37 = vcombine.high %v1353_v26, %v1360_v27  ;;  %v1366_v34 = vunpack.c.l.s8.bf16 %v727_v31 }
 0x215   : > { %5937 = vmatpush1.bf16.msra.mxu0 %v7844_v39  ;;  %6101 = vmatpush1.bf16.msra.mxu1 %v7846_v41  ;;  %v1373_v39 = vunpack.c.l.s8.bf16 %v731_v32  ;;  %v1367_v41 = vunpack.c.h.s8.bf16 %v727_v31  ;;  %v1437_v32 = vunpack.c.h.s8.bf16 %v767_v25 }
 0x216   : > { %5938 = vmatprep.subr.bf16.mxu0 %v7858_v47  ;;  %6102 = vmatprep.subr.bf16.mxu1 %v7860_v48  ;;  %v7924_v47 = vcombine.low %v1353_v26, %v1360_v27  ;;  %v1380_v48 = vunpack.c.l.s8.bf16 %v735_v44  ;;  %v771_v26 = vld [vmem:[%s9209_s14 + $0x772] sm:$0xff] }
 0x217   : > { %v7935_v57 = vcombine.low %v1366_v34, %v1373_v39  ;;  %v7937_v58 = vcombine.low %v1367_v41, %v1374_v43  ;;  %v1443_v31 = vunpack.c.l.s8.bf16 %v771_v26 }
 0x218   : > { %v7949_v59 = vcombine.high %v1380_v48, %v1387_v49  ;;  %v7948_v5 = vcombine.low %v1380_v48, %v1387_v49  ;;  %v783_v49 = vld [vmem:[%s9209_s14 + $0x7c0] sm:$0xff] }
 0x219   : > { %5939 = vmatpush1.bf16.msra.mxu0 %v7857_v53  ;;  %6103 = vmatpush1.bf16.msra.mxu1 %v7859_v54  ;;  %v1388_v53 = vunpack.c.h.s8.bf16 %v739_v45  ;;  %v7936_v54 = vcombine.high %v1366_v34, %v1373_v39  ;;  %v779_v34 = vld [vmem:[%s9209_s14 + $0x7a6] sm:$0xff] }
 0x21a   : > { %5940 = vmatprep.subr.bf16.mxu0 %v7871_v29  ;;  %6104 = vmatprep.subr.bf16.mxu1 %v7873_v38  ;;  %v7938_v29 = vcombine.high %v1367_v41, %v1374_v43  ;;  %v743_v38 = vld [vmem:[%s9209_s14 + $0x6bc] sm:$0xff]  ;;  %v1458_v48 = vunpack.c.h.s8.bf16 %v779_v34 }
 0x21b   : > { %v7951_v60 = vcombine.high %v1381_v52, %v1388_v53  ;;  %v1394_v61 = vunpack.c.l.s8.bf16 %v743_v38 }
 0x21d   : > { %5941 = vmatpush1.bf16.msra.mxu0 %v7870_v0  ;;  %6105 = vmatpush1.bf16.msra.mxu1 %v7872_v1  ;;  %v1401_v0 = vunpack.c.l.s8.bf16 %v747_v56  ;;  %v1395_v1 = vunpack.c.h.s8.bf16 %v743_v38  ;;  %v1465_v56 = vunpack.c.h.s8.bf16 %v783_v49 }
 0x21e   : > { %5942 = vmatprep.subr.bf16.mxu0 %v7884_v6  ;;  %6106 = vmatprep.subr.bf16.mxu1 %v7886_v7  ;;  %v7950_v6 = vcombine.low %v1381_v52, %v1388_v53  ;;  %v1408_v7 = vunpack.c.l.s8.bf16 %v751_v3  ;;  %v787_v52 = vld [vmem:[%s9209_s14 + $0x7da] sm:$0xff] }
 0x21f   : > { %v7961_v17 = vcombine.low %v1394_v61, %v1401_v0  ;;  %v7963_v18 = vcombine.low %v1395_v1, %v1402_v2  ;;  %v1471_v38 = vunpack.c.l.s8.bf16 %v787_v52 }
 0x220   : > { %v7975_v19 = vcombine.high %v1408_v7, %v1415_v8  ;;  %v7974_v27 = vcombine.low %v1408_v7, %v1415_v8  ;;  %v799_v8 = vld [vmem:[%s9209_s14 + $0x828] sm:$0xff] }
 0x221   : > { %5943 = vmatpush1.bf16.msra.mxu0 %v7883_v40  ;;  %6107 = vmatpush1.bf16.msra.mxu1 %v7885_v11  ;;  %v1416_v40 = vunpack.c.h.s8.bf16 %v755_v4  ;;  %v7962_v11 = vcombine.high %v1394_v61, %v1401_v0  ;;  %v795_v61 = vld [vmem:[%s9209_s14 + $0x80e] sm:$0xff] }
 0x222   : > { %5944 = vmatprep.subr.bf16.mxu0 %v7897_v12  ;;  %6108 = vmatprep.subr.bf16.mxu1 %v7899_v13  ;;  %v7964_v12 = vcombine.high %v1395_v1, %v1402_v2  ;;  %v759_v13 = vld [vmem:[%s9209_s14 + $0x724] sm:$0xff]  ;;  %v1486_v7 = vunpack.c.h.s8.bf16 %v795_v61 }
 0x223   : > { %v7977_v20 = vcombine.high %v1409_v9, %v1416_v40  ;;  %v1422_v21 = vunpack.c.l.s8.bf16 %v759_v13 }
 0x225   : > { %5945 = vmatpush1.bf16.msra.mxu0 %v7896_v22  ;;  %6109 = vmatpush1.bf16.msra.mxu1 %v7898_v23  ;;  %v1429_v22 = vunpack.c.l.s8.bf16 %v763_v14  ;;  %v1423_v23 = vunpack.c.h.s8.bf16 %v759_v13  ;;  %v1493_v14 = vunpack.c.h.s8.bf16 %v799_v8 }
 0x226   : > { %5946 = vmatprep.subr.bf16.mxu0 %v7910_v28  ;;  %6110 = vmatprep.subr.bf16.mxu1 %v7912_v30  ;;  %v7976_v28 = vcombine.low %v1409_v9, %v1416_v40  ;;  %v1436_v30 = vunpack.c.l.s8.bf16 %v767_v25  ;;  %v803_v9 = vld [vmem:[%s9209_s14 + $0x842] sm:$0xff] }
 0x227   : > { %v7987_v39 = vcombine.low %v1422_v21, %v1429_v22  ;;  %v7989_v41 = vcombine.low %v1423_v23, %v1430_v24  ;;  %v1499_v13 = vunpack.c.l.s8.bf16 %v803_v9 }
 0x228   : > { %v8001_v43 = vcombine.high %v1436_v30, %v1443_v31  ;;  %v8000_v53 = vcombine.low %v1436_v30, %v1443_v31  ;;  %v815_v31 = vld [vmem:[%s9209_s14 + $0x890] sm:$0xff] }
 0x229   : > { %5947 = vmatpush1.bf16.msra.mxu0 %v7909_v33  ;;  %6111 = vmatpush1.bf16.msra.mxu1 %v7911_v35  ;;  %v1444_v33 = vunpack.c.h.s8.bf16 %v771_v26  ;;  %v7988_v35 = vcombine.high %v1422_v21, %v1429_v22  ;;  %v811_v21 = vld [vmem:[%s9209_s14 + $0x876] sm:$0xff] }
 0x22a   : > { %5948 = vmatprep.subr.bf16.mxu0 %v7923_v36  ;;  %6112 = vmatprep.subr.bf16.mxu1 %v7925_v37  ;;  %v7990_v36 = vcombine.high %v1423_v23, %v1430_v24  ;;  %v775_v37 = vld [vmem:[%s9209_s14 + $0x78c] sm:$0xff]  ;;  %v1514_v30 = vunpack.c.h.s8.bf16 %v811_v21 }
 0x22b   : > { %v8003_v44 = vcombine.high %v1437_v32, %v1444_v33  ;;  %v1450_v45 = vunpack.c.l.s8.bf16 %v775_v37 }
 0x22d   : > { %5949 = vmatpush1.bf16.msra.mxu0 %v7922_v46  ;;  %6113 = vmatpush1.bf16.msra.mxu1 %v7924_v47  ;;  %v1457_v46 = vunpack.c.l.s8.bf16 %v779_v34  ;;  %v1451_v47 = vunpack.c.h.s8.bf16 %v775_v37  ;;  %v1521_v34 = vunpack.c.h.s8.bf16 %v815_v31 }
 0x22e   : > { %5950 = vmatprep.subr.bf16.mxu0 %v7936_v54  ;;  %6114 = vmatprep.subr.bf16.mxu1 %v7938_v29  ;;  %v8002_v54 = vcombine.low %v1437_v32, %v1444_v33  ;;  %v1464_v29 = vunpack.c.l.s8.bf16 %v783_v49  ;;  %v819_v32 = vld [vmem:[%s9209_s14 + $0x8aa] sm:$0xff] }
 0x22f   : > { %v8013_v0 = vcombine.low %v1450_v45, %v1457_v46  ;;  %v8015_v1 = vcombine.low %v1451_v47, %v1458_v48  ;;  %v1527_v37 = vunpack.c.l.s8.bf16 %v819_v32 }
 0x230   : > { %v8027_v2 = vcombine.high %v1464_v29, %v1471_v38  ;;  %v8026_v40 = vcombine.low %v1464_v29, %v1471_v38  ;;  %v831_v38 = vld [vmem:[%s9209_s14 + $0x8f8] sm:$0xff] }
 0x231   : > { %5951 = vmatpush1.bf16.msra.mxu0 %v7935_v57  ;;  %6115 = vmatpush1.bf16.msra.mxu1 %v7937_v58  ;;  %v1472_v57 = vunpack.c.h.s8.bf16 %v787_v52  ;;  %v8014_v58 = vcombine.high %v1450_v45, %v1457_v46  ;;  %v827_v45 = vld [vmem:[%s9209_s14 + $0x8de] sm:$0xff] }
 0x232   : > { %5961 = vmatprep.subr.bf16.mxu0 %v7949_v59  ;;  %6125 = vmatprep.subr.bf16.mxu1 %v7951_v60  ;;  %v8016_v59 = vcombine.high %v1451_v47, %v1458_v48  ;;  %v791_v60 = vld [vmem:[%s9209_s14 + $0x7f4] sm:$0xff]  ;;  %v1542_v29 = vunpack.c.h.s8.bf16 %v827_v45 }
 0x233   : > { %v8029_v3 = vcombine.high %v1465_v56, %v1472_v57  ;;  %v1478_v4 = vunpack.c.l.s8.bf16 %v791_v60 }
 0x234   : > { %5953 = vmatmul.mubr.bf16.vlgmr.msra.gmra.mrb[4].mxu0 %v9351_v50  ;;  %6117 = vmatmul.mubr.bf16.vlgmr.msra.gmra.mrb[4].mxu1 %v9351_v50 }
 0x235   : > { %5962 = vmatpush1.bf16.msra.mxu0 %v7948_v5  ;;  %6126 = vmatpush1.bf16.msra.mxu1 %v7950_v6  ;;  %v1485_v5 = vunpack.c.l.s8.bf16 %v795_v61  ;;  %v1479_v6 = vunpack.c.h.s8.bf16 %v791_v60  ;;  %v1549_v61 = vunpack.c.h.s8.bf16 %v831_v38 }
 0x236   : > { %5963 = vmatprep.subr.bf16.mxu0 %v7962_v11  ;;  %6127 = vmatprep.subr.bf16.mxu1 %v7964_v12  ;;  %v8028_v11 = vcombine.low %v1465_v56, %v1472_v57  ;;  %v1492_v12 = vunpack.c.l.s8.bf16 %v799_v8  ;;  %v835_v56 = vld [vmem:[%s9209_s14 + $0x912] sm:$0xff] }
 0x237   : > { %5993 = vmatprep.mubr.bf16.mxu0 %v9356_v62  ;;  %6157 = vmatprep.mubr.bf16.mxu1 %v9356_v62  ;;  %v8039_v22 = vcombine.low %v1478_v4, %v1485_v5  ;;  %v8041_v23 = vcombine.low %v1479_v6, %v1486_v7  ;;  %v1555_v60 = vunpack.c.l.s8.bf16 %v835_v56 }
 0x238   : > { %v8053_v24 = vcombine.high %v1492_v12, %v1499_v13  ;;  %v8052_v33 = vcombine.low %v1492_v12, %v1499_v13  ;;  %v847_v13 = vld [vmem:[%s9209_s14 + $0x960] sm:$0xff] }
 0x239   : > { %5964 = vmatpush1.bf16.msra.mxu0 %v7961_v17  ;;  %6128 = vmatpush1.bf16.msra.mxu1 %v7963_v18  ;;  %v1500_v17 = vunpack.c.h.s8.bf16 %v803_v9  ;;  %v8040_v18 = vcombine.high %v1478_v4, %v1485_v5  ;;  %v843_v4 = vld [vmem:[%s9209_s14 + $0x946] sm:$0xff] }
 0x23a   : > { %5965 = vmatprep.subr.bf16.mxu0 %v7975_v19  ;;  %6129 = vmatprep.subr.bf16.mxu1 %v7977_v20  ;;  %v8042_v19 = vcombine.high %v1479_v6, %v1486_v7  ;;  %v807_v20 = vld [vmem:[%s9209_s14 + $0x85c] sm:$0xff]  ;;  %v1570_v12 = vunpack.c.h.s8.bf16 %v843_v4 }
 0x23b   : > { %v8055_v25 = vcombine.high %v1493_v14, %v1500_v17  ;;  %v1506_v26 = vunpack.c.l.s8.bf16 %v807_v20 }
 0x23d   : > { %5966 = vmatpush1.bf16.msra.mxu0 %v7974_v27  ;;  %6130 = vmatpush1.bf16.msra.mxu1 %v7976_v28  ;;  %v1513_v27 = vunpack.c.l.s8.bf16 %v811_v21  ;;  %v1507_v28 = vunpack.c.h.s8.bf16 %v807_v20  ;;  %v1577_v21 = vunpack.c.h.s8.bf16 %v847_v13 }
 0x23e   : > { %5967 = vmatprep.subr.bf16.mxu0 %v7988_v35  ;;  %6131 = vmatprep.subr.bf16.mxu1 %v7990_v36  ;;  %v8054_v35 = vcombine.low %v1493_v14, %v1500_v17  ;;  %v1520_v36 = vunpack.c.l.s8.bf16 %v815_v31  ;;  %v851_v14 = vld [vmem:[%s9209_s14 + $0x97a] sm:$0xff] }
 0x23f   : > { %v8065_v46 = vcombine.low %v1506_v26, %v1513_v27  ;;  %v8067_v47 = vcombine.low %v1507_v28, %v1514_v30  ;;  %v1583_v20 = vunpack.c.l.s8.bf16 %v851_v14 }
 0x240   : > { %v8079_v48 = vcombine.high %v1520_v36, %v1527_v37  ;;  %v8078_v57 = vcombine.low %v1520_v36, %v1527_v37  ;;  %v863_v37 = vld [vmem:[%s9209_s14 + $0x9c8] sm:$0xff] }
 0x241   : > { %5968 = vmatpush1.bf16.msra.mxu0 %v7987_v39  ;;  %6132 = vmatpush1.bf16.msra.mxu1 %v7989_v41  ;;  %v1528_v39 = vunpack.c.h.s8.bf16 %v819_v32  ;;  %v8066_v41 = vcombine.high %v1506_v26, %v1513_v27  ;;  %v859_v26 = vld [vmem:[%s9209_s14 + $0x9ae] sm:$0xff] }
 0x242   : > { %5969 = vmatprep.subr.bf16.mxu0 %v8001_v43  ;;  %6133 = vmatprep.subr.bf16.mxu1 %v8003_v44  ;;  %v8068_v43 = vcombine.high %v1507_v28, %v1514_v30  ;;  %v823_v44 = vld [vmem:[%s9209_s14 + $0x8c4] sm:$0xff]  ;;  %v1598_v36 = vunpack.c.h.s8.bf16 %v859_v26 }
 0x243   : > { %v8081_v49 = vcombine.high %v1521_v34, %v1528_v39  ;;  %v1534_v52 = vunpack.c.l.s8.bf16 %v823_v44 }
 0x245   : > { %5970 = vmatpush1.bf16.msra.mxu0 %v8000_v53  ;;  %6134 = vmatpush1.bf16.msra.mxu1 %v8002_v54  ;;  %v1541_v53 = vunpack.c.l.s8.bf16 %v827_v45  ;;  %v1535_v54 = vunpack.c.h.s8.bf16 %v823_v44  ;;  %v1605_v45 = vunpack.c.h.s8.bf16 %v863_v37 }
 0x246   : > { %5971 = vmatprep.subr.bf16.mxu0 %v8014_v58  ;;  %6135 = vmatprep.subr.bf16.mxu1 %v8016_v59  ;;  %v8080_v58 = vcombine.low %v1521_v34, %v1528_v39  ;;  %v1548_v59 = vunpack.c.l.s8.bf16 %v831_v38  ;;  %v867_v34 = vld [vmem:[%s9209_s14 + $0x9e2] sm:$0xff] }
 0x247   : > { %v8091_v5 = vcombine.low %v1534_v52, %v1541_v53  ;;  %v8093_v6 = vcombine.low %v1535_v54, %v1542_v29  ;;  %v1611_v44 = vunpack.c.l.s8.bf16 %v867_v34 }
 0x248   : > { %v8105_v7 = vcombine.high %v1548_v59, %v1555_v60  ;;  %v8104_v17 = vcombine.low %v1548_v59, %v1555_v60  ;;  %v879_v60 = vld [vmem:[%s9209_s14 + $0xa30] sm:$0xff] }
 0x249   : > { %5972 = vmatpush1.bf16.msra.mxu0 %v8013_v0  ;;  %6136 = vmatpush1.bf16.msra.mxu1 %v8015_v1  ;;  %v1556_v0 = vunpack.c.h.s8.bf16 %v835_v56  ;;  %v8092_v1 = vcombine.high %v1534_v52, %v1541_v53  ;;  %v875_v52 = vld [vmem:[%s9209_s14 + $0xa16] sm:$0xff] }
 0x24a   : > { %5973 = vmatprep.subr.bf16.mxu0 %v8027_v2  ;;  %6137 = vmatprep.subr.bf16.mxu1 %v8029_v3  ;;  %v8094_v2 = vcombine.high %v1535_v54, %v1542_v29  ;;  %v839_v3 = vld [vmem:[%s9209_s14 + $0x92c] sm:$0xff]  ;;  %v1626_v59 = vunpack.c.h.s8.bf16 %v875_v52 }
 0x24b   : > { %v8107_v8 = vcombine.high %v1549_v61, %v1556_v0  ;;  %v1562_v9 = vunpack.c.l.s8.bf16 %v839_v3 }
 0x24d   : > { %5974 = vmatpush1.bf16.msra.mxu0 %v8026_v40  ;;  %6138 = vmatpush1.bf16.msra.mxu1 %v8028_v11  ;;  %v1569_v40 = vunpack.c.l.s8.bf16 %v843_v4  ;;  %v1563_v11 = vunpack.c.h.s8.bf16 %v839_v3  ;;  %v1633_v4 = vunpack.c.h.s8.bf16 %v879_v60 }
 0x24e   : > { %5975 = vmatprep.subr.bf16.mxu0 %v8040_v18  ;;  %6139 = vmatprep.subr.bf16.mxu1 %v8042_v19  ;;  %v8106_v18 = vcombine.low %v1549_v61, %v1556_v0  ;;  %v1576_v19 = vunpack.c.l.s8.bf16 %v847_v13  ;;  %v883_v61 = vld [vmem:[%s9209_s14 + $0xa4a] sm:$0xff] }
 0x24f   : > { %v8117_v27 = vcombine.low %v1562_v9, %v1569_v40  ;;  %v8119_v28 = vcombine.low %v1563_v11, %v1570_v12  ;;  %v1639_v3 = vunpack.c.l.s8.bf16 %v883_v61 }
 0x250   : > { %v8131_v30 = vcombine.high %v1576_v19, %v1583_v20  ;;  %v8130_v39 = vcombine.low %v1576_v19, %v1583_v20  ;;  %v895_v20 = vld [vmem:[%s9209_s14 + $0xa98] sm:$0xff] }
 0x251   : > { %5976 = vmatpush1.bf16.msra.mxu0 %v8039_v22  ;;  %6140 = vmatpush1.bf16.msra.mxu1 %v8041_v23  ;;  %v1584_v22 = vunpack.c.h.s8.bf16 %v851_v14  ;;  %v8118_v23 = vcombine.high %v1562_v9, %v1569_v40  ;;  %v891_v9 = vld [vmem:[%s9209_s14 + $0xa7e] sm:$0xff] }
 0x252   : > { %5977 = vmatprep.subr.bf16.mxu0 %v8053_v24  ;;  %6141 = vmatprep.subr.bf16.mxu1 %v8055_v25  ;;  %v8120_v24 = vcombine.high %v1563_v11, %v1570_v12  ;;  %v855_v25 = vld [vmem:[%s9209_s14 + $0x994] sm:$0xff]  ;;  %v1654_v19 = vunpack.c.h.s8.bf16 %v891_v9 }
 0x253   : > { %v8133_v31 = vcombine.high %v1577_v21, %v1584_v22  ;;  %v1590_v32 = vunpack.c.l.s8.bf16 %v855_v25 }
 0x255   : > { %5978 = vmatpush1.bf16.msra.mxu0 %v8052_v33  ;;  %6142 = vmatpush1.bf16.msra.mxu1 %v8054_v35  ;;  %v1597_v33 = vunpack.c.l.s8.bf16 %v859_v26  ;;  %v1591_v35 = vunpack.c.h.s8.bf16 %v855_v25  ;;  %v1661_v26 = vunpack.c.h.s8.bf16 %v895_v20 }
 0x256   : > { %5979 = vmatprep.subr.bf16.mxu0 %v8066_v41  ;;  %6143 = vmatprep.subr.bf16.mxu1 %v8068_v43  ;;  %v8132_v41 = vcombine.low %v1577_v21, %v1584_v22  ;;  %v1604_v43 = vunpack.c.l.s8.bf16 %v863_v37  ;;  %v899_v21 = vld [vmem:[%s9209_s14 + $0xab2] sm:$0xff] }
 0x257   : > { %v8143_v53 = vcombine.low %v1590_v32, %v1597_v33  ;;  %v8145_v54 = vcombine.low %v1591_v35, %v1598_v36  ;;  %v1667_v25 = vunpack.c.l.s8.bf16 %v899_v21 }
 0x258   : > { %v8157_v29 = vcombine.high %v1604_v43, %v1611_v44  ;;  %v8156_v0 = vcombine.low %v1604_v43, %v1611_v44  ;;  %v911_v44 = vld [vmem:[%s9209_s14 + $0xb00] sm:$0xff] }
 0x259   : > { %5980 = vmatpush1.bf16.msra.mxu0 %v8065_v46  ;;  %6144 = vmatpush1.bf16.msra.mxu1 %v8067_v47  ;;  %v1612_v46 = vunpack.c.h.s8.bf16 %v867_v34  ;;  %v8144_v47 = vcombine.high %v1590_v32, %v1597_v33  ;;  %v907_v32 = vld [vmem:[%s9209_s14 + $0xae6] sm:$0xff] }
 0x25a   : > { %5981 = vmatprep.subr.bf16.mxu0 %v8079_v48  ;;  %6145 = vmatprep.subr.bf16.mxu1 %v8081_v49  ;;  %v8146_v48 = vcombine.high %v1591_v35, %v1598_v36  ;;  %v871_v49 = vld [vmem:[%s9209_s14 + $0x9fc] sm:$0xff]  ;;  %v1682_v43 = vunpack.c.h.s8.bf16 %v907_v32 }
 0x25b   : > { %v8159_v38 = vcombine.high %v1605_v45, %v1612_v46  ;;  %v1618_v56 = vunpack.c.l.s8.bf16 %v871_v49 }
 0x25d   : > { %5982 = vmatpush1.bf16.msra.mxu0 %v8078_v57  ;;  %6146 = vmatpush1.bf16.msra.mxu1 %v8080_v58  ;;  %v1625_v57 = vunpack.c.l.s8.bf16 %v875_v52  ;;  %v1619_v58 = vunpack.c.h.s8.bf16 %v871_v49  ;;  %v1689_v52 = vunpack.c.h.s8.bf16 %v911_v44 }
 0x25e   : > { %5983 = vmatprep.subr.bf16.mxu0 %v8092_v1  ;;  %6147 = vmatprep.subr.bf16.mxu1 %v8094_v2  ;;  %v8158_v1 = vcombine.low %v1605_v45, %v1612_v46  ;;  %v1632_v2 = vunpack.c.l.s8.bf16 %v879_v60  ;;  %v915_v45 = vld [vmem:[%s9209_s14 + $0xb1a] sm:$0xff] }
 0x25f   : > { %v8169_v40 = vcombine.low %v1618_v56, %v1625_v57  ;;  %v8171_v11 = vcombine.low %v1619_v58, %v1626_v59  ;;  %v1695_v49 = vunpack.c.l.s8.bf16 %v915_v45 }
 0x260   : > { %v8183_v12 = vcombine.high %v1632_v2, %v1639_v3  ;;  %v8182_v22 = vcombine.low %v1632_v2, %v1639_v3 }
 0x261   : > { %5984 = vmatpush1.bf16.msra.mxu0 %v8091_v5  ;;  %6148 = vmatpush1.bf16.msra.mxu1 %v8093_v6  ;;  %v1640_v5 = vunpack.c.h.s8.bf16 %v883_v61  ;;  %v8170_v6 = vcombine.high %v1618_v56, %v1625_v57  ;;  %v923_v56 = vld [vmem:[%s9209_s14 + $0xb4e] sm:$0xff] }
 0x262   : > { %5985 = vmatprep.subr.bf16.mxu0 %v8105_v7  ;;  %6149 = vmatprep.subr.bf16.mxu1 %v8107_v8  ;;  %v8172_v7 = vcombine.high %v1619_v58, %v1626_v59  ;;  %v887_v8 = vld [vmem:[%s9209_s14 + $0xa64] sm:$0xff]  ;;  %v1710_v3 = vunpack.c.h.s8.bf16 %v923_v56 }
 0x263   : > { %v8185_v13 = vcombine.high %v1633_v4, %v1640_v5  ;;  %v1646_v14 = vunpack.c.l.s8.bf16 %v887_v8  ;;  %v927_v61 = vld [vmem:[%s9209_s14 + $0xb68] sm:$0x55] }
 0x265   : > { %5986 = vmatpush1.bf16.msra.mxu0 %v8104_v17  ;;  %6150 = vmatpush1.bf16.msra.mxu1 %v8106_v18  ;;  %v1653_v17 = vunpack.c.l.s8.bf16 %v891_v9  ;;  %v1647_v18 = vunpack.c.h.s8.bf16 %v887_v8  ;;  %v1716_v8 = vunpack.c.l.s8.bf16 %v927_v61  ;;  %v1717_v9 = vunpack.c.h.s8.bf16 %v927_v61 }
 0x266   : > { %5987 = vmatprep.subr.bf16.mxu0 %v8118_v23  ;;  %6151 = vmatprep.subr.bf16.mxu1 %v8120_v24  ;;  %v8184_v23 = vcombine.low %v1633_v4, %v1640_v5  ;;  %v1660_v24 = vunpack.c.l.s8.bf16 %v895_v20  ;;  %v480_v20 = vld [vmem:[%s9209_s14 + $0x10] sm:$0xff] }
 0x267   : > { %v8195_v33 = vcombine.low %v1646_v14, %v1653_v17  ;;  %v8197_v35 = vcombine.low %v1647_v18, %v1654_v19 }
 0x268   : > { %v8209_v36 = vcombine.high %v1660_v24, %v1667_v25  ;;  %v8208_v46 = vcombine.low %v1660_v24, %v1667_v25  ;;  %v8260_v24 = vcombine.low %v1716_v8, %v1716_v8  ;;  %v8262_v25 = vcombine.low %v1717_v9, %v1717_v9 }
 0x269   : > { %5988 = vmatpush1.bf16.msra.mxu0 %v8117_v27  ;;  %6152 = vmatpush1.bf16.msra.mxu1 %v8119_v28  ;;  %v1668_v27 = vunpack.c.h.s8.bf16 %v899_v21  ;;  %v8196_v28 = vcombine.high %v1646_v14, %v1653_v17  ;;  %v484_v21 = vld [vmem:[%s9209_s14 + $0x2a] sm:$0xff] }
 0x26a   : > { %5989 = vmatprep.subr.bf16.mxu0 %v8131_v30  ;;  %6153 = vmatprep.subr.bf16.mxu1 %v8133_v31  ;;  %v8198_v30 = vcombine.high %v1647_v18, %v1654_v19  ;;  %v903_v31 = vld [vmem:[%s9209_s14 + $0xacc] sm:$0xff] }
 0x26b   : > { %v8211_v37 = vcombine.high %v1661_v26, %v1668_v27  ;;  %v1674_v34 = vunpack.c.l.s8.bf16 %v903_v31 }
 0x26d   : > { %5990 = vmatpush1.bf16.msra.mxu0 %v8130_v39  ;;  %6154 = vmatpush1.bf16.msra.mxu1 %v8132_v41  ;;  %v1681_v39 = vunpack.c.l.s8.bf16 %v907_v32  ;;  %v1675_v41 = vunpack.c.h.s8.bf16 %v903_v31  ;;  %v8261_v31 = vcombine.high %v1716_v8, %v1716_v8  ;;  %v8263_v32 = vcombine.high %v1717_v9, %v1717_v9  ;;  %v512_v9 = vld [vmem:[%s9209_s14 + $0xe0] sm:$0xff] }
 0x26e   : > { %5991 = vmatprep.subr.bf16.mxu0 %v8144_v47  ;;  %6155 = vmatprep.subr.bf16.mxu1 %v8146_v48  ;;  %v8210_v47 = vcombine.low %v1661_v26, %v1668_v27  ;;  %v1688_v48 = vunpack.c.l.s8.bf16 %v911_v44  ;;  %v934_v26 = vunpack.c.l.s8.bf16 %v480_v20  ;;  %v941_v27 = vunpack.c.l.s8.bf16 %v484_v21 }
 0x26f   : > { %v8221_v57 = vcombine.low %v1674_v34, %v1681_v39  ;;  %v8223_v58 = vcombine.low %v1675_v41, %v1682_v43 }
 0x270   : > { %v8235_v59 = vcombine.high %v1688_v48, %v1695_v49 }
 0x271   : > { %5992 = vmatpush1.bf16.msra.mxu0 %v8143_v53  ;;  %6156 = vmatpush1.bf16.msra.mxu1 %v8145_v54  ;;  %v1696_v53 = vunpack.c.h.s8.bf16 %v915_v45  ;;  %v8222_v54 = vcombine.high %v1674_v34, %v1681_v39  ;;  %v7537_v34 = vcombine.high %v934_v26, %v941_v27 }
 0x272   : > { %6002 = vmatprep.subr.bf16.mxu0 %v8157_v29  ;;  %6166 = vmatprep.subr.bf16.mxu1 %v8159_v38  ;;  %v8224_v29 = vcombine.high %v1675_v41, %v1682_v43  ;;  %v919_v38 = vld [vmem:[%s9209_s14 + $0xb34] sm:$0xff] }
 0x273   : > { %v8237_v60 = vcombine.high %v1689_v52, %v1696_v53  ;;  %v1703_v2 = vunpack.c.h.s8.bf16 %v919_v38 }
 0x274   : > { %5994 = vmatmul.mubr.bf16.vlgmr.msra.gmra.mrb[4].mxu0 %v9394_v42  ;;  %6158 = vmatmul.mubr.bf16.vlgmr.msra.gmra.mrb[4].mxu1 %v9394_v42 }
 0x275   : > { %6003 = vmatpush1.bf16.msra.mxu0 %v8156_v0  ;;  %6167 = vmatpush1.bf16.msra.mxu1 %v8158_v1  ;;  %v1702_v0 = vunpack.c.l.s8.bf16 %v919_v38  ;;  %v1709_v1 = vunpack.c.l.s8.bf16 %v923_v56  ;;  %v8250_v19 = vcombine.high %v1703_v2, %v1710_v3 }
 0x276   : > { %6004 = vmatprep.subr.bf16.mxu0 %v8170_v6  ;;  %6168 = vmatprep.subr.bf16.mxu1 %v8172_v7 }
 0x277   : > { %8274 = vmatprep.mubr.msk.bf16.mxu0 %vm5507_vm0, %v9400_v55  ;;  %8276 = vmatprep.mubr.msk.bf16.mxu1 %vm5507_vm0, %v9400_v55  ;;  %v8248_v18 = vcombine.high %v1702_v0, %v1709_v1 }
 0x279   : > { %6005 = vmatpush1.bf16.msra.mxu0 %v8169_v40  ;;  %6169 = vmatpush1.bf16.msra.mxu1 %v8171_v11 }
 0x27a   : > { %6006 = vmatprep.subr.bf16.mxu0 %v8183_v12  ;;  %6170 = vmatprep.subr.bf16.mxu1 %v8185_v13  ;;  %v8234_v12 = vcombine.low %v1688_v48, %v1695_v49  ;;  %v8236_v13 = vcombine.low %v1689_v52, %v1696_v53  ;;  %v7536_v48 = vcombine.low %v934_v26, %v941_v27 }
 0x27d   : > { %6007 = vmatpush1.bf16.msra.mxu0 %v8182_v22  ;;  %6171 = vmatpush1.bf16.msra.mxu1 %v8184_v23  ;;  %v8247_v22 = vcombine.low %v1702_v0, %v1709_v1  ;;  %v8249_v23 = vcombine.low %v1703_v2, %v1710_v3 }
 0x27e   : > { %6008 = vmatprep.subr.bf16.mxu0 %v8196_v28  ;;  %6172 = vmatprep.subr.bf16.mxu1 %v8198_v30  ;;  %v935_v28 = vunpack.c.h.s8.bf16 %v480_v20  ;;  %v942_v30 = vunpack.c.h.s8.bf16 %v484_v21  ;;  %v520_v21 = vld [vmem:[%s9209_s14 + $0x114] sm:$0xff] }
 0x27f   : > { %v1004_v27 = vunpack.c.l.s8.bf16 %v520_v21 }
 0x280   : > { %v7539_v39 = vcombine.high %v935_v28, %v942_v30  ;;  %v7538_v49 = vcombine.low %v935_v28, %v942_v30  ;;  %v1005_v30 = vunpack.c.h.s8.bf16 %v520_v21  ;;  %v564_v21 = vld [vmem:[%s9209_s14 + $0x232] sm:$0xff] }
 0x281   : > { %6009 = vmatpush1.bf16.msra.mxu0 %v8195_v33  ;;  %6173 = vmatpush1.bf16.msra.mxu1 %v8197_v35  ;;  %v488_v33 = vld [vmem:[%s9209_s14 + $0x44] sm:$0xff] }
 0x282   : > { %6010 = vmatprep.subr.bf16.mxu0 %v8209_v36  ;;  %6174 = vmatprep.subr.bf16.mxu1 %v8211_v37  ;;  %v492_v35 = vld [vmem:[%s9209_s14 + $0x5e] sm:$0xff]  ;;  %v5525_v36 = vsel %vm5511_vm1, %v8260_v24, 0  ;;  %v5531_v37 = vsel %vm5511_vm1, %v8262_v25, 0  ;;  %v948_v41 = vunpack.c.l.s8.bf16 %v488_v33  ;;  %v949_v44 = vunpack.c.h.s8.bf16 %v488_v33 }
 0x283   : > { %v955_v43 = vunpack.c.l.s8.bf16 %v492_v35  ;;  %v956_v45 = vunpack.c.h.s8.bf16 %v492_v35  ;;  %v532_v33 = vld [vmem:[%s9209_s14 + $0x162] sm:$0xff] }
 0x285   : > { %6011 = vmatpush1.bf16.msra.mxu0 %v8208_v46  ;;  %6175 = vmatpush1.bf16.msra.mxu1 %v8210_v47  ;;  %v496_v46 = vld [vmem:[%s9209_s14 + $0x78] sm:$0xff]  ;;  %v7550_v38 = vcombine.high %v948_v41, %v955_v43  ;;  %v7552_v56 = vcombine.high %v949_v44, %v956_v45 }
 0x286   : > { %6012 = vmatprep.subr.bf16.mxu0 %v8222_v54  ;;  %6176 = vmatprep.subr.bf16.mxu1 %v8224_v29  ;;  %v500_v47 = vld [vmem:[%s9209_s14 + $0x92] sm:$0xff]  ;;  %v962_v52 = vunpack.c.l.s8.bf16 %v496_v46  ;;  %v963_v54 = vunpack.c.h.s8.bf16 %v496_v46 }
 0x287   : > { %v9556_v4 = vpop.f32.mrb[0].mxu0  ;;  %v9558_v5 = vpop.f32.mrb[0].mxu1  ;;  %v969_v53 = vunpack.c.l.s8.bf16 %v500_v47  ;;  %v970_v29 = vunpack.c.h.s8.bf16 %v500_v47  ;;  %v540_v46 = vld [vmem:[%s9209_s14 + $0x196] sm:$0xff] }
 0x288   : > { %v9560_v6 = vpop.f32.mrb[1].mxu0  ;;  %v9562_v7 = vpop.f32.mrb[1].mxu1 }
 0x289   : > { %v5712_v40 = vpop.f32.mrb[2].mxu0  ;;  %v5876_v11 = vpop.f32.mrb[2].mxu1  ;;  %6013 = vmatpush1.bf16.msra.mxu0 %v8221_v57  ;;  %6177 = vmatpush1.bf16.msra.mxu1 %v8223_v58  ;;  %v504_v57 = vld [vmem:[%s9209_s14 + $0xac] sm:$0xff]  ;;  %v7563_v61 = vcombine.high %v962_v52, %v969_v53  ;;  %v7565_v0 = vcombine.high %v963_v54, %v970_v29 }
 0x28a   : > { %v5713_v14 = vpop.f32.mrb[3].mxu0  ;;  %v5877_v17 = vpop.f32.mrb[3].mxu1  ;;  %6014 = vmatprep.subr.bf16.mxu0 %v8235_v59  ;;  %6178 = vmatprep.subr.bf16.mxu1 %v8237_v60  ;;  %v508_v58 = vld [vmem:[%s9209_s14 + $0xc6] sm:$0xff]  ;;  %v7549_v59 = vcombine.low %v948_v41, %v955_v43  ;;  %v7551_v60 = vcombine.low %v949_v44, %v956_v45  ;;  %v976_v1 = vunpack.c.l.s8.bf16 %v504_v57  ;;  %v977_v3 = vunpack.c.h.s8.bf16 %v504_v57  ;;  %v516_v40 = vld [vmem:[%s9209_s14 + $0xfa] sm:$0xff] }
 0x28b   : > { %v983_v2 = vunpack.c.l.s8.bf16 %v508_v58  ;;  %v984_v8 = vunpack.c.h.s8.bf16 %v508_v58  ;;  %v7562_v11 = vcombine.low %v962_v52, %v969_v53  ;;  %v997_v14 = vunpack.c.l.s8.bf16 %v516_v40  ;;  %v536_v45 = vld [vmem:[%s9209_s14 + $0x17c] sm:$0xff]  ;;  %v548_v57 = vld [vmem:[%s9209_s14 + $0x1ca] sm:$0xff] }
 0x28c   : > { %v991_v17 = vunpack.c.h.s8.bf16 %v512_v9  ;;  %v1026_v41 = vunpack.c.h.s8.bf16 %v532_v33  ;;  %v1032_v53 = vunpack.c.l.s8.bf16 %v536_v45 }
 0x28d   : > { %6015 = vmatpush1.bf16.msra.mxu0 %v8234_v12  ;;  %6179 = vmatpush1.bf16.msra.mxu1 %v8236_v13  ;;  %v7564_v12 = vcombine.low %v963_v54, %v970_v29  ;;  %v990_v13 = vunpack.c.l.s8.bf16 %v512_v9  ;;  %v7578_v20 = vcombine.high %v977_v3, %v984_v8  ;;  %v7577_v24 = vcombine.low %v977_v3, %v984_v8  ;;  %v552_v8 = vld [vmem:[%s9209_s14 + $0x1e4] sm:$0xff] }
 0x28e   : > { %6016 = vmatprep.subr.bf16.mxu0 %v8248_v18  ;;  %6180 = vmatprep.subr.bf16.mxu1 %v8250_v19  ;;  %v998_v18 = vunpack.c.h.s8.bf16 %v516_v40  ;;  %v7576_v19 = vcombine.high %v976_v1, %v983_v2  ;;  %v1039_v54 = vunpack.c.l.s8.bf16 %v540_v46  ;;  %v1033_v29 = vunpack.c.h.s8.bf16 %v536_v45  ;;  %v556_v9 = vld [vmem:[%s9209_s14 + $0x1fe] sm:$0xff] }
 0x28f   : > { %v7589_v25 = vcombine.high %v990_v13, %v997_v14  ;;  %v7588_v35 = vcombine.low %v990_v13, %v997_v14  ;;  %v1060_v14 = vunpack.c.l.s8.bf16 %v552_v8  ;;  %v580_v45 = vld [vmem:[%s9209_s14 + $0x29a] sm:$0xff] }
 0x290   : > { %v7591_v26 = vcombine.high %v991_v17, %v998_v18  ;;  %v7627_v40 = vcombine.low %v1032_v53, %v1039_v54 }
 0x291   : > { %6017 = vmatpush1.bf16.msra.mxu0 %v8247_v22  ;;  %6181 = vmatpush1.bf16.msra.mxu1 %v8249_v23  ;;  %v524_v22 = vld [vmem:[%s9209_s14 + $0x12e] sm:$0xff]  ;;  %v7575_v23 = vcombine.low %v976_v1, %v983_v2  ;;  %v1054_v1 = vunpack.c.h.s8.bf16 %v548_v57  ;;  %v7628_v2 = vcombine.high %v1032_v53, %v1039_v54  ;;  %v1110_v53 = vunpack.c.h.s8.bf16 %v580_v45 }
 0x292   : > { %8273 = vmatprep.subr.msk.bf16.mxu0 %vm5511_vm1, %v8261_v31  ;;  %8275 = vmatprep.subr.msk.bf16.mxu1 %vm5511_vm1, %v8263_v32  ;;  %v1011_v28 = vunpack.c.l.s8.bf16 %v524_v22  ;;  %v1012_v31 = vunpack.c.h.s8.bf16 %v524_v22  ;;  %v528_v32 = vld [vmem:[%s9209_s14 + $0x148] sm:$0xff] }
 0x294   : > { %v7602_v43 = vcombine.high %v1004_v27, %v1011_v28  ;;  %v7604_v44 = vcombine.high %v1005_v30, %v1012_v31  ;;  %v7601_v47 = vcombine.low %v1004_v27, %v1011_v28  ;;  %v1082_v27 = vunpack.c.h.s8.bf16 %v564_v21 }
 0x295   : > { %6019 = vmatpush1.bf16.msra.mxu0 %v5525_v36  ;;  %6183 = vmatpush1.bf16.msra.mxu1 %v5531_v37  ;;  %v7590_v36 = vcombine.low %v991_v17, %v998_v18  ;;  %v1018_v37 = vunpack.c.l.s8.bf16 %v528_v32  ;;  %v1067_v17 = vunpack.c.l.s8.bf16 %v556_v9  ;;  %v1061_v18 = vunpack.c.h.s8.bf16 %v552_v8  ;;  %v596_v8 = vld [vmem:[%s9209_s14 + $0x302] sm:$0xff] }
 0x296   : > { %6207 = vmatprep.subr.bf16.mxu0 %v7537_v34  ;;  %6371 = vmatprep.subr.bf16.mxu1 %v7539_v39  ;;  %v1025_v34 = vunpack.c.l.s8.bf16 %v532_v33  ;;  %v1019_v39 = vunpack.c.h.s8.bf16 %v528_v32  ;;  %v572_v32 = vld [vmem:[%s9209_s14 + $0x266] sm:$0xff] }
 0x297   : > { %v7654_v28 = vcombine.high %v1060_v14, %v1067_v17  ;;  %v7653_v33 = vcombine.low %v1060_v14, %v1067_v17  ;;  %v1138_v14 = vunpack.c.h.s8.bf16 %v596_v8 }
 0x298   : > { %6035 = vmatmul.mubr.bf16.vlgmr.msra.gmra.mrb[4].mxu0 %v9429_v15  ;;  %6199 = vmatmul.mubr.bf16.vlgmr.msra.gmra.mrb[4].mxu1 %v9429_v15  ;;  %v7617_v52 = vcombine.high %v1019_v39, %v1026_v41  ;;  %v7614_v58 = vcombine.low %v1018_v37, %v1025_v34 }
 0x299   : > { %6208 = vmatpush1.bf16.msra.mxu0 %v7536_v48  ;;  %6372 = vmatpush1.bf16.msra.mxu1 %v7538_v49  ;;  %v7603_v48 = vcombine.low %v1005_v30, %v1012_v31  ;;  %v7615_v49 = vcombine.high %v1018_v37, %v1025_v34  ;;  %v568_v31 = vld [vmem:[%s9209_s14 + $0x24c] sm:$0xff] }
 0x29a   : > { %6209 = vmatprep.subr.bf16.mxu0 %v7550_v38  ;;  %6373 = vmatprep.subr.bf16.mxu1 %v7552_v56  ;;  %v1040_v38 = vunpack.c.h.s8.bf16 %v540_v46  ;;  %v544_v56 = vld [vmem:[%s9209_s14 + $0x1b0] sm:$0xff]  ;;  %v1088_v34 = vunpack.c.l.s8.bf16 %v568_v31 }
 0x29b   : > { %6239 = vmatprep.mubr.bf16.mxu0 %v9280_v51  ;;  %6403 = vmatprep.mubr.bf16.mxu1 %v9280_v51 }
 0x29c   : > { %v7630_v3 = vcombine.high %v1033_v29, %v1040_v38 }
 0x29d   : > { %6210 = vmatpush1.bf16.msra.mxu0 %v7549_v59  ;;  %6374 = vmatpush1.bf16.msra.mxu1 %v7551_v60  ;;  %v7616_v59 = vcombine.low %v1019_v39, %v1026_v41  ;;  %v1046_v60 = vunpack.c.l.s8.bf16 %v544_v56  ;;  %v1095_v39 = vunpack.c.l.s8.bf16 %v572_v32  ;;  %v1089_v41 = vunpack.c.h.s8.bf16 %v568_v31  ;;  %v612_v31 = vld [vmem:[%s9209_s14 + $0x36a] sm:$0xff] }
 0x29e   : > { %6211 = vmatprep.subr.bf16.mxu0 %v7563_v61  ;;  %6375 = vmatprep.subr.bf16.mxu1 %v7565_v0  ;;  %v1053_v61 = vunpack.c.l.s8.bf16 %v548_v57  ;;  %v1047_v0 = vunpack.c.h.s8.bf16 %v544_v56  ;;  %v588_v56 = vld [vmem:[%s9209_s14 + $0x2ce] sm:$0xff] }
 0x29f   : > { %v7680_v54 = vcombine.high %v1088_v34, %v1095_v39  ;;  %v7679_v57 = vcombine.low %v1088_v34, %v1095_v39  ;;  %v1166_v34 = vunpack.c.h.s8.bf16 %v612_v31 }
 0x2a0   : > { %v7643_v13 = vcombine.high %v1047_v0, %v1054_v1  ;;  %v7640_v22 = vcombine.low %v1046_v60, %v1053_v61 }
 0x2a1   : > { %6212 = vmatpush1.bf16.msra.mxu0 %v7562_v11  ;;  %6376 = vmatpush1.bf16.msra.mxu1 %v7564_v12  ;;  %v7629_v11 = vcombine.low %v1033_v29, %v1040_v38  ;;  %v7641_v12 = vcombine.high %v1046_v60, %v1053_v61  ;;  %v584_v38 = vld [vmem:[%s9209_s14 + $0x2b4] sm:$0xff] }
 0x2a2   : > { %6213 = vmatprep.subr.bf16.mxu0 %v7576_v19  ;;  %6377 = vmatprep.subr.bf16.mxu1 %v7578_v20  ;;  %v1068_v19 = vunpack.c.h.s8.bf16 %v556_v9  ;;  %v560_v20 = vld [vmem:[%s9209_s14 + $0x218] sm:$0xff]  ;;  %v1116_v61 = vunpack.c.l.s8.bf16 %v584_v38 }
 0x2a4   : > { %v7656_v30 = vcombine.high %v1061_v18, %v1068_v19 }
 0x2a5   : > { %6214 = vmatpush1.bf16.msra.mxu0 %v7575_v23  ;;  %6378 = vmatpush1.bf16.msra.mxu1 %v7577_v24  ;;  %v7642_v23 = vcombine.low %v1047_v0, %v1054_v1  ;;  %v1074_v24 = vunpack.c.l.s8.bf16 %v560_v20  ;;  %v1123_v0 = vunpack.c.l.s8.bf16 %v588_v56  ;;  %v1117_v1 = vunpack.c.h.s8.bf16 %v584_v38  ;;  %v628_v38 = vld [vmem:[%s9209_s14 + $0x3d2] sm:$0xff] }
 0x2a6   : > { %6215 = vmatprep.subr.bf16.mxu0 %v7589_v25  ;;  %6379 = vmatprep.subr.bf16.mxu1 %v7591_v26  ;;  %v1081_v25 = vunpack.c.l.s8.bf16 %v564_v21  ;;  %v1075_v26 = vunpack.c.h.s8.bf16 %v560_v20  ;;  %v604_v20 = vld [vmem:[%s9209_s14 + $0x336] sm:$0xff] }
 0x2a7   : > { %v7706_v17 = vcombine.high %v1116_v61, %v1123_v0  ;;  %v7705_v21 = vcombine.low %v1116_v61, %v1123_v0  ;;  %v1194_v61 = vunpack.c.h.s8.bf16 %v628_v38 }
 0x2a8   : > { %v7669_v37 = vcombine.high %v1075_v26, %v1082_v27  ;;  %v7666_v46 = vcombine.low %v1074_v24, %v1081_v25 }
 0x2a9   : > { %6216 = vmatpush1.bf16.msra.mxu0 %v7588_v35  ;;  %6380 = vmatpush1.bf16.msra.mxu1 %v7590_v36  ;;  %v7655_v35 = vcombine.low %v1061_v18, %v1068_v19  ;;  %v7667_v36 = vcombine.high %v1074_v24, %v1081_v25  ;;  %v600_v19 = vld [vmem:[%s9209_s14 + $0x31c] sm:$0xff] }
 0x2aa   : > { %6217 = vmatprep.subr.bf16.mxu0 %v7602_v43  ;;  %6381 = vmatprep.subr.bf16.mxu1 %v7604_v44  ;;  %v1096_v43 = vunpack.c.h.s8.bf16 %v572_v32  ;;  %v576_v44 = vld [vmem:[%s9209_s14 + $0x280] sm:$0xff]  ;;  %v1144_v25 = vunpack.c.l.s8.bf16 %v600_v19 }
 0x2ac   : > { %v7682_v29 = vcombine.high %v1089_v41, %v1096_v43 }
 0x2ad   : > { %6218 = vmatpush1.bf16.msra.mxu0 %v7601_v47  ;;  %6382 = vmatpush1.bf16.msra.mxu1 %v7603_v48  ;;  %v7668_v47 = vcombine.low %v1075_v26, %v1082_v27  ;;  %v1102_v48 = vunpack.c.l.s8.bf16 %v576_v44  ;;  %v1151_v26 = vunpack.c.l.s8.bf16 %v604_v20  ;;  %v1145_v27 = vunpack.c.h.s8.bf16 %v600_v19  ;;  %v644_v19 = vld [vmem:[%s9209_s14 + $0x43a] sm:$0xff] }
 0x2ae   : > { %6219 = vmatprep.subr.bf16.mxu0 %v7615_v49  ;;  %6383 = vmatprep.subr.bf16.mxu1 %v7617_v52  ;;  %v1109_v49 = vunpack.c.l.s8.bf16 %v580_v45  ;;  %v1103_v52 = vunpack.c.h.s8.bf16 %v576_v44  ;;  %v620_v44 = vld [vmem:[%s9209_s14 + $0x39e] sm:$0xff] }
 0x2af   : > { %v7732_v39 = vcombine.high %v1144_v25, %v1151_v26  ;;  %v7731_v45 = vcombine.low %v1144_v25, %v1151_v26  ;;  %v1222_v25 = vunpack.c.h.s8.bf16 %v644_v19 }
 0x2b0   : > { %v7695_v60 = vcombine.high %v1103_v52, %v1110_v53  ;;  %v7692_v9 = vcombine.low %v1102_v48, %v1109_v49 }
 0x2b1   : > { %6220 = vmatpush1.bf16.msra.mxu0 %v7614_v58  ;;  %6384 = vmatpush1.bf16.msra.mxu1 %v7616_v59  ;;  %v7681_v58 = vcombine.low %v1089_v41, %v1096_v43  ;;  %v7693_v59 = vcombine.high %v1102_v48, %v1109_v49  ;;  %v616_v43 = vld [vmem:[%s9209_s14 + $0x384] sm:$0xff] }
 0x2b2   : > { %6221 = vmatprep.subr.bf16.mxu0 %v7628_v2  ;;  %6385 = vmatprep.subr.bf16.mxu1 %v7630_v3  ;;  %v1124_v2 = vunpack.c.h.s8.bf16 %v588_v56  ;;  %v592_v3 = vld [vmem:[%s9209_s14 + $0x2e8] sm:$0xff]  ;;  %v1172_v49 = vunpack.c.l.s8.bf16 %v616_v43 }
 0x2b4   : > { %v7708_v18 = vcombine.high %v1117_v1, %v1124_v2 }
 0x2b5   : > { %6222 = vmatpush1.bf16.msra.mxu0 %v7627_v40  ;;  %6386 = vmatpush1.bf16.msra.mxu1 %v7629_v11  ;;  %v7694_v40 = vcombine.low %v1103_v52, %v1110_v53  ;;  %v1130_v11 = vunpack.c.l.s8.bf16 %v592_v3  ;;  %v1179_v52 = vunpack.c.l.s8.bf16 %v620_v44  ;;  %v1173_v53 = vunpack.c.h.s8.bf16 %v616_v43  ;;  %v660_v43 = vld [vmem:[%s9209_s14 + $0x4a2] sm:$0xff] }
 0x2b6   : > { %6223 = vmatprep.subr.bf16.mxu0 %v7641_v12  ;;  %6387 = vmatprep.subr.bf16.mxu1 %v7643_v13  ;;  %v1137_v12 = vunpack.c.l.s8.bf16 %v596_v8  ;;  %v1131_v13 = vunpack.c.h.s8.bf16 %v592_v3  ;;  %v636_v3 = vld [vmem:[%s9209_s14 + $0x406] sm:$0xff] }
 0x2b7   : > { %v7758_v0 = vcombine.high %v1172_v49, %v1179_v52  ;;  %v7757_v8 = vcombine.low %v1172_v49, %v1179_v52  ;;  %v1250_v49 = vunpack.c.h.s8.bf16 %v660_v43 }
 0x2b8   : > { %v7721_v24 = vcombine.high %v1131_v13, %v1138_v14  ;;  %v7718_v32 = vcombine.low %v1130_v11, %v1137_v12 }
 0x2b9   : > { %6224 = vmatpush1.bf16.msra.mxu0 %v7640_v22  ;;  %6388 = vmatpush1.bf16.msra.mxu1 %v7642_v23  ;;  %v7707_v22 = vcombine.low %v1117_v1, %v1124_v2  ;;  %v7719_v23 = vcombine.high %v1130_v11, %v1137_v12  ;;  %v632_v2 = vld [vmem:[%s9209_s14 + $0x3ec] sm:$0xff] }
 0x2ba   : > { %6225 = vmatprep.subr.bf16.mxu0 %v7654_v28  ;;  %6389 = vmatprep.subr.bf16.mxu1 %v7656_v30  ;;  %v1152_v28 = vunpack.c.h.s8.bf16 %v604_v20  ;;  %v608_v30 = vld [vmem:[%s9209_s14 + $0x350] sm:$0xff]  ;;  %v1200_v12 = vunpack.c.l.s8.bf16 %v632_v2 }
 0x2bc   : > { %v7734_v41 = vcombine.high %v1145_v27, %v1152_v28 }
 0x2bd   : > { %6226 = vmatpush1.bf16.msra.mxu0 %v7653_v33  ;;  %6390 = vmatpush1.bf16.msra.mxu1 %v7655_v35  ;;  %v7720_v33 = vcombine.low %v1131_v13, %v1138_v14  ;;  %v1158_v35 = vunpack.c.l.s8.bf16 %v608_v30  ;;  %v1207_v13 = vunpack.c.l.s8.bf16 %v636_v3  ;;  %v1201_v14 = vunpack.c.h.s8.bf16 %v632_v2  ;;  %v676_v2 = vld [vmem:[%s9209_s14 + $0x50a] sm:$0xff] }
 0x2be   : > { %6227 = vmatprep.subr.bf16.mxu0 %v7667_v36  ;;  %6391 = vmatprep.subr.bf16.mxu1 %v7669_v37  ;;  %v1165_v36 = vunpack.c.l.s8.bf16 %v612_v31  ;;  %v1159_v37 = vunpack.c.h.s8.bf16 %v608_v30  ;;  %v652_v30 = vld [vmem:[%s9209_s14 + $0x46e] sm:$0xff] }
 0x2bf   : > { %v7784_v26 = vcombine.high %v1200_v12, %v1207_v13  ;;  %v7783_v31 = vcombine.low %v1200_v12, %v1207_v13  ;;  %v1278_v12 = vunpack.c.h.s8.bf16 %v676_v2 }
 0x2c0   : > { %v7747_v48 = vcombine.high %v1159_v37, %v1166_v34  ;;  %v7744_v56 = vcombine.low %v1158_v35, %v1165_v36 }
 0x2c1   : > { %6228 = vmatpush1.bf16.msra.mxu0 %v7666_v46  ;;  %6392 = vmatpush1.bf16.msra.mxu1 %v7668_v47  ;;  %v7733_v46 = vcombine.low %v1145_v27, %v1152_v28  ;;  %v7745_v47 = vcombine.high %v1158_v35, %v1165_v36  ;;  %v648_v28 = vld [vmem:[%s9209_s14 + $0x454] sm:$0xff] }
 0x2c2   : > { %6229 = vmatprep.subr.bf16.mxu0 %v7680_v54  ;;  %6393 = vmatprep.subr.bf16.mxu1 %v7682_v29  ;;  %v1180_v54 = vunpack.c.h.s8.bf16 %v620_v44  ;;  %v624_v29 = vld [vmem:[%s9209_s14 + $0x3b8] sm:$0xff]  ;;  %v1228_v36 = vunpack.c.l.s8.bf16 %v648_v28 }
 0x2c4   : > { %v7760_v1 = vcombine.high %v1173_v53, %v1180_v54 }
 0x2c5   : > { %6230 = vmatpush1.bf16.msra.mxu0 %v7679_v57  ;;  %6394 = vmatpush1.bf16.msra.mxu1 %v7681_v58  ;;  %v7746_v57 = vcombine.low %v1159_v37, %v1166_v34  ;;  %v1186_v58 = vunpack.c.l.s8.bf16 %v624_v29  ;;  %v1235_v37 = vunpack.c.l.s8.bf16 %v652_v30  ;;  %v1229_v34 = vunpack.c.h.s8.bf16 %v648_v28  ;;  %v692_v28 = vld [vmem:[%s9209_s14 + $0x572] sm:$0xff] }
 0x2c6   : > { %6231 = vmatprep.subr.bf16.mxu0 %v7693_v59  ;;  %6395 = vmatprep.subr.bf16.mxu1 %v7695_v60  ;;  %v1193_v59 = vunpack.c.l.s8.bf16 %v628_v38  ;;  %v1187_v60 = vunpack.c.h.s8.bf16 %v624_v29  ;;  %v668_v29 = vld [vmem:[%s9209_s14 + $0x4d6] sm:$0xff] }
 0x2c7   : > { %v7810_v52 = vcombine.high %v1228_v36, %v1235_v37  ;;  %v7809_v38 = vcombine.low %v1228_v36, %v1235_v37  ;;  %v1306_v36 = vunpack.c.h.s8.bf16 %v692_v28 }
 0x2c8   : > { %v7773_v11 = vcombine.high %v1187_v60, %v1194_v61  ;;  %v7770_v20 = vcombine.low %v1186_v58, %v1193_v59 }
 0x2c9   : > { %6232 = vmatpush1.bf16.msra.mxu0 %v7692_v9  ;;  %6396 = vmatpush1.bf16.msra.mxu1 %v7694_v40  ;;  %v7759_v9 = vcombine.low %v1173_v53, %v1180_v54  ;;  %v7771_v40 = vcombine.high %v1186_v58, %v1193_v59  ;;  %v664_v54 = vld [vmem:[%s9209_s14 + $0x4bc] sm:$0xff] }
 0x2ca   : > { %6233 = vmatprep.subr.bf16.mxu0 %v7706_v17  ;;  %6397 = vmatprep.subr.bf16.mxu1 %v7708_v18  ;;  %v1208_v17 = vunpack.c.h.s8.bf16 %v636_v3  ;;  %v640_v18 = vld [vmem:[%s9209_s14 + $0x420] sm:$0xff]  ;;  %v1256_v59 = vunpack.c.l.s8.bf16 %v664_v54 }
 0x2cc   : > { %v7786_v27 = vcombine.high %v1201_v14, %v1208_v17 }
 0x2cd   : > { %6234 = vmatpush1.bf16.msra.mxu0 %v7705_v21  ;;  %6398 = vmatpush1.bf16.msra.mxu1 %v7707_v22  ;;  %v7772_v21 = vcombine.low %v1187_v60, %v1194_v61  ;;  %v1214_v22 = vunpack.c.l.s8.bf16 %v640_v18  ;;  %v1263_v60 = vunpack.c.l.s8.bf16 %v668_v29  ;;  %v1257_v61 = vunpack.c.h.s8.bf16 %v664_v54  ;;  %v708_v54 = vld [vmem:[%s9209_s14 + $0x5da] sm:$0xff] }
 0x2ce   : > { %6235 = vmatprep.subr.bf16.mxu0 %v7719_v23  ;;  %6399 = vmatprep.subr.bf16.mxu1 %v7721_v24  ;;  %v1221_v23 = vunpack.c.l.s8.bf16 %v644_v19  ;;  %v1215_v24 = vunpack.c.h.s8.bf16 %v640_v18  ;;  %v684_v18 = vld [vmem:[%s9209_s14 + $0x53e] sm:$0xff] }
 0x2cf   : > { %v7836_v13 = vcombine.high %v1256_v59, %v1263_v60  ;;  %v7835_v19 = vcombine.low %v1256_v59, %v1263_v60  ;;  %v1334_v59 = vunpack.c.h.s8.bf16 %v708_v54 }
 0x2d0   : > { %v7799_v35 = vcombine.high %v1215_v24, %v1222_v25  ;;  %v7796_v44 = vcombine.low %v1214_v22, %v1221_v23 }
 0x2d1   : > { %6236 = vmatpush1.bf16.msra.mxu0 %v7718_v32  ;;  %6400 = vmatpush1.bf16.msra.mxu1 %v7720_v33  ;;  %v7785_v32 = vcombine.low %v1201_v14, %v1208_v17  ;;  %v7797_v33 = vcombine.high %v1214_v22, %v1221_v23  ;;  %v680_v17 = vld [vmem:[%s9209_s14 + $0x524] sm:$0xff] }
 0x2d2   : > { %6237 = vmatprep.subr.bf16.mxu0 %v7732_v39  ;;  %6401 = vmatprep.subr.bf16.mxu1 %v7734_v41  ;;  %v1236_v39 = vunpack.c.h.s8.bf16 %v652_v30  ;;  %v656_v41 = vld [vmem:[%s9209_s14 + $0x488] sm:$0xff]  ;;  %v1284_v23 = vunpack.c.l.s8.bf16 %v680_v17 }
 0x2d4   : > { %v7812_v53 = vcombine.high %v1229_v34, %v1236_v39 }
 0x2d5   : > { %6238 = vmatpush1.bf16.msra.mxu0 %v7731_v45  ;;  %6402 = vmatpush1.bf16.msra.mxu1 %v7733_v46  ;;  %v7798_v45 = vcombine.low %v1215_v24, %v1222_v25  ;;  %v1242_v46 = vunpack.c.l.s8.bf16 %v656_v41  ;;  %v1291_v24 = vunpack.c.l.s8.bf16 %v684_v18  ;;  %v1285_v25 = vunpack.c.h.s8.bf16 %v680_v17  ;;  %v724_v17 = vld [vmem:[%s9209_s14 + $0x642] sm:$0xff] }
 0x2d6   : > { %6248 = vmatprep.subr.bf16.mxu0 %v7745_v47  ;;  %6412 = vmatprep.subr.bf16.mxu1 %v7747_v48  ;;  %v1249_v47 = vunpack.c.l.s8.bf16 %v660_v43  ;;  %v1243_v48 = vunpack.c.h.s8.bf16 %v656_v41  ;;  %v700_v41 = vld [vmem:[%s9209_s14 + $0x5a6] sm:$0xff] }
 0x2d7   : > { %v7862_v37 = vcombine.high %v1284_v23, %v1291_v24  ;;  %v7861_v43 = vcombine.low %v1284_v23, %v1291_v24  ;;  %v1362_v23 = vunpack.c.h.s8.bf16 %v724_v17 }
 0x2d8   : > { %6240 = vmatmul.mubr.bf16.vlgmr.msra.gmra.mrb[8].mxu0 %v9300_v63  ;;  %6404 = vmatmul.mubr.bf16.vlgmr.msra.gmra.mrb[8].mxu1 %v9300_v63  ;;  %v7825_v58 = vcombine.high %v1243_v48, %v1250_v49  ;;  %v7822_v3 = vcombine.low %v1242_v46, %v1249_v47 }
 0x2d9   : > { %6249 = vmatpush1.bf16.msra.mxu0 %v7744_v56  ;;  %6413 = vmatpush1.bf16.msra.mxu1 %v7746_v57  ;;  %v7811_v56 = vcombine.low %v1229_v34, %v1236_v39  ;;  %v7823_v57 = vcombine.high %v1242_v46, %v1249_v47  ;;  %v696_v39 = vld [vmem:[%s9209_s14 + $0x58c] sm:$0xff] }
 0x2da   : > { %6250 = vmatprep.subr.bf16.mxu0 %v7758_v0  ;;  %6414 = vmatprep.subr.bf16.mxu1 %v7760_v1  ;;  %v1264_v0 = vunpack.c.h.s8.bf16 %v668_v29  ;;  %v672_v1 = vld [vmem:[%s9209_s14 + $0x4f0] sm:$0xff]  ;;  %v1312_v47 = vunpack.c.l.s8.bf16 %v696_v39 }
 0x2db   : > { %6280 = vmatprep.mubr.bf16.mxu0 %v9306_v10  ;;  %6444 = vmatprep.mubr.bf16.mxu1 %v9306_v10 }
 0x2dc   : > { %v7838_v14 = vcombine.high %v1257_v61, %v1264_v0 }
 0x2dd   : > { %6251 = vmatpush1.bf16.msra.mxu0 %v7757_v8  ;;  %6415 = vmatpush1.bf16.msra.mxu1 %v7759_v9  ;;  %v7824_v8 = vcombine.low %v1243_v48, %v1250_v49  ;;  %v1270_v9 = vunpack.c.l.s8.bf16 %v672_v1  ;;  %v1319_v48 = vunpack.c.l.s8.bf16 %v700_v41  ;;  %v1313_v49 = vunpack.c.h.s8.bf16 %v696_v39  ;;  %v740_v39 = vld [vmem:[%s9209_s14 + $0x6aa] sm:$0xff] }
 0x2de   : > { %6252 = vmatprep.subr.bf16.mxu0 %v7771_v40  ;;  %6416 = vmatprep.subr.bf16.mxu1 %v7773_v11  ;;  %v1277_v40 = vunpack.c.l.s8.bf16 %v676_v2  ;;  %v1271_v11 = vunpack.c.h.s8.bf16 %v672_v1  ;;  %v716_v1 = vld [vmem:[%s9209_s14 + $0x60e] sm:$0xff] }
 0x2df   : > { %v7888_v60 = vcombine.high %v1312_v47, %v1319_v48  ;;  %v7887_v2 = vcombine.low %v1312_v47, %v1319_v48  ;;  %v1390_v47 = vunpack.c.h.s8.bf16 %v740_v39 }
 0x2e0   : > { %v7851_v22 = vcombine.high %v1271_v11, %v1278_v12  ;;  %v7848_v30 = vcombine.low %v1270_v9, %v1277_v40 }
 0x2e1   : > { %6253 = vmatpush1.bf16.msra.mxu0 %v7770_v20  ;;  %6417 = vmatpush1.bf16.msra.mxu1 %v7772_v21  ;;  %v7837_v20 = vcombine.low %v1257_v61, %v1264_v0  ;;  %v7849_v21 = vcombine.high %v1270_v9, %v1277_v40  ;;  %v712_v0 = vld [vmem:[%s9209_s14 + $0x5f4] sm:$0xff] }
 0x2e2   : > { %6254 = vmatprep.subr.bf16.mxu0 %v7784_v26  ;;  %6418 = vmatprep.subr.bf16.mxu1 %v7786_v27  ;;  %v1292_v26 = vunpack.c.h.s8.bf16 %v684_v18  ;;  %v688_v27 = vld [vmem:[%s9209_s14 + $0x558] sm:$0xff]  ;;  %v1340_v40 = vunpack.c.l.s8.bf16 %v712_v0 }
 0x2e4   : > { %v7864_v34 = vcombine.high %v1285_v25, %v1292_v26 }
 0x2e5   : > { %6255 = vmatpush1.bf16.msra.mxu0 %v7783_v31  ;;  %6419 = vmatpush1.bf16.msra.mxu1 %v7785_v32  ;;  %v7850_v31 = vcombine.low %v1271_v11, %v1278_v12  ;;  %v1298_v32 = vunpack.c.l.s8.bf16 %v688_v27  ;;  %v1347_v11 = vunpack.c.l.s8.bf16 %v716_v1  ;;  %v1341_v12 = vunpack.c.h.s8.bf16 %v712_v0  ;;  %v756_v0 = vld [vmem:[%s9209_s14 + $0x712] sm:$0xff] }
 0x2e6   : > { %6256 = vmatprep.subr.bf16.mxu0 %v7797_v33  ;;  %6420 = vmatprep.subr.bf16.mxu1 %v7799_v35  ;;  %v1305_v33 = vunpack.c.l.s8.bf16 %v692_v28  ;;  %v1299_v35 = vunpack.c.h.s8.bf16 %v688_v27  ;;  %v732_v27 = vld [vmem:[%s9209_s14 + $0x676] sm:$0xff] }
 0x2e7   : > { %v7914_v24 = vcombine.high %v1340_v40, %v1347_v11  ;;  %v7913_v28 = vcombine.low %v1340_v40, %v1347_v11  ;;  %v1418_v40 = vunpack.c.h.s8.bf16 %v756_v0 }
 0x2e8   : > { %v7877_v46 = vcombine.high %v1299_v35, %v1306_v36  ;;  %v7874_v29 = vcombine.low %v1298_v32, %v1305_v33 }
 0x2e9   : > { %6257 = vmatpush1.bf16.msra.mxu0 %v7796_v44  ;;  %6421 = vmatpush1.bf16.msra.mxu1 %v7798_v45  ;;  %v7863_v44 = vcombine.low %v1285_v25, %v1292_v26  ;;  %v7875_v45 = vcombine.high %v1298_v32, %v1305_v33  ;;  %v728_v26 = vld [vmem:[%s9209_s14 + $0x65c] sm:$0xff] }
 0x2ea   : > { %6258 = vmatprep.subr.bf16.mxu0 %v7810_v52  ;;  %6422 = vmatprep.subr.bf16.mxu1 %v7812_v53  ;;  %v1320_v52 = vunpack.c.h.s8.bf16 %v700_v41  ;;  %v704_v53 = vld [vmem:[%s9209_s14 + $0x5c0] sm:$0xff]  ;;  %v1368_v33 = vunpack.c.l.s8.bf16 %v728_v26 }
 0x2ec   : > { %v7890_v61 = vcombine.high %v1313_v49, %v1320_v52 }
 0x2ed   : > { %6259 = vmatpush1.bf16.msra.mxu0 %v7809_v38  ;;  %6423 = vmatpush1.bf16.msra.mxu1 %v7811_v56  ;;  %v7876_v38 = vcombine.low %v1299_v35, %v1306_v36  ;;  %v1326_v56 = vunpack.c.l.s8.bf16 %v704_v53  ;;  %v1375_v35 = vunpack.c.l.s8.bf16 %v732_v27  ;;  %v1369_v36 = vunpack.c.h.s8.bf16 %v728_v26  ;;  %v772_v26 = vld [vmem:[%s9209_s14 + $0x77a] sm:$0xff] }
 0x2ee   : > { %6260 = vmatprep.subr.bf16.mxu0 %v7823_v57  ;;  %6424 = vmatprep.subr.bf16.mxu1 %v7825_v58  ;;  %v1333_v57 = vunpack.c.l.s8.bf16 %v708_v54  ;;  %v1327_v58 = vunpack.c.h.s8.bf16 %v704_v53  ;;  %v748_v53 = vld [vmem:[%s9209_s14 + $0x6de] sm:$0xff] }
 0x2ef   : > { %v7940_v48 = vcombine.high %v1368_v33, %v1375_v35  ;;  %v7939_v54 = vcombine.low %v1368_v33, %v1375_v35  ;;  %v1446_v33 = vunpack.c.h.s8.bf16 %v772_v26 }
 0x2f0   : > { %v7903_v9 = vcombine.high %v1327_v58, %v1334_v59  ;;  %v7900_v18 = vcombine.low %v1326_v56, %v1333_v57 }
 0x2f1   : > { %6261 = vmatpush1.bf16.msra.mxu0 %v7822_v3  ;;  %6425 = vmatpush1.bf16.msra.mxu1 %v7824_v8  ;;  %v7889_v3 = vcombine.low %v1313_v49, %v1320_v52  ;;  %v7901_v8 = vcombine.high %v1326_v56, %v1333_v57  ;;  %v744_v52 = vld [vmem:[%s9209_s14 + $0x6c4] sm:$0xff] }
 0x2f2   : > { %6262 = vmatprep.subr.bf16.mxu0 %v7836_v13  ;;  %6426 = vmatprep.subr.bf16.mxu1 %v7838_v14  ;;  %v1348_v13 = vunpack.c.h.s8.bf16 %v716_v1  ;;  %v720_v14 = vld [vmem:[%s9209_s14 + $0x628] sm:$0xff]  ;;  %v1396_v57 = vunpack.c.l.s8.bf16 %v744_v52 }
 0x2f4   : > { %v7916_v25 = vcombine.high %v1341_v12, %v1348_v13 }
 0x2f5   : > { %6263 = vmatpush1.bf16.msra.mxu0 %v7835_v19  ;;  %6427 = vmatpush1.bf16.msra.mxu1 %v7837_v20  ;;  %v7902_v19 = vcombine.low %v1327_v58, %v1334_v59  ;;  %v1354_v20 = vunpack.c.l.s8.bf16 %v720_v14  ;;  %v1403_v58 = vunpack.c.l.s8.bf16 %v748_v53  ;;  %v1397_v59 = vunpack.c.h.s8.bf16 %v744_v52  ;;  %v788_v52 = vld [vmem:[%s9209_s14 + $0x7e2] sm:$0xff] }
 0x2f6   : > { %6264 = vmatprep.subr.bf16.mxu0 %v7849_v21  ;;  %6428 = vmatprep.subr.bf16.mxu1 %v7851_v22  ;;  %v1361_v21 = vunpack.c.l.s8.bf16 %v724_v17  ;;  %v1355_v22 = vunpack.c.h.s8.bf16 %v720_v14  ;;  %v764_v14 = vld [vmem:[%s9209_s14 + $0x746] sm:$0xff] }
 0x2f7   : > { %v7966_v11 = vcombine.high %v1396_v57, %v1403_v58  ;;  %v7965_v17 = vcombine.low %v1396_v57, %v1403_v58  ;;  %v1474_v57 = vunpack.c.h.s8.bf16 %v788_v52 }
 0x2f8   : > { %v7929_v32 = vcombine.high %v1355_v22, %v1362_v23  ;;  %v7926_v41 = vcombine.low %v1354_v20, %v1361_v21 }
 0x2f9   : > { %6265 = vmatpush1.bf16.msra.mxu0 %v7848_v30  ;;  %6429 = vmatpush1.bf16.msra.mxu1 %v7850_v31  ;;  %v7915_v30 = vcombine.low %v1341_v12, %v1348_v13  ;;  %v7927_v31 = vcombine.high %v1354_v20, %v1361_v21  ;;  %v760_v13 = vld [vmem:[%s9209_s14 + $0x72c] sm:$0xff] }
 0x2fa   : > { %6266 = vmatprep.subr.bf16.mxu0 %v7862_v37  ;;  %6430 = vmatprep.subr.bf16.mxu1 %v7864_v34  ;;  %v1376_v37 = vunpack.c.h.s8.bf16 %v732_v27  ;;  %v736_v34 = vld [vmem:[%s9209_s14 + $0x690] sm:$0xff]  ;;  %v1424_v21 = vunpack.c.l.s8.bf16 %v760_v13 }
 0x2fc   : > { %v7942_v49 = vcombine.high %v1369_v36, %v1376_v37 }
 0x2fd   : > { %6267 = vmatpush1.bf16.msra.mxu0 %v7861_v43  ;;  %6431 = vmatpush1.bf16.msra.mxu1 %v7863_v44  ;;  %v7928_v43 = vcombine.low %v1355_v22, %v1362_v23  ;;  %v1382_v44 = vunpack.c.l.s8.bf16 %v736_v34  ;;  %v1431_v22 = vunpack.c.l.s8.bf16 %v764_v14  ;;  %v1425_v23 = vunpack.c.h.s8.bf16 %v760_v13  ;;  %v804_v13 = vld [vmem:[%s9209_s14 + $0x84a] sm:$0xff] }
 0x2fe   : > { %6268 = vmatprep.subr.bf16.mxu0 %v7875_v45  ;;  %6432 = vmatprep.subr.bf16.mxu1 %v7877_v46  ;;  %v1389_v45 = vunpack.c.l.s8.bf16 %v740_v39  ;;  %v1383_v46 = vunpack.c.h.s8.bf16 %v736_v34  ;;  %v780_v34 = vld [vmem:[%s9209_s14 + $0x7ae] sm:$0xff] }
 0x2ff   : > { %v7992_v35 = vcombine.high %v1424_v21, %v1431_v22  ;;  %v7991_v39 = vcombine.low %v1424_v21, %v1431_v22  ;;  %v1502_v21 = vunpack.c.h.s8.bf16 %v804_v13 }
 0x300   : > { %v7955_v56 = vcombine.high %v1383_v46, %v1390_v47  ;;  %v7952_v1 = vcombine.low %v1382_v44, %v1389_v45 }
 0x301   : > { %6269 = vmatpush1.bf16.msra.mxu0 %v7874_v29  ;;  %6433 = vmatpush1.bf16.msra.mxu1 %v7876_v38  ;;  %v7941_v29 = vcombine.low %v1369_v36, %v1376_v37  ;;  %v7953_v38 = vcombine.high %v1382_v44, %v1389_v45  ;;  %v776_v37 = vld [vmem:[%s9209_s14 + $0x794] sm:$0xff] }
 0x302   : > { %6270 = vmatprep.subr.bf16.mxu0 %v7888_v60  ;;  %6434 = vmatprep.subr.bf16.mxu1 %v7890_v61  ;;  %v1404_v60 = vunpack.c.h.s8.bf16 %v748_v53  ;;  %v752_v61 = vld [vmem:[%s9209_s14 + $0x6f8] sm:$0xff]  ;;  %v1452_v45 = vunpack.c.l.s8.bf16 %v776_v37 }
 0x304   : > { %v7968_v12 = vcombine.high %v1397_v59, %v1404_v60 }
 0x305   : > { %6271 = vmatpush1.bf16.msra.mxu0 %v7887_v2  ;;  %6435 = vmatpush1.bf16.msra.mxu1 %v7889_v3  ;;  %v7954_v2 = vcombine.low %v1383_v46, %v1390_v47  ;;  %v1410_v3 = vunpack.c.l.s8.bf16 %v752_v61  ;;  %v1459_v46 = vunpack.c.l.s8.bf16 %v780_v34  ;;  %v1453_v47 = vunpack.c.h.s8.bf16 %v776_v37  ;;  %v820_v37 = vld [vmem:[%s9209_s14 + $0x8b2] sm:$0xff] }
 0x306   : > { %6272 = vmatprep.subr.bf16.mxu0 %v7901_v8  ;;  %6436 = vmatprep.subr.bf16.mxu1 %v7903_v9  ;;  %v1417_v8 = vunpack.c.l.s8.bf16 %v756_v0  ;;  %v1411_v9 = vunpack.c.h.s8.bf16 %v752_v61  ;;  %v796_v61 = vld [vmem:[%s9209_s14 + $0x816] sm:$0xff] }
 0x307   : > { %v8018_v58 = vcombine.high %v1452_v45, %v1459_v46  ;;  %v8017_v0 = vcombine.low %v1452_v45, %v1459_v46  ;;  %v1530_v45 = vunpack.c.h.s8.bf16 %v820_v37 }
 0x308   : > { %v7981_v20 = vcombine.high %v1411_v9, %v1418_v40  ;;  %v7978_v27 = vcombine.low %v1410_v3, %v1417_v8 }
 0x309   : > { %6273 = vmatpush1.bf16.msra.mxu0 %v7900_v18  ;;  %6437 = vmatpush1.bf16.msra.mxu1 %v7902_v19  ;;  %v7967_v18 = vcombine.low %v1397_v59, %v1404_v60  ;;  %v7979_v19 = vcombine.high %v1410_v3, %v1417_v8  ;;  %v792_v60 = vld [vmem:[%s9209_s14 + $0x7fc] sm:$0xff] }
 0x30a   : > { %6274 = vmatprep.subr.bf16.mxu0 %v7914_v24  ;;  %6438 = vmatprep.subr.bf16.mxu1 %v7916_v25  ;;  %v1432_v24 = vunpack.c.h.s8.bf16 %v764_v14  ;;  %v768_v25 = vld [vmem:[%s9209_s14 + $0x760] sm:$0xff]  ;;  %v1480_v8 = vunpack.c.l.s8.bf16 %v792_v60 }
 0x30c   : > { %v7994_v36 = vcombine.high %v1425_v23, %v1432_v24 }
 0x30d   : > { %6275 = vmatpush1.bf16.msra.mxu0 %v7913_v28  ;;  %6439 = vmatpush1.bf16.msra.mxu1 %v7915_v30  ;;  %v7980_v28 = vcombine.low %v1411_v9, %v1418_v40  ;;  %v1438_v30 = vunpack.c.l.s8.bf16 %v768_v25  ;;  %v1487_v9 = vunpack.c.l.s8.bf16 %v796_v61  ;;  %v1481_v40 = vunpack.c.h.s8.bf16 %v792_v60  ;;  %v836_v60 = vld [vmem:[%s9209_s14 + $0x91a] sm:$0xff] }
 0x30e   : > { %6276 = vmatprep.subr.bf16.mxu0 %v7927_v31  ;;  %6440 = vmatprep.subr.bf16.mxu1 %v7929_v32  ;;  %v1445_v31 = vunpack.c.l.s8.bf16 %v772_v26  ;;  %v1439_v32 = vunpack.c.h.s8.bf16 %v768_v25  ;;  %v812_v25 = vld [vmem:[%s9209_s14 + $0x87e] sm:$0xff] }
 0x30f   : > { %v8044_v22 = vcombine.high %v1480_v8, %v1487_v9  ;;  %v8043_v26 = vcombine.low %v1480_v8, %v1487_v9  ;;  %v1558_v8 = vunpack.c.h.s8.bf16 %v836_v60 }
 0x310   : > { %v8007_v44 = vcombine.high %v1439_v32, %v1446_v33  ;;  %v8004_v53 = vcombine.low %v1438_v30, %v1445_v31 }
 0x311   : > { %6277 = vmatpush1.bf16.msra.mxu0 %v7926_v41  ;;  %6441 = vmatpush1.bf16.msra.mxu1 %v7928_v43  ;;  %v7993_v41 = vcombine.low %v1425_v23, %v1432_v24  ;;  %v8005_v43 = vcombine.high %v1438_v30, %v1445_v31  ;;  %v808_v24 = vld [vmem:[%s9209_s14 + $0x864] sm:$0xff] }
 0x312   : > { %6278 = vmatprep.subr.bf16.mxu0 %v7940_v48  ;;  %6442 = vmatprep.subr.bf16.mxu1 %v7942_v49  ;;  %v1460_v48 = vunpack.c.h.s8.bf16 %v780_v34  ;;  %v784_v49 = vld [vmem:[%s9209_s14 + $0x7c8] sm:$0xff]  ;;  %v1508_v31 = vunpack.c.l.s8.bf16 %v808_v24 }
 0x314   : > { %v8020_v59 = vcombine.high %v1453_v47, %v1460_v48 }
 0x315   : > { %6279 = vmatpush1.bf16.msra.mxu0 %v7939_v54  ;;  %6443 = vmatpush1.bf16.msra.mxu1 %v7941_v29  ;;  %v8006_v54 = vcombine.low %v1439_v32, %v1446_v33  ;;  %v1466_v29 = vunpack.c.l.s8.bf16 %v784_v49  ;;  %v1515_v32 = vunpack.c.l.s8.bf16 %v812_v25  ;;  %v1509_v33 = vunpack.c.h.s8.bf16 %v808_v24  ;;  %v852_v24 = vld [vmem:[%s9209_s14 + $0x982] sm:$0xff] }
 0x316   : > { %6289 = vmatprep.subr.bf16.mxu0 %v7953_v38  ;;  %6453 = vmatprep.subr.bf16.mxu1 %v7955_v56  ;;  %v1473_v38 = vunpack.c.l.s8.bf16 %v788_v52  ;;  %v1467_v56 = vunpack.c.h.s8.bf16 %v784_v49  ;;  %v828_v49 = vld [vmem:[%s9209_s14 + $0x8e6] sm:$0xff] }
 0x317   : > { %v8070_v46 = vcombine.high %v1508_v31, %v1515_v32  ;;  %v8069_v52 = vcombine.low %v1508_v31, %v1515_v32  ;;  %v1586_v31 = vunpack.c.h.s8.bf16 %v852_v24 }
 0x318   : > { %6281 = vmatmul.mubr.bf16.vlgmr.msra.gmra.mrb[8].mxu0 %v9351_v50  ;;  %6445 = vmatmul.mubr.bf16.vlgmr.msra.gmra.mrb[8].mxu1 %v9351_v50  ;;  %v8033_v3 = vcombine.high %v1467_v56, %v1474_v57  ;;  %v8030_v14 = vcombine.low %v1466_v29, %v1473_v38 }
 0x319   : > { %6290 = vmatpush1.bf16.msra.mxu0 %v7952_v1  ;;  %6454 = vmatpush1.bf16.msra.mxu1 %v7954_v2  ;;  %v8019_v1 = vcombine.low %v1453_v47, %v1460_v48  ;;  %v8031_v2 = vcombine.high %v1466_v29, %v1473_v38  ;;  %v824_v48 = vld [vmem:[%s9209_s14 + $0x8cc] sm:$0xff] }
 0x31a   : > { %6291 = vmatprep.subr.bf16.mxu0 %v7966_v11  ;;  %6455 = vmatprep.subr.bf16.mxu1 %v7968_v12  ;;  %v1488_v11 = vunpack.c.h.s8.bf16 %v796_v61  ;;  %v800_v12 = vld [vmem:[%s9209_s14 + $0x830] sm:$0xff]  ;;  %v1536_v38 = vunpack.c.l.s8.bf16 %v824_v48 }
 0x31b   : > { %6321 = vmatprep.mubr.bf16.mxu0 %v9356_v62  ;;  %6485 = vmatprep.mubr.bf16.mxu1 %v9356_v62 }
 0x31c   : > { %v8046_v23 = vcombine.high %v1481_v40, %v1488_v11 }
 0x31d   : > { %6292 = vmatpush1.bf16.msra.mxu0 %v7965_v17  ;;  %6456 = vmatpush1.bf16.msra.mxu1 %v7967_v18  ;;  %v8032_v17 = vcombine.low %v1467_v56, %v1474_v57  ;;  %v1494_v18 = vunpack.c.l.s8.bf16 %v800_v12  ;;  %v1543_v56 = vunpack.c.l.s8.bf16 %v828_v49  ;;  %v1537_v57 = vunpack.c.h.s8.bf16 %v824_v48  ;;  %v868_v48 = vld [vmem:[%s9209_s14 + $0x9ea] sm:$0xff] }
 0x31e   : > { %6293 = vmatprep.subr.bf16.mxu0 %v7979_v19  ;;  %6457 = vmatprep.subr.bf16.mxu1 %v7981_v20  ;;  %v1501_v19 = vunpack.c.l.s8.bf16 %v804_v13  ;;  %v1495_v20 = vunpack.c.h.s8.bf16 %v800_v12  ;;  %v844_v12 = vld [vmem:[%s9209_s14 + $0x94e] sm:$0xff] }
 0x31f   : > { %v8096_v9 = vcombine.high %v1536_v38, %v1543_v56  ;;  %v8095_v13 = vcombine.low %v1536_v38, %v1543_v56  ;;  %v1614_v38 = vunpack.c.h.s8.bf16 %v868_v48 }
 0x320   : > { %v8059_v30 = vcombine.high %v1495_v20, %v1502_v21  ;;  %v8056_v34 = vcombine.low %v1494_v18, %v1501_v19 }
 0x321   : > { %6294 = vmatpush1.bf16.msra.mxu0 %v7978_v27  ;;  %6458 = vmatpush1.bf16.msra.mxu1 %v7980_v28  ;;  %v8045_v27 = vcombine.low %v1481_v40, %v1488_v11  ;;  %v8057_v28 = vcombine.high %v1494_v18, %v1501_v19  ;;  %v840_v11 = vld [vmem:[%s9209_s14 + $0x934] sm:$0xff] }
 0x322   : > { %6295 = vmatprep.subr.bf16.mxu0 %v7992_v35  ;;  %6459 = vmatprep.subr.bf16.mxu1 %v7994_v36  ;;  %v1516_v35 = vunpack.c.h.s8.bf16 %v812_v25  ;;  %v816_v36 = vld [vmem:[%s9209_s14 + $0x898] sm:$0xff]  ;;  %v1564_v19 = vunpack.c.l.s8.bf16 %v840_v11 }
 0x324   : > { %v8072_v47 = vcombine.high %v1509_v33, %v1516_v35 }
 0x325   : > { %6296 = vmatpush1.bf16.msra.mxu0 %v7991_v39  ;;  %6460 = vmatpush1.bf16.msra.mxu1 %v7993_v41  ;;  %v8058_v39 = vcombine.low %v1495_v20, %v1502_v21  ;;  %v1522_v41 = vunpack.c.l.s8.bf16 %v816_v36  ;;  %v1571_v20 = vunpack.c.l.s8.bf16 %v844_v12  ;;  %v1565_v21 = vunpack.c.h.s8.bf16 %v840_v11  ;;  %v884_v11 = vld [vmem:[%s9209_s14 + $0xa52] sm:$0xff] }
 0x326   : > { %6297 = vmatprep.subr.bf16.mxu0 %v8005_v43  ;;  %6461 = vmatprep.subr.bf16.mxu1 %v8007_v44  ;;  %v1529_v43 = vunpack.c.l.s8.bf16 %v820_v37  ;;  %v1523_v44 = vunpack.c.h.s8.bf16 %v816_v36  ;;  %v860_v36 = vld [vmem:[%s9209_s14 + $0x9b6] sm:$0xff] }
 0x327   : > { %v8122_v32 = vcombine.high %v1564_v19, %v1571_v20  ;;  %v8121_v37 = vcombine.low %v1564_v19, %v1571_v20  ;;  %v1642_v19 = vunpack.c.h.s8.bf16 %v884_v11 }
 0x328   : > { %v8085_v29 = vcombine.high %v1523_v44, %v1530_v45  ;;  %v8082_v61 = vcombine.low %v1522_v41, %v1529_v43 }
 0x329   : > { %6298 = vmatpush1.bf16.msra.mxu0 %v8004_v53  ;;  %6462 = vmatpush1.bf16.msra.mxu1 %v8006_v54  ;;  %v8071_v53 = vcombine.low %v1509_v33, %v1516_v35  ;;  %v8083_v54 = vcombine.high %v1522_v41, %v1529_v43  ;;  %v856_v35 = vld [vmem:[%s9209_s14 + $0x99c] sm:$0xff] }
 0x32a   : > { %6299 = vmatprep.subr.bf16.mxu0 %v8018_v58  ;;  %6463 = vmatprep.subr.bf16.mxu1 %v8020_v59  ;;  %v1544_v58 = vunpack.c.h.s8.bf16 %v828_v49  ;;  %v832_v59 = vld [vmem:[%s9209_s14 + $0x900] sm:$0xff]  ;;  %v1592_v43 = vunpack.c.l.s8.bf16 %v856_v35 }
 0x32c   : > { %v8098_v40 = vcombine.high %v1537_v57, %v1544_v58 }
 0x32d   : > { %6300 = vmatpush1.bf16.msra.mxu0 %v8017_v0  ;;  %6464 = vmatpush1.bf16.msra.mxu1 %v8019_v1  ;;  %v8084_v0 = vcombine.low %v1523_v44, %v1530_v45  ;;  %v1550_v1 = vunpack.c.l.s8.bf16 %v832_v59  ;;  %v1599_v44 = vunpack.c.l.s8.bf16 %v860_v36  ;;  %v1593_v45 = vunpack.c.h.s8.bf16 %v856_v35  ;;  %v900_v35 = vld [vmem:[%s9209_s14 + $0xaba] sm:$0xff] }
 0x32e   : > { %6301 = vmatprep.subr.bf16.mxu0 %v8031_v2  ;;  %6465 = vmatprep.subr.bf16.mxu1 %v8033_v3  ;;  %v1557_v2 = vunpack.c.l.s8.bf16 %v836_v60  ;;  %v1551_v3 = vunpack.c.h.s8.bf16 %v832_v59  ;;  %v876_v59 = vld [vmem:[%s9209_s14 + $0xa1e] sm:$0xff] }
 0x32f   : > { %v8148_v56 = vcombine.high %v1592_v43, %v1599_v44  ;;  %v8147_v60 = vcombine.low %v1592_v43, %v1599_v44  ;;  %v1670_v43 = vunpack.c.h.s8.bf16 %v900_v35 }
 0x330   : > { %v8111_v18 = vcombine.high %v1551_v3, %v1558_v8  ;;  %v8108_v25 = vcombine.low %v1550_v1, %v1557_v2 }
 0x331   : > { %6302 = vmatpush1.bf16.msra.mxu0 %v8030_v14  ;;  %6466 = vmatpush1.bf16.msra.mxu1 %v8032_v17  ;;  %v8097_v14 = vcombine.low %v1537_v57, %v1544_v58  ;;  %v8109_v17 = vcombine.high %v1550_v1, %v1557_v2  ;;  %v872_v58 = vld [vmem:[%s9209_s14 + $0xa04] sm:$0xff] }
 0x332   : > { %6303 = vmatprep.subr.bf16.mxu0 %v8044_v22  ;;  %6467 = vmatprep.subr.bf16.mxu1 %v8046_v23  ;;  %v1572_v22 = vunpack.c.h.s8.bf16 %v844_v12  ;;  %v848_v23 = vld [vmem:[%s9209_s14 + $0x968] sm:$0xff]  ;;  %v1620_v2 = vunpack.c.l.s8.bf16 %v872_v58 }
 0x334   : > { %v8124_v33 = vcombine.high %v1565_v21, %v1572_v22 }
 0x335   : > { %6304 = vmatpush1.bf16.msra.mxu0 %v8043_v26  ;;  %6468 = vmatpush1.bf16.msra.mxu1 %v8045_v27  ;;  %v8110_v26 = vcombine.low %v1551_v3, %v1558_v8  ;;  %v1578_v27 = vunpack.c.l.s8.bf16 %v848_v23  ;;  %v1627_v3 = vunpack.c.l.s8.bf16 %v876_v59  ;;  %v1621_v8 = vunpack.c.h.s8.bf16 %v872_v58  ;;  %v916_v58 = vld [vmem:[%s9209_s14 + $0xb22] sm:$0xff] }
 0x336   : > { %6305 = vmatprep.subr.bf16.mxu0 %v8057_v28  ;;  %6469 = vmatprep.subr.bf16.mxu1 %v8059_v30  ;;  %v1585_v28 = vunpack.c.l.s8.bf16 %v852_v24  ;;  %v1579_v30 = vunpack.c.h.s8.bf16 %v848_v23  ;;  %v892_v23 = vld [vmem:[%s9209_s14 + $0xa86] sm:$0xff] }
 0x337   : > { %v8174_v20 = vcombine.high %v1620_v2, %v1627_v3  ;;  %v8173_v24 = vcombine.low %v1620_v2, %v1627_v3  ;;  %v1698_v2 = vunpack.c.h.s8.bf16 %v916_v58 }
 0x338   : > { %v8137_v41 = vcombine.high %v1579_v30, %v1586_v31  ;;  %v8134_v49 = vcombine.low %v1578_v27, %v1585_v28 }
 0x339   : > { %6306 = vmatpush1.bf16.msra.mxu0 %v8056_v34  ;;  %6470 = vmatpush1.bf16.msra.mxu1 %v8058_v39  ;;  %v8123_v34 = vcombine.low %v1565_v21, %v1572_v22  ;;  %v8135_v39 = vcombine.high %v1578_v27, %v1585_v28  ;;  %v888_v22 = vld [vmem:[%s9209_s14 + $0xa6c] sm:$0xff] }
 0x33a   : > { %6307 = vmatprep.subr.bf16.mxu0 %v8070_v46  ;;  %6471 = vmatprep.subr.bf16.mxu1 %v8072_v47  ;;  %v1600_v46 = vunpack.c.h.s8.bf16 %v860_v36  ;;  %v864_v47 = vld [vmem:[%s9209_s14 + $0x9d0] sm:$0xff]  ;;  %v1648_v28 = vunpack.c.l.s8.bf16 %v888_v22 }
 0x33c   : > { %v8150_v57 = vcombine.high %v1593_v45, %v1600_v46 }
 0x33d   : > { %6308 = vmatpush1.bf16.msra.mxu0 %v8069_v52  ;;  %6472 = vmatpush1.bf16.msra.mxu1 %v8071_v53  ;;  %v8136_v52 = vcombine.low %v1579_v30, %v1586_v31  ;;  %v1606_v53 = vunpack.c.l.s8.bf16 %v864_v47  ;;  %v1655_v30 = vunpack.c.l.s8.bf16 %v892_v23  ;;  %v1649_v31 = vunpack.c.h.s8.bf16 %v888_v22 }
 0x33e   : > { %6309 = vmatprep.subr.bf16.mxu0 %v8083_v54  ;;  %6473 = vmatprep.subr.bf16.mxu1 %v8085_v29  ;;  %v1613_v54 = vunpack.c.l.s8.bf16 %v868_v48  ;;  %v1607_v29 = vunpack.c.h.s8.bf16 %v864_v47  ;;  %v908_v47 = vld [vmem:[%s9209_s14 + $0xaee] sm:$0xff] }
 0x33f   : > { %v8200_v44 = vcombine.high %v1648_v28, %v1655_v30  ;;  %v8199_v48 = vcombine.low %v1648_v28, %v1655_v30 }
 0x340   : > { %v8163_v1 = vcombine.high %v1607_v29, %v1614_v38  ;;  %v8160_v12 = vcombine.low %v1606_v53, %v1613_v54 }
 0x341   : > { %6310 = vmatpush1.bf16.msra.mxu0 %v8082_v61  ;;  %6474 = vmatpush1.bf16.msra.mxu1 %v8084_v0  ;;  %v8149_v61 = vcombine.low %v1593_v45, %v1600_v46  ;;  %v8161_v0 = vcombine.high %v1606_v53, %v1613_v54  ;;  %v904_v46 = vld [vmem:[%s9209_s14 + $0xad4] sm:$0xff] }
 0x342   : > { %6311 = vmatprep.subr.bf16.mxu0 %v8096_v9  ;;  %6475 = vmatprep.subr.bf16.mxu1 %v8098_v40  ;;  %v1628_v9 = vunpack.c.h.s8.bf16 %v876_v59  ;;  %v880_v40 = vld [vmem:[%s9209_s14 + $0xa38] sm:$0xff]  ;;  %v1676_v54 = vunpack.c.l.s8.bf16 %v904_v46 }
 0x344   : > { %v8176_v21 = vcombine.high %v1621_v8, %v1628_v9 }
 0x345   : > { %6312 = vmatpush1.bf16.msra.mxu0 %v8095_v13  ;;  %6476 = vmatpush1.bf16.msra.mxu1 %v8097_v14  ;;  %v8162_v13 = vcombine.low %v1607_v29, %v1614_v38  ;;  %v1634_v14 = vunpack.c.l.s8.bf16 %v880_v40  ;;  %v1683_v29 = vunpack.c.l.s8.bf16 %v908_v47  ;;  %v1677_v38 = vunpack.c.h.s8.bf16 %v904_v46 }
 0x346   : > { %6313 = vmatprep.subr.bf16.mxu0 %v8109_v17  ;;  %6477 = vmatprep.subr.bf16.mxu1 %v8111_v18  ;;  %v1641_v17 = vunpack.c.l.s8.bf16 %v884_v11  ;;  %v1635_v18 = vunpack.c.h.s8.bf16 %v880_v40  ;;  %v924_v40 = vld [vmem:[%s9209_s14 + $0xb56] sm:$0xff] }
 0x347   : > { %v8226_v3 = vcombine.high %v1676_v54, %v1683_v29  ;;  %v928_v11 = vld [vmem:[%s9209_s14 + $0xb70] sm:$0x55] }
 0x348   : > { %v8189_v27 = vcombine.high %v1635_v18, %v1642_v19  ;;  %v8186_v36 = vcombine.low %v1634_v14, %v1641_v17  ;;  %v1718_v22 = vunpack.c.l.s8.bf16 %v928_v11 }
 0x349   : > { %6314 = vmatpush1.bf16.msra.mxu0 %v8108_v25  ;;  %6478 = vmatpush1.bf16.msra.mxu1 %v8110_v26  ;;  %v8175_v25 = vcombine.low %v1621_v8, %v1628_v9  ;;  %v8187_v26 = vcombine.high %v1634_v14, %v1641_v17  ;;  %v920_v9 = vld [vmem:[%s9209_s14 + $0xb3c] sm:$0xff] }
 0x34a   : > { %6315 = vmatprep.subr.bf16.mxu0 %v8122_v32  ;;  %6479 = vmatprep.subr.bf16.mxu1 %v8124_v33  ;;  %v1656_v32 = vunpack.c.h.s8.bf16 %v892_v23  ;;  %v896_v33 = vld [vmem:[%s9209_s14 + $0xaa0] sm:$0xff]  ;;  %v1719_v23 = vunpack.c.h.s8.bf16 %v928_v11  ;;  %v489_v11 = vld [vmem:[%s9209_s14 + $0x4c] sm:$0x3] }
 0x34c   : > { %v8202_v45 = vcombine.high %v1649_v31, %v1656_v32 }
 0x34d   : > { %6316 = vmatpush1.bf16.msra.mxu0 %v8121_v37  ;;  %6480 = vmatpush1.bf16.msra.mxu1 %v8123_v34  ;;  %v8188_v37 = vcombine.low %v1635_v18, %v1642_v19  ;;  %v1662_v34 = vunpack.c.l.s8.bf16 %v896_v33  ;;  %v1704_v18 = vunpack.c.l.s8.bf16 %v920_v9  ;;  %v1711_v19 = vunpack.c.l.s8.bf16 %v924_v40 }
 0x34e   : > { %6317 = vmatprep.subr.bf16.mxu0 %v8135_v39  ;;  %6481 = vmatprep.subr.bf16.mxu1 %v8137_v41  ;;  %v1669_v39 = vunpack.c.l.s8.bf16 %v900_v35  ;;  %v1663_v41 = vunpack.c.h.s8.bf16 %v896_v33  ;;  %v545_v35 = vld [vmem:[%s9209_s14 + $0x1b8] sm:$0x3] }
 0x34f   : > { %v8252_v33 = vcombine.high %v1704_v18, %v1711_v19  ;;  %v8251_v46 = vcombine.low %v1704_v18, %v1711_v19  ;;  %v621_v18 = vld [vmem:[%s9209_s14 + $0x3a6] sm:$0x3]  ;;  %v561_v19 = vld [vmem:[%s9209_s14 + $0x220] sm:$0x3] }
 0x350   : > { %v8215_v53 = vcombine.high %v1663_v41, %v1670_v43  ;;  %v8212_v59 = vcombine.low %v1662_v34, %v1669_v39 }
 0x351   : > { %6318 = vmatpush1.bf16.msra.mxu0 %v8134_v49  ;;  %6482 = vmatpush1.bf16.msra.mxu1 %v8136_v52  ;;  %v8201_v49 = vcombine.low %v1649_v31, %v1656_v32  ;;  %v8213_v52 = vcombine.high %v1662_v34, %v1669_v39 }
 0x352   : > { %6319 = vmatprep.subr.bf16.mxu0 %v8148_v56  ;;  %6483 = vmatprep.subr.bf16.mxu1 %v8150_v57  ;;  %v1684_v56 = vunpack.c.h.s8.bf16 %v908_v47  ;;  %v912_v57 = vld [vmem:[%s9209_s14 + $0xb08] sm:$0xff] }
 0x354   : > { %v8228_v8 = vcombine.high %v1677_v38, %v1684_v56 }
 0x355   : > { %6320 = vmatpush1.bf16.msra.mxu0 %v8147_v60  ;;  %6484 = vmatpush1.bf16.msra.mxu1 %v8149_v61  ;;  %v8214_v60 = vcombine.low %v1663_v41, %v1670_v43  ;;  %v1690_v61 = vunpack.c.l.s8.bf16 %v912_v57  ;;  %v8264_v41 = vcombine.low %v1718_v22, %v1718_v22  ;;  %v8266_v43 = vcombine.low %v1719_v23, %v1719_v23 }
 0x356   : > { %6330 = vmatprep.subr.bf16.mxu0 %v8161_v0  ;;  %6494 = vmatprep.subr.bf16.mxu1 %v8163_v1  ;;  %v1697_v0 = vunpack.c.l.s8.bf16 %v916_v58  ;;  %v1691_v1 = vunpack.c.h.s8.bf16 %v912_v57  ;;  %v8265_v57 = vcombine.high %v1718_v22, %v1718_v22  ;;  %v8267_v58 = vcombine.high %v1719_v23, %v1719_v23 }
 0x358   : > { %6322 = vmatmul.mubr.bf16.vlgmr.msra.gmra.mrb[8].mxu0 %v9394_v42  ;;  %6486 = vmatmul.mubr.bf16.vlgmr.msra.gmra.mrb[8].mxu1 %v9394_v42  ;;  %v8239_v14 = vcombine.high %v1690_v61, %v1697_v0  ;;  %v8241_v17 = vcombine.high %v1691_v1, %v1698_v2  ;;  %v8238_v31 = vcombine.low %v1690_v61, %v1697_v0  ;;  %v553_v61 = vld [vmem:[%s9209_s14 + $0x1ec] sm:$0x3]  ;;  %v557_v0 = vld [vmem:[%s9209_s14 + $0x206] sm:$0x3] }
 0x359   : > { %6331 = vmatpush1.bf16.msra.mxu0 %v8160_v12  ;;  %6495 = vmatpush1.bf16.msra.mxu1 %v8162_v13  ;;  %v8225_v12 = vcombine.low %v1676_v54, %v1683_v29  ;;  %v8227_v13 = vcombine.low %v1677_v38, %v1684_v56  ;;  %v8240_v32 = vcombine.low %v1691_v1, %v1698_v2  ;;  %v485_v29 = vld [vmem:[%s9209_s14 + $0x32] sm:$0x3]  ;;  %v609_v38 = vld [vmem:[%s9209_s14 + $0x358] sm:$0x3]  ;;  %v681_v1 = vld [vmem:[%s9209_s14 + $0x52c] sm:$0x3] }
 0x35a   : > { %6332 = vmatprep.subr.bf16.mxu0 %v8174_v20  ;;  %6496 = vmatprep.subr.bf16.mxu1 %v8176_v21  ;;  %v1705_v20 = vunpack.c.h.s8.bf16 %v920_v9  ;;  %v1712_v21 = vunpack.c.h.s8.bf16 %v924_v40  ;;  %v613_v56 = vld [vmem:[%s9209_s14 + $0x372] sm:$0x3]  ;;  %v685_v2 = vld [vmem:[%s9209_s14 + $0x546] sm:$0x3]  ;;  %v1160_v9 = vunpack.c.l.s8.bf16 %v609_v38  ;;  %v1286_v22 = vunpack.c.l.s8.bf16 %v681_v1  ;;  %v697_v38 = vld [vmem:[%s9209_s14 + $0x594] sm:$0x3] }
 0x35b   : > { %8278 = vmatprep.mubr.msk.bf16.mxu0 %vm5507_vm0, %v9400_v55  ;;  %8280 = vmatprep.mubr.msk.bf16.mxu1 %vm5507_vm0, %v9400_v55  ;;  %v1167_v40 = vunpack.c.l.s8.bf16 %v613_v56  ;;  %v1293_v23 = vunpack.c.l.s8.bf16 %v685_v2  ;;  %v701_v56 = vld [vmem:[%s9209_s14 + $0x5ae] sm:$0x3] }
 0x35c   : > { %v8254_v39 = vcombine.high %v1705_v20, %v1712_v21  ;;  %v8253_v47 = vcombine.low %v1705_v20, %v1712_v21  ;;  %v1062_v20 = vunpack.c.l.s8.bf16 %v553_v61  ;;  %v1069_v21 = vunpack.c.l.s8.bf16 %v557_v0  ;;  %v505_v61 = vld [vmem:[%s9209_s14 + $0xb4] sm:$0x3]  ;;  %v509_v0 = vld [vmem:[%s9209_s14 + $0xce] sm:$0x3] }
 0x35d   : > { %6333 = vmatpush1.bf16.msra.mxu0 %v8173_v24  ;;  %6497 = vmatpush1.bf16.msra.mxu1 %v8175_v25 }
 0x35e   : > { %6334 = vmatprep.subr.bf16.mxu0 %v8187_v26  ;;  %6498 = vmatprep.subr.bf16.mxu1 %v8189_v27 }
 0x361   : > { %6335 = vmatpush1.bf16.msra.mxu0 %v8186_v36  ;;  %6499 = vmatpush1.bf16.msra.mxu1 %v8188_v37  ;;  %v549_v36 = vld [vmem:[%s9209_s14 + $0x1d2] sm:$0x3] }
 0x362   : > { %6336 = vmatprep.subr.bf16.mxu0 %v8200_v44  ;;  %6500 = vmatprep.subr.bf16.mxu1 %v8202_v45  ;;  %v673_v44 = vld [vmem:[%s9209_s14 + $0x4f8] sm:$0x3]  ;;  %v677_v45 = vld [vmem:[%s9209_s14 + $0x512] sm:$0x3] }
 0x363   : > { %v1279_v54 = vunpack.c.l.s8.bf16 %v677_v45 }
 0x365   : > { %6337 = vmatpush1.bf16.msra.mxu0 %v8199_v48  ;;  %6501 = vmatpush1.bf16.msra.mxu1 %v8201_v49  ;;  %v481_v48 = vld [vmem:[%s9209_s14 + $0x18] sm:$0x3]  ;;  %v1048_v49 = vunpack.c.l.s8.bf16 %v545_v35 }
 0x366   : > { %6338 = vmatprep.subr.bf16.mxu0 %v8213_v52  ;;  %6502 = vmatprep.subr.bf16.mxu1 %v8215_v53  ;;  %v1055_v52 = vunpack.c.l.s8.bf16 %v549_v36  ;;  %v1272_v53 = vunpack.c.l.s8.bf16 %v673_v44  ;;  %v7748_v36 = vcombine.low %v1160_v9, %v1167_v40  ;;  %v637_v9 = vld [vmem:[%s9209_s14 + $0x40e] sm:$0x3]  ;;  %v577_v40 = vld [vmem:[%s9209_s14 + $0x288] sm:$0x3] }
 0x369   : > { %6339 = vmatpush1.bf16.msra.mxu0 %v8212_v59  ;;  %6503 = vmatpush1.bf16.msra.mxu1 %v8214_v60  ;;  %v5537_v59 = vsel %vm5511_vm1, %v8264_v41, 0  ;;  %v5543_v60 = vsel %vm5511_vm1, %v8266_v43, 0  ;;  %v1076_v41 = vunpack.c.l.s8.bf16 %v561_v19  ;;  %v709_v19 = vld [vmem:[%s9209_s14 + $0x5e2] sm:$0x3] }
 0x36a   : > { %6340 = vmatprep.subr.bf16.mxu0 %v8226_v3  ;;  %6504 = vmatprep.subr.bf16.mxu1 %v8228_v8  ;;  %v936_v3 = vunpack.c.l.s8.bf16 %v481_v48  ;;  %v943_v8 = vunpack.c.l.s8.bf16 %v485_v29  ;;  %v629_v48 = vld [vmem:[%s9209_s14 + $0x3da] sm:$0x3]  ;;  %v573_v29 = vld [vmem:[%s9209_s14 + $0x26e] sm:$0x3] }
 0x36b   : > { %v9699_v24 = vpop.f32.mrb[4].mxu0  ;;  %v9701_v25 = vpop.f32.mrb[4].mxu1 }
 0x36c   : > { %v9703_v26 = vpop.f32.mrb[5].mxu0  ;;  %v9705_v27 = vpop.f32.mrb[5].mxu1  ;;  %v7540_v35 = vcombine.low %v936_v3, %v943_v8  ;;  %v633_v8 = vld [vmem:[%s9209_s14 + $0x3f4] sm:$0x3] }
 0x36d   : > { %v6040_v28 = vpop.f32.mrb[6].mxu0  ;;  %v6204_v30 = vpop.f32.mrb[6].mxu1  ;;  %6341 = vmatpush1.bf16.msra.mxu0 %v8225_v12  ;;  %6505 = vmatpush1.bf16.msra.mxu1 %v8227_v13  ;;  %v493_v12 = vld [vmem:[%s9209_s14 + $0x66] sm:$0x3]  ;;  %v7644_v13 = vcombine.low %v1048_v49, %v1055_v52  ;;  %v7657_v49 = vcombine.low %v1062_v20, %v1069_v21  ;;  %v7865_v52 = vcombine.low %v1286_v22, %v1293_v23  ;;  %v978_v20 = vunpack.c.l.s8.bf16 %v505_v61 }
 0x36e   : > { %v6041_v37 = vpop.f32.mrb[7].mxu0  ;;  %v6205_v34 = vpop.f32.mrb[7].mxu1  ;;  %6342 = vmatprep.subr.bf16.mxu0 %v8239_v14  ;;  %6506 = vmatprep.subr.bf16.mxu1 %v8241_v17  ;;  %v7852_v14 = vcombine.low %v1272_v53, %v1279_v54  ;;  %v617_v17 = vld [vmem:[%s9209_s14 + $0x38c] sm:$0x3]  ;;  %v565_v28 = vld [vmem:[%s9209_s14 + $0x23a] sm:$0x3]  ;;  %v985_v21 = vunpack.c.l.s8.bf16 %v509_v0 }
 0x36f   : > { %v689_v30 = vld [vmem:[%s9209_s14 + $0x560] sm:$0x3]  ;;  %v1174_v37 = vunpack.c.l.s8.bf16 %v617_v17  ;;  %v1181_v34 = vunpack.c.l.s8.bf16 %v621_v18  ;;  %v1083_v43 = vunpack.c.l.s8.bf16 %v565_v28  ;;  %v569_v53 = vld [vmem:[%s9209_s14 + $0x254] sm:$0x3]  ;;  %v581_v17 = vld [vmem:[%s9209_s14 + $0x2a2] sm:$0x3]  ;;  %v1202_v28 = vunpack.c.l.s8.bf16 %v633_v8 }
 0x370   : > { %v1300_v44 = vunpack.c.l.s8.bf16 %v689_v30  ;;  %v705_v18 = vld [vmem:[%s9209_s14 + $0x5c8] sm:$0x3]  ;;  %v1209_v30 = vunpack.c.l.s8.bf16 %v637_v9  ;;  %v725_v8 = vld [vmem:[%s9209_s14 + $0x64a] sm:$0x3] }
 0x371   : > { %6343 = vmatpush1.bf16.msra.mxu0 %v8238_v31  ;;  %6507 = vmatpush1.bf16.msra.mxu1 %v8240_v32  ;;  %v693_v31 = vld [vmem:[%s9209_s14 + $0x57a] sm:$0x3]  ;;  %v950_v32 = vunpack.c.l.s8.bf16 %v489_v11  ;;  %v7761_v1 = vcombine.low %v1174_v37, %v1181_v34  ;;  %v7670_v2 = vcombine.low %v1076_v41, %v1083_v43  ;;  %v1090_v11 = vunpack.c.l.s8.bf16 %v569_v53  ;;  %v517_v37 = vld [vmem:[%s9209_s14 + $0x102] sm:$0x3]  ;;  %v585_v41 = vld [vmem:[%s9209_s14 + $0x2bc] sm:$0x3] }
 0x372   : > { %6344 = vmatprep.subr.bf16.mxu0 %v8252_v33  ;;  %6508 = vmatprep.subr.bf16.mxu1 %v8254_v39  ;;  %v957_v33 = vunpack.c.l.s8.bf16 %v493_v12  ;;  %v497_v39 = vld [vmem:[%s9209_s14 + $0x80] sm:$0x3]  ;;  %v1307_v45 = vunpack.c.l.s8.bf16 %v693_v31  ;;  %v1097_v12 = vunpack.c.l.s8.bf16 %v573_v29  ;;  %v513_v31 = vld [vmem:[%s9209_s14 + $0xe8] sm:$0x3]  ;;  %v7579_v43 = vcombine.low %v978_v20, %v985_v21  ;;  %v521_v53 = vld [vmem:[%s9209_s14 + $0x11c] sm:$0x3] }
 0x373   : > { %v7787_v29 = vcombine.low %v1202_v28, %v1209_v30  ;;  %v1006_v9 = vunpack.c.l.s8.bf16 %v521_v53  ;;  %v1363_v21 = vunpack.c.l.s8.bf16 %v725_v8  ;;  %v661_v28 = vld [vmem:[%s9209_s14 + $0x4aa] sm:$0x3]  ;;  %v665_v53 = vld [vmem:[%s9209_s14 + $0x4c4] sm:$0x3] }
 0x374   : > { %v7553_v54 = vcombine.low %v950_v32, %v957_v33  ;;  %v7878_v3 = vcombine.low %v1300_v44, %v1307_v45  ;;  %v1104_v32 = vunpack.c.l.s8.bf16 %v577_v40  ;;  %v1111_v33 = vunpack.c.l.s8.bf16 %v581_v17  ;;  %v589_v44 = vld [vmem:[%s9209_s14 + $0x2d6] sm:$0x3]  ;;  %v713_v45 = vld [vmem:[%s9209_s14 + $0x5fc] sm:$0x3]  ;;  %v529_v17 = vld [vmem:[%s9209_s14 + $0x150] sm:$0x3] }
 0x375   : > { %6345 = vmatpush1.bf16.msra.mxu0 %v8251_v46  ;;  %6509 = vmatpush1.bf16.msra.mxu1 %v8253_v47  ;;  %v501_v46 = vld [vmem:[%s9209_s14 + $0x9a] sm:$0x3]  ;;  %v625_v47 = vld [vmem:[%s9209_s14 + $0x3c0] sm:$0x3]  ;;  %v7683_v34 = vcombine.low %v1090_v11, %v1097_v12  ;;  %v1125_v61 = vunpack.c.l.s8.bf16 %v589_v44  ;;  %v1342_v0 = vunpack.c.l.s8.bf16 %v713_v45  ;;  %v537_v45 = vld [vmem:[%s9209_s14 + $0x184] sm:$0x3] }
 0x376   : > { %8277 = vmatprep.subr.msk.bf16.mxu0 %vm5511_vm1, %v8265_v57  ;;  %8279 = vmatprep.subr.msk.bf16.mxu1 %vm5511_vm1, %v8267_v58  ;;  %v964_v57 = vunpack.c.l.s8.bf16 %v497_v39  ;;  %v971_v58 = vunpack.c.l.s8.bf16 %v501_v46  ;;  %v717_v46 = vld [vmem:[%s9209_s14 + $0x616] sm:$0x3] }
 0x378   : > { %v7566_v22 = vcombine.low %v964_v57, %v971_v58  ;;  %v649_v57 = vld [vmem:[%s9209_s14 + $0x45c] sm:$0x3]  ;;  %v653_v58 = vld [vmem:[%s9209_s14 + $0x476] sm:$0x3] }
 0x379   : > { %6347 = vmatpush1.bf16.msra.mxu0 %v5537_v59  ;;  %6511 = vmatpush1.bf16.msra.mxu1 %v5543_v60  ;;  %v1188_v59 = vunpack.c.l.s8.bf16 %v625_v47  ;;  %v1195_v60 = vunpack.c.l.s8.bf16 %v629_v48  ;;  %v992_v47 = vunpack.c.l.s8.bf16 %v513_v31  ;;  %v999_v48 = vunpack.c.l.s8.bf16 %v517_v37  ;;  %v733_v37 = vld [vmem:[%s9209_s14 + $0x67e] sm:$0x3] }
 0x37a   : > { %8287 = vmatprep.subr.bf16.mxu0 %v7644_v13  ;;  %8309 = vmatprep.subr.bf16.mxu1 %v7852_v14  ;;  %v1314_v13 = vunpack.c.l.s8.bf16 %v697_v38  ;;  %v1321_v14 = vunpack.c.l.s8.bf16 %v701_v56  ;;  %v7696_v38 = vcombine.low %v1104_v32, %v1111_v33  ;;  %v601_v32 = vld [vmem:[%s9209_s14 + $0x324] sm:$0x3] }
 0x37b   : > { %v7774_v23 = vcombine.low %v1188_v59, %v1195_v60  ;;  %v593_v59 = vld [vmem:[%s9209_s14 + $0x2f0] sm:$0x3]  ;;  %v1118_v60 = vunpack.c.l.s8.bf16 %v585_v41  ;;  %v7592_v11 = vcombine.low %v992_v47, %v999_v48 }
 0x37c   : > { %6363 = vmatmul.mubr.bf16.vlgmr.msra.gmra.mrb[8].mxu0 %v9429_v15  ;;  %6527 = vmatmul.mubr.bf16.vlgmr.msra.gmra.mrb[8].mxu1 %v9429_v15  ;;  %v7891_v39 = vcombine.low %v1314_v13, %v1321_v14  ;;  %v1230_v13 = vunpack.c.l.s8.bf16 %v649_v57  ;;  %v1237_v14 = vunpack.c.l.s8.bf16 %v653_v58  ;;  %v737_v58 = vld [vmem:[%s9209_s14 + $0x698] sm:$0x3] }
 0x37d   : > { %8288 = vmatpush3.bf16.msra.mxu0 %v7540_v35  ;;  %8310 = vmatpush3.bf16.msra.mxu1 %v7748_v36  ;;  %v1328_v35 = vunpack.c.l.s8.bf16 %v705_v18  ;;  %v1335_v36 = vunpack.c.l.s8.bf16 %v709_v19  ;;  %v1132_v18 = vunpack.c.l.s8.bf16 %v593_v59  ;;  %v7709_v30 = vcombine.low %v1118_v60, %v1125_v61 }
 0x37e   : > { %8289 = vmatprep.subr.bf16.mxu0 %v7657_v49  ;;  %8311 = vmatprep.subr.bf16.mxu1 %v7865_v52  ;;  %v7813_v41 = vcombine.low %v1230_v13, %v1237_v14  ;;  %v1034_v59 = vunpack.c.l.s8.bf16 %v537_v45  ;;  %v1258_v61 = vunpack.c.l.s8.bf16 %v665_v53  ;;  %v813_v13 = vld [vmem:[%s9209_s14 + $0x886] sm:$0x3]  ;;  %v1384_v14 = vunpack.c.l.s8.bf16 %v737_v58  ;;  %v881_v45 = vld [vmem:[%s9209_s14 + $0xa40] sm:$0x3]  ;;  %v825_v53 = vld [vmem:[%s9209_s14 + $0x8d4] sm:$0x3] }
 0x37f   : > { %6567 = vmatprep.mubr.bf16.mxu0 %v9280_v51  ;;  %6607 = vmatprep.mubr.bf16.mxu1 %v9306_v10  ;;  %v641_v51 = vld [vmem:[%s9209_s14 + $0x428] sm:$0x3]  ;;  %v645_v10 = vld [vmem:[%s9209_s14 + $0x442] sm:$0x3]  ;;  %v7904_v56 = vcombine.low %v1328_v35, %v1335_v36  ;;  %v605_v35 = vld [vmem:[%s9209_s14 + $0x33e] sm:$0x3] }
 0x380   : > { %v1216_v49 = vunpack.c.l.s8.bf16 %v641_v51  ;;  %v1223_v52 = vunpack.c.l.s8.bf16 %v645_v10  ;;  %v729_v36 = vld [vmem:[%s9209_s14 + $0x664] sm:$0x3]  ;;  %v1020_v51 = vunpack.c.l.s8.bf16 %v529_v17  ;;  %v1153_v47 = vunpack.c.l.s8.bf16 %v605_v35  ;;  %v817_v35 = vld [vmem:[%s9209_s14 + $0x8a0] sm:$0x3] }
 0x381   : > { %8290 = vmatpush3.bf16.msra.mxu0 %v7553_v54  ;;  %8312 = vmatpush3.bf16.msra.mxu1 %v7761_v1  ;;  %v525_v54 = vld [vmem:[%s9209_s14 + $0x136] sm:$0x3]  ;;  %v1349_v1 = vunpack.c.l.s8.bf16 %v717_v46  ;;  %v1146_v46 = vunpack.c.l.s8.bf16 %v601_v32  ;;  %v1370_v48 = vunpack.c.l.s8.bf16 %v729_v36  ;;  %v873_v32 = vld [vmem:[%s9209_s14 + $0xa0c] sm:$0x3]  ;;  %v821_v36 = vld [vmem:[%s9209_s14 + $0x8ba] sm:$0x3] }
 0x382   : > { %8291 = vmatprep.subr.bf16.mxu0 %v7670_v2  ;;  %8313 = vmatprep.subr.bf16.mxu1 %v7878_v3  ;;  %v597_v2 = vld [vmem:[%s9209_s14 + $0x30a] sm:$0x3]  ;;  %v721_v3 = vld [vmem:[%s9209_s14 + $0x630] sm:$0x3]  ;;  %v1013_v40 = vunpack.c.l.s8.bf16 %v525_v54  ;;  %v7800_v12 = vcombine.low %v1216_v49, %v1223_v52  ;;  %v1377_v49 = vunpack.c.l.s8.bf16 %v733_v37  ;;  %v541_v52 = vld [vmem:[%s9209_s14 + $0x19e] sm:$0x3] }
 0x383   : > { %v1139_v19 = vunpack.c.l.s8.bf16 %v597_v2  ;;  %v1356_v20 = vunpack.c.l.s8.bf16 %v721_v3  ;;  %v7917_v31 = vcombine.low %v1342_v0, %v1349_v1  ;;  %v669_v54 = vld [vmem:[%s9209_s14 + $0x4de] sm:$0x3]  ;;  %v1041_v60 = vunpack.c.l.s8.bf16 %v541_v52  ;;  %v741_v1 = vld [vmem:[%s9209_s14 + $0x6b2] sm:$0x3]  ;;  %v865_v2 = vld [vmem:[%s9209_s14 + $0x9d8] sm:$0x3] }
 0x384   : > { %v7605_v33 = vcombine.low %v1006_v9, %v1013_v40  ;;  %v1265_v0 = vunpack.c.l.s8.bf16 %v669_v54  ;;  %v869_v3 = vld [vmem:[%s9209_s14 + $0x9f2] sm:$0x3]  ;;  %v7735_v8 = vcombine.low %v1146_v46, %v1153_v47  ;;  %v7943_v9 = vcombine.low %v1370_v48, %v1377_v49  ;;  %v885_v46 = vld [vmem:[%s9209_s14 + $0xa5a] sm:$0x3]  ;;  %v829_v54 = vld [vmem:[%s9209_s14 + $0x8ee] sm:$0x3] }
 0x385   : > { %8292 = vmatpush3.bf16.msra.mxu0 %v7566_v22  ;;  %8314 = vmatpush3.bf16.msra.mxu1 %v7774_v23  ;;  %v533_v22 = vld [vmem:[%s9209_s14 + $0x16a] sm:$0x3]  ;;  %v657_v23 = vld [vmem:[%s9209_s14 + $0x490] sm:$0x3]  ;;  %v7930_v44 = vcombine.low %v1356_v20, %v1363_v21  ;;  %v1391_v17 = vunpack.c.l.s8.bf16 %v741_v1  ;;  %v7631_v20 = vcombine.low %v1034_v59, %v1041_v60  ;;  %v8915_v47 = vmov 0  }
 0x386   : > { %8293 = vmatprep.subr.bf16.mxu0 %v7683_v34  ;;  %8315 = vmatprep.subr.bf16.mxu1 %v7891_v39  ;;  %v1027_v10 = vunpack.c.l.s8.bf16 %v533_v22  ;;  %v1244_v34 = vunpack.c.l.s8.bf16 %v657_v23  ;;  %v1251_v39 = vunpack.c.l.s8.bf16 %v661_v28  ;;  %v7839_v21 = vcombine.low %v1258_v61, %v1265_v0  ;;  %v745_v22 = vld [vmem:[%s9209_s14 + $0x6cc] sm:$0x3]  ;;  %v761_v60 = vld [vmem:[%s9209_s14 + $0x734] sm:$0x3]  ;;  %v765_v0 = vld [vmem:[%s9209_s14 + $0x74e] sm:$0x3] }
 0x387   : > { %v7956_v37 = vcombine.low %v1384_v14, %v1391_v17  ;;  %v1524_v49 = vunpack.c.l.s8.bf16 %v817_v35  ;;  %v1531_v52 = vunpack.c.l.s8.bf16 %v821_v36  ;;  %v1538_v61 = vunpack.c.l.s8.bf16 %v825_v53  ;;  %v889_v1 = vld [vmem:[%s9209_s14 + $0xa74] sm:$0x3]  ;;  %v777_v36 = vld [vmem:[%s9209_s14 + $0x79c] sm:$0x3] }
 0x388   : > { %v7826_v57 = vcombine.low %v1244_v34, %v1251_v39  ;;  %v1398_v34 = vunpack.c.l.s8.bf16 %v745_v22  ;;  %v1650_v14 = vunpack.c.l.s8.bf16 %v889_v1  ;;  %v841_v22 = vld [vmem:[%s9209_s14 + $0x93c] sm:$0x3]  ;;  %v1454_v53 = vunpack.c.l.s8.bf16 %v777_v36  ;;  %v861_v1 = vld [vmem:[%s9209_s14 + $0x9be] sm:$0x3] }
 0x389   : > { %8294 = vmatpush3.bf16.msra.mxu0 %v7579_v43  ;;  %8316 = vmatpush3.bf16.msra.mxu1 %v7787_v29  ;;  %v7722_v43 = vcombine.low %v1132_v18, %v1139_v19  ;;  %v801_v29 = vld [vmem:[%s9209_s14 + $0x838] sm:$0x3]  ;;  %v1608_v18 = vunpack.c.l.s8.bf16 %v865_v2  ;;  %v1615_v19 = vunpack.c.l.s8.bf16 %v869_v3  ;;  %v893_v2 = vld [vmem:[%s9209_s14 + $0xa8e] sm:$0x3]  ;;  %v833_v3 = vld [vmem:[%s9209_s14 + $0x908] sm:$0x3] }
 0x38a   : > { %8295 = vmatprep.subr.bf16.mxu0 %v7696_v38  ;;  %8317 = vmatprep.subr.bf16.mxu1 %v7904_v56  ;;  %v805_v38 = vld [vmem:[%s9209_s14 + $0x852] sm:$0x3]  ;;  %v7618_v56 = vcombine.low %v1020_v51, %v1027_v10  ;;  %v1496_v40 = vunpack.c.l.s8.bf16 %v801_v29  ;;  %v753_v10 = vld [vmem:[%s9209_s14 + $0x700] sm:$0x3]  ;;  %v1657_v17 = vunpack.c.l.s8.bf16 %v893_v2 }
 0x38b   : > { %v8164_v51 = vcombine.low %v1608_v18, %v1615_v19  ;;  %v1412_v29 = vunpack.c.l.s8.bf16 %v753_v10  ;;  %v773_v18 = vld [vmem:[%s9209_s14 + $0x782] sm:$0x3]  ;;  %v897_v19 = vld [vmem:[%s9209_s14 + $0xaa8] sm:$0x3] }
 0x38c   : > { %v8203_v35 = vcombine.low %v1650_v14, %v1657_v17 }
 0x38d   : > { %8296 = vmatpush3.bf16.msra.mxu0 %v7592_v11  ;;  %8318 = vmatpush3.bf16.msra.mxu1 %v7800_v12  ;;  %v1503_v11 = vunpack.c.l.s8.bf16 %v805_v38  ;;  %v809_v12 = vld [vmem:[%s9209_s14 + $0x86c] sm:$0x3] }
 0x38e   : > { %8297 = vmatprep.subr.bf16.mxu0 %v7709_v30  ;;  %8319 = vmatprep.subr.bf16.mxu1 %v7917_v31  ;;  %v1510_v28 = vunpack.c.l.s8.bf16 %v809_v12  ;;  %v1517_v30 = vunpack.c.l.s8.bf16 %v813_v13  ;;  %v749_v31 = vld [vmem:[%s9209_s14 + $0x6e6] sm:$0x3]  ;;  %v1426_v12 = vunpack.c.l.s8.bf16 %v761_v60  ;;  %v1433_v13 = vunpack.c.l.s8.bf16 %v765_v0  ;;  %v857_v0 = vld [vmem:[%s9209_s14 + $0x9a4] sm:$0x3] }
 0x38f   : > { %v8060_v23 = vcombine.low %v1496_v40, %v1503_v11  ;;  %v1405_v39 = vunpack.c.l.s8.bf16 %v749_v31  ;;  %v769_v11 = vld [vmem:[%s9209_s14 + $0x768] sm:$0x3]  ;;  %v1664_v31 = vunpack.c.l.s8.bf16 %v897_v19  ;;  %v1594_v17 = vunpack.c.l.s8.bf16 %v857_v0  ;;  %v797_v19 = vld [vmem:[%s9209_s14 + $0x81e] sm:$0x3] }
 0x390   : > { %v8073_v48 = vcombine.low %v1510_v28, %v1517_v30  ;;  %v1440_v28 = vunpack.c.l.s8.bf16 %v769_v11  ;;  %v1447_v30 = vunpack.c.l.s8.bf16 %v773_v18  ;;  %v1601_v18 = vunpack.c.l.s8.bf16 %v861_v1  ;;  %v6885_v1 = vld [vmem:[%s9226_s18 + $0x68] sm:$0xff] }
 0x391   : > { %8298 = vmatpush3.bf16.msra.mxu0 %v7605_v33  ;;  %8320 = vmatpush3.bf16.msra.mxu1 %v7813_v41  ;;  %v877_v33 = vld [vmem:[%s9209_s14 + $0xa26] sm:$0x3]  ;;  %v1622_v41 = vunpack.c.l.s8.bf16 %v873_v32  ;;  %v7969_v58 = vcombine.low %v1398_v34, %v1405_v39  ;;  %v781_v34 = vld [vmem:[%s9209_s14 + $0x7b6] sm:$0x3]  ;;  %v905_v39 = vld [vmem:[%s9209_s14 + $0xadc] sm:$0x3] }
 0x392   : > { %8299 = vmatprep.subr.bf16.mxu0 %v7722_v43  ;;  %8321 = vmatprep.subr.bf16.mxu1 %v7930_v44  ;;  %v1629_v43 = vunpack.c.l.s8.bf16 %v877_v33  ;;  %v757_v44 = vld [vmem:[%s9209_s14 + $0x71a] sm:$0x3]  ;;  %v7995_v33 = vcombine.low %v1426_v12, %v1433_v13  ;;  %v793_v13 = vld [vmem:[%s9209_s14 + $0x804] sm:$0x3]  ;;  %v8151_v36 = vcombine.low %v1594_v17, %v1601_v18  ;;  %v9877_v17 = vsub.s32 0, %v9257_v16 }
 0x393   : > { %v1419_v38 = vunpack.c.l.s8.bf16 %v757_v44  ;;  %v849_v44 = vld [vmem:[%s9209_s14 + $0x970] sm:$0x3]  ;;  %v6951_v18 = vunpack.c.h.s8.bf16 %v6885_v1 }
 0x394   : > { %v8177_v59 = vcombine.low %v1622_v41, %v1629_v43  ;;  %v909_v41 = vld [vmem:[%s9209_s14 + $0xaf6] sm:$0x3]  ;;  %v9825_v43 = vsub.s32 1, %v9257_v16  ;;  %v1580_v60 = vunpack.c.l.s8.bf16 %v849_v44 }
 0x395   : > { %8300 = vmatpush3.bf16.msra.mxu0 %v7618_v56  ;;  %8322 = vmatpush3.bf16.msra.mxu1 %v7826_v57  ;;  %v1636_v56 = vunpack.c.l.s8.bf16 %v881_v45  ;;  %v1643_v57 = vunpack.c.l.s8.bf16 %v885_v46  ;;  %v853_v45 = vld [vmem:[%s9209_s14 + $0x98a] sm:$0x3] }
 0x396   : > { %8301 = vmatprep.subr.bf16.mxu0 %v7735_v8  ;;  %8323 = vmatprep.subr.bf16.mxu1 %v7943_v9  ;;  %v837_v8 = vld [vmem:[%s9209_s14 + $0x922] sm:$0x3]  ;;  %v7982_v9 = vcombine.low %v1412_v29, %v1419_v38  ;;  %v9830_v46 = vld [vmem:[%s9217_s16] sm:$0xff]  ;;  %v1678_v29 = vunpack.c.l.s8.bf16 %v905_v39  ;;  %v1685_v38 = vunpack.c.l.s8.bf16 %v909_v41 }
 0x397   : > { %v8190_v40 = vcombine.low %v1636_v56, %v1643_v57  ;;  %v789_v56 = vld [vmem:[%s9209_s14 + $0x7ea] sm:$0x3]  ;;  %v913_v57 = vld [vmem:[%s9209_s14 + $0xb10] sm:$0x3] }
 0x398   : > { %v8229_v12 = vcombine.low %v1678_v29, %v1685_v38  ;;  %v6880_v38 = vld [vmem:[%s9226_s18 + $0x40] sm:$0xff] }
 0x399   : > { %8302 = vmatpush3.bf16.msra.mxu0 %v7631_v20  ;;  %8324 = vmatpush3.bf16.msra.mxu1 %v7839_v21  ;;  %v901_v20 = vld [vmem:[%s9209_s14 + $0xac2] sm:$0x3]  ;;  %v1559_v21 = vunpack.c.l.s8.bf16 %v837_v8  ;;  %v1692_v8 = vunpack.c.l.s8.bf16 %v913_v57  ;;  %v6877_v57 = vld [vmem:[%s9226_s18 + $0x28] sm:$0xff] }
 0x39a   : > { %8331 = vmatprep.subr.bf16.mxu0 %v8060_v23  ;;  %6655 = vmatprep.subr.bf16.mxu1 %v8915_v47  ;;  %v845_v23 = vld [vmem:[%s9209_s14 + $0x956] sm:$0x3]  ;;  %v1671_v32 = vunpack.c.l.s8.bf16 %v901_v20  ;;  %v921_v20 = vld [vmem:[%s9209_s14 + $0xb44] sm:$0x3] }
 0x39b   : > { %v1573_v10 = vunpack.c.l.s8.bf16 %v845_v23 }
 0x39c   : > { %6568 = vmatmul.mubr.bf16.vlgmr.msra.gmra.mrb[12].mxu0 %v9300_v63  ;;  %6608 = vmatmul.mubr.bf16.vlgmr.msra.gmra.mrb[12].mxu1 %v9351_v50  ;;  %v8086_v63 = vcombine.low %v1524_v49, %v1531_v52  ;;  %v1545_v50 = vunpack.c.l.s8.bf16 %v829_v54  ;;  %v8216_v49 = vcombine.low %v1664_v31, %v1671_v32  ;;  %v785_v52 = vld [vmem:[%s9209_s14 + $0x7d0] sm:$0x3]  ;;  %v1461_v54 = vunpack.c.l.s8.bf16 %v781_v34 }
 0x39d   : > { %8332 = vmatpush3.bf16.msra.mxu0 %v7956_v37  ;;  %6656 = vmatpush1.bf16.msra.mxu1 %v8164_v51  ;;  %v1566_v51 = vunpack.c.l.s8.bf16 %v841_v22  ;;  %v1468_v2 = vunpack.c.l.s8.bf16 %v785_v52  ;;  %v1482_v31 = vunpack.c.l.s8.bf16 %v793_v13  ;;  %v1489_v32 = vunpack.c.l.s8.bf16 %v797_v19  ;;  %v6874_v19 = vld [vmem:[%s9226_s18 + $0x10] sm:$0xff] }
 0x39e   : > { %8333 = vmatprep.subr.bf16.mxu0 %v8073_v48  ;;  %6657 = vmatprep.subr.bf16.mxu1 %v8915_v47  ;;  %v8008_v48 = vcombine.low %v1440_v28, %v1447_v30  ;;  %v8021_v11 = vcombine.low %v1454_v53, %v1461_v54  ;;  %v6884_v53 = vld [vmem:[%s9226_s18 + $0x60] sm:$0xff] }
 0x39f   : > { %6647 = vmatprep.mubr.bf16.mxu0 %v9356_v62  ;;  %8281 = vmatprep.mubr.msk.bf16.mxu1 %vm5507_vm0, %v9400_v55  ;;  %v8099_v62 = vcombine.low %v1538_v61, %v1545_v50  ;;  %v1552_v55 = vunpack.c.l.s8.bf16 %v833_v3  ;;  %v6706_v61 = vrot.slane %v9830_v46, %v9825_v43  ;;  %v9840_v50 = vsub.s32 3, %v9257_v16 }
 0x3a0   : > { %v1475_v3 = vunpack.c.l.s8.bf16 %v789_v56  ;;  %v8047_v39 = vcombine.low %v1482_v31, %v1489_v32  ;;  %v6948_v56 = vunpack.c.l.s8.bf16 %v6884_v53  ;;  %v6949_v0 = vunpack.c.h.s8.bf16 %v6884_v53  ;;  %v6882_v31 = vld [vmem:[%s9226_s18 + $0x50] sm:$0xff]  ;;  %v6879_v32 = vld [vmem:[%s9226_s18 + $0x38] sm:$0xff] }
 0x3a1   : > { %8334 = vmatpush3.bf16.msra.mxu0 %v7969_v58  ;;  %6658 = vmatpush1.bf16.msra.mxu1 %v8177_v59  ;;  %v8112_v37 = vcombine.low %v1552_v55, %v1559_v21  ;;  %v917_v58 = vld [vmem:[%s9209_s14 + $0xb2a] sm:$0x3]  ;;  %v8125_v59 = vcombine.low %v1566_v51, %v1573_v10  ;;  %v6714_v55 = vrot.slane %v9830_v46, %v9840_v50  ;;  %v929_v21 = vld [vmem:[%s9209_s14 + $0xb78] sm:$0x1]  ;;  %v6945_v53 = vunpack.c.h.s8.bf16 %v6882_v31 }
 0x3a2   : > { %8335 = vmatprep.subr.bf16.mxu0 %v8086_v63  ;;  %6659 = vmatprep.subr.bf16.mxu1 %v8915_v47  ;;  %v1587_v63 = vunpack.c.l.s8.bf16 %v853_v45  ;;  %v6765_v22 = vmul.f32 %v6706_v61, %v9560_v6  ;;  %v8034_v28 = vcombine.low %v1468_v2, %v1475_v3  ;;  %v6876_v51 = vld [vmem:[%s9226_s18 + $0x20] sm:$0xff]  ;;  %v6873_v61 = vld [vmem:[%s9226_s18 + $0x8] sm:$0xff] }
 0x3a3   : > { %v6767_v10 = vmul.f32 %v6714_v55, %v9562_v7  ;;  %v6932_v44 = vunpack.c.l.s8.bf16 %v6876_v51  ;;  %v6933_v29 = vunpack.c.h.s8.bf16 %v6876_v51  ;;  %v6926_v3 = vunpack.c.l.s8.bf16 %v6873_v61 }
 0x3a4   : > { %v8138_v14 = vcombine.low %v1580_v60, %v1587_v63  ;;  %v6940_v63 = vunpack.c.l.s8.bf16 %v6880_v38  ;;  %v6927_v13 = vunpack.c.h.s8.bf16 %v6873_v61  ;;  %v9883_v55 = vsub.s32 2, %v9257_v16 }
 0x3a5   : > { %8336 = vmatpush3.bf16.msra.mxu0 %v7982_v9  ;;  %6660 = vmatpush1.bf16.msra.mxu1 %v8190_v40  ;;  %v1699_v9 = vunpack.c.l.s8.bf16 %v917_v58  ;;  %v9845_v40 = vld [vmem:[%s9224_s19] sm:$0xff]  ;;  %v6944_v51 = vunpack.c.l.s8.bf16 %v6882_v31 }
 0x3a6   : > { %8337 = vmatprep.subr.bf16.mxu0 %v8099_v62  ;;  %6661 = vmatprep.subr.bf16.mxu1 %v8915_v47  ;;  %v925_v62 = vld [vmem:[%s9209_s14 + $0xb5e] sm:$0x3]  ;;  %v6788_v23 = vrot.slane %v9845_v40, %v9825_v43  ;;  %v6796_v34 = vrot.slane %v9845_v40, %v9840_v50 }
 0x3a7   : > { %v8242_v30 = vcombine.low %v1692_v8, %v1699_v9  ;;  %v6935_v8 = vunpack.c.h.s8.bf16 %v6877_v57  ;;  %v6950_v9 = vunpack.c.l.s8.bf16 %v6885_v1  ;;  %v6888_v1 = vld [vmem:[%s9226_s18 + $0x80] sm:$0xff] }
 0x3a8   : > { %v6847_v6 = vadd.f32 %v6788_v23, %v6765_v22  ;;  %v6849_v52 = vadd.f32 %v6796_v34, %v6767_v10  ;;  %v6702_v23 = vrot.slane %v9830_v46, %v9877_v17  ;;  %v6784_v10 = vrot.slane %v9845_v40, %v9877_v17 }
 0x3a9   : > { %8338 = vmatpush3.bf16.msra.mxu0 %v7995_v33  ;;  %6662 = vmatpush1.bf16.msra.mxu1 %v8203_v35  ;;  %v1706_v33 = vunpack.c.l.s8.bf16 %v921_v20  ;;  %v1713_v35 = vunpack.c.l.s8.bf16 %v925_v62  ;;  %v6886_v20 = vld [vmem:[%s9226_s18 + $0x70] sm:$0xff]  ;;  %v6721_v62 = vsub.s32 5, %v9257_v16  ;;  %v6938_v34 = vunpack.c.l.s8.bf16 %v6879_v32 }
 0x3aa   : > { %8339 = vmatprep.subr.bf16.mxu0 %v8112_v37  ;;  %6663 = vmatprep.subr.bf16.mxu1 %v8915_v47  ;;  %v1720_v37 = vunpack.c.l.s8.bf16 %v929_v21  ;;  %v6928_v21 = vunpack.c.l.s8.bf16 %v6874_v19 }
 0x3ab   : > { %v8255_v41 = vcombine.low %v1706_v33, %v1713_v35  ;;  %v6722_v33 = vrot.slane %v9830_v46, %v6721_v62  ;;  %v6729_v35 = vsub.s32 7, %v9257_v16 }
 0x3ac   : > { %v8268_v45 = vcombine.low %v1720_v37, %v1720_v37  ;;  %v6929_v37 = vunpack.c.h.s8.bf16 %v6874_v19 }
 0x3ad   : > { %8340 = vmatpush3.bf16.msra.mxu0 %v8008_v48  ;;  %6664 = vmatpush1.bf16.msra.mxu1 %v8216_v49  ;;  %v6872_v48 = vld [vmem:[%s9226_s18] sm:$0xff]  ;;  %v6860_v49 = vmax.f32 %v6847_v6, 0.0  ;;  %v6764_v6 = vmul.f32 %v6702_v23, %v9556_v4  ;;  %v6792_v4 = vrot.slane %v9845_v40, %v9883_v55  ;;  %v6889_v23 = vld [vmem:[%s9226_s18 + $0x88] sm:$0xff] }
 0x3ae   : > { %8341 = vmatprep.subr.bf16.mxu0 %v8125_v59  ;;  %6665 = vmatprep.subr.bf16.mxu1 %v8915_v47  ;;  %v6924_v7 = vunpack.c.l.s8.bf16 %v6872_v48  ;;  %v5549_v54 = vsel %vm5511_vm1, %v8268_v45, 0  ;;  %v6862_v59 = vmax.f32 %v6849_v52, 0.0  ;;  %v6925_v60 = vunpack.c.h.s8.bf16 %v6872_v48 }
 0x3af   : > { %v7029_v58 = vpack.c.bf16 %v6860_v49, %v6860_v49  ;;  %v6769_v45 = vmul.f32 %v6722_v33, %v9703_v26  ;;  %v6804_v48 = vrot.slane %v9845_v40, %v6721_v62  ;;  %v6730_v49 = vrot.slane %v9830_v46, %v6729_v35  ;;  %v6883_v26 = vld [vmem:[%s9226_s18 + $0x58] sm:$0xff] }
 0x3b0   : > { %v7031_v2 = vpack.c.bf16 %v6862_v59, %v6862_v59  ;;  %v6812_v59 = vrot.slane %v9845_v40, %v6729_v35 }
 0x3b1   : > { %8342 = vmatpush3.bf16.msra.mxu0 %v8021_v11  ;;  %6666 = vmatpush1.bf16.msra.mxu1 %v8229_v12  ;;  %v6881_v11 = vld [vmem:[%s9226_s18 + $0x48] sm:$0xff]  ;;  %v6878_v12 = vld [vmem:[%s9226_s18 + $0x30] sm:$0xff] }
 0x3b2   : > { %8343 = vmatprep.subr.bf16.mxu0 %v8138_v14  ;;  %6667 = vmatprep.subr.bf16.mxu1 %v8915_v47  ;;  %v6942_v14 = vunpack.c.l.s8.bf16 %v6881_v11  ;;  %v6943_v22 = vunpack.c.h.s8.bf16 %v6881_v11 }
 0x3b5   : > { %8344 = vmatpush3.bf16.msra.mxu0 %v8034_v28  ;;  %6668 = vmatpush1.bf16.msra.mxu1 %v8242_v30  ;;  %v6937_v28 = vunpack.c.h.s8.bf16 %v6878_v12  ;;  %v6952_v30 = vunpack.c.l.s8.bf16 %v6886_v20 }
 0x3b6   : > { %8345 = vmatprep.subr.bf16.mxu0 %v8151_v36  ;;  %6669 = vmatprep.subr.bf16.mxu1 %v8915_v47  ;;  %v6710_v36 = vrot.slane %v9830_v46, %v9883_v55 }
 0x3b9   : > { %8346 = vmatpush3.bf16.msra.mxu0 %v8047_v39  ;;  %6670 = vmatpush1.bf16.msra.mxu1 %v8255_v41  ;;  %v6953_v39 = vunpack.c.h.s8.bf16 %v6886_v20  ;;  %v6875_v41 = vld [vmem:[%s9226_s18 + $0x18] sm:$0xff]  ;;  %v6957_v20 = vunpack.c.h.s8.bf16 %v6888_v1 }
 0x3ba   : > { %6671 = vmatprep.subr.bf16.mxu1 %v8915_v47  ;;  %8353 = vmatprep.subr.bf16.mxu0 %v6932_v44  ;;  %v6934_v47 = vunpack.c.l.s8.bf16 %v6877_v57  ;;  %v6887_v44 = vld [vmem:[%s9226_s18 + $0x78] sm:$0xff]  ;;  %v6930_v52 = vunpack.c.l.s8.bf16 %v6875_v41  ;;  %v6851_v57 = vadd.f32 %v6804_v48, %v6769_v45  ;;  %v6902_v45 = vld [vmem:[%s9226_s18 + $0xf0] sm:$0xff]  ;;  %v6725_v48 = vsub.s32 6, %v9257_v16 }
 0x3bc   : > { %6648 = vmatmul.mubr.bf16.vlgmr.msra.gmra.mrb[16].mxu0 %v9394_v42  ;;  %v6941_v42 = vunpack.c.h.s8.bf16 %v6880_v38  ;;  %v6954_v38 = vunpack.c.l.s8.bf16 %v6887_v44 }
 0x3bd   : > { %6672 = vmatpush1.bf16.msra.mxu1 %v5549_v54  ;;  %8354 = vmatpush3.bf16.msra.mxu0 %v6924_v7  ;;  %v6846_v7 = vadd.f32 %v6784_v10, %v6764_v6  ;;  %v6766_v54 = vmul.f32 %v6710_v36, %v9558_v5  ;;  %v6955_v5 = vunpack.c.h.s8.bf16 %v6887_v44  ;;  %v6959_v6 = vunpack.c.h.s8.bf16 %v6889_v23  ;;  %v6890_v44 = vld [vmem:[%s9226_s18 + $0x90] sm:$0xff] }
 0x3be   : > { %7073 = vmatprep.mubr.bf16.mxu0 %v7029_v58  ;;  %8355 = vmatprep.subr.bf16.mxu0 %v6933_v29  ;;  %v6939_v29 = vunpack.c.h.s8.bf16 %v6879_v32  ;;  %v6771_v58 = vmul.f32 %v6730_v49, %v9705_v27  ;;  %v6947_v27 = vunpack.c.h.s8.bf16 %v6883_v26  ;;  %v6958_v32 = vunpack.c.l.s8.bf16 %v6889_v23 }
 0x3bf   : > { %8375 = vmatprep.subr.bf16.mxu1 %v6948_v56  ;;  %v6892_v56 = vld [vmem:[%s9226_s18 + $0xa0] sm:$0xff]  ;;  %v6848_v61 = vadd.f32 %v6792_v4, %v6766_v54  ;;  %v6960_v49 = vunpack.c.l.s8.bf16 %v6890_v44  ;;  %v6898_v54 = vld [vmem:[%s9226_s18 + $0xd0] sm:$0xff] }
 0x3c0   : > { %6688 = vmatmul.mubr.bf16.vlgmr.msra.gmra.mrb[16].mxu1 %v9429_v15  ;;  %v6936_v15 = vunpack.c.l.s8.bf16 %v6878_v12  ;;  %v6965_v12 = vunpack.c.h.s8.bf16 %v6892_v56 }
 0x3c1   : > { %8356 = vmatpush3.bf16.msra.mxu0 %v6925_v60  ;;  %8376 = vmatpush3.bf16.msra.mxu1 %v6940_v63  ;;  %v6931_v60 = vunpack.c.h.s8.bf16 %v6875_v41  ;;  %v6946_v63 = vunpack.c.l.s8.bf16 %v6883_v26  ;;  %v6861_v11 = vmax.f32 %v6848_v61, 0.0  ;;  %v6976_v26 = vunpack.c.l.s8.bf16 %v6898_v54 }
 0x3c2   : > { %7113 = vmatprep.mubr.bf16.mxu1 %v7031_v2  ;;  %8357 = vmatprep.subr.bf16.mxu0 %v6934_v47  ;;  %v6859_v47 = vmax.f32 %v6846_v7, 0.0  ;;  %v6864_v2 = vmax.f32 %v6851_v57, 0.0  ;;  %v6984_v7 = vunpack.c.l.s8.bf16 %v6902_v45  ;;  %v6977_v61 = vunpack.c.h.s8.bf16 %v6898_v54 }
 0x3c3   : > { %8377 = vmatprep.subr.bf16.mxu1 %v6949_v0  ;;  %v6964_v0 = vunpack.c.l.s8.bf16 %v6892_v56 }
 0x3c5   : > { %8358 = vmatpush3.bf16.msra.mxu0 %v6926_v3  ;;  %8378 = vmatpush3.bf16.msra.mxu1 %v6941_v42  ;;  %v6853_v3 = vadd.f32 %v6812_v59, %v6771_v58  ;;  %v6900_v42 = vld [vmem:[%s9226_s18 + $0xe0] sm:$0xff]  ;;  %v6985_v59 = vunpack.c.h.s8.bf16 %v6902_v45 }
 0x3c6   : > { %8359 = vmatprep.subr.bf16.mxu0 %v6935_v8  ;;  %8379 = vmatprep.subr.bf16.mxu1 %v6950_v9  ;;  %v6956_v8 = vunpack.c.l.s8.bf16 %v6888_v1  ;;  %v7028_v9 = vpack.c.bf16 %v6859_v47, %v6859_v47  ;;  %v6808_v47 = vrot.slane %v9845_v40, %v6725_v48 }
 0x3c7   : > { %v6866_v19 = vmax.f32 %v6853_v3, 0.0  ;;  %v6908_v3 = vld [vmem:[%s9226_s18 + $0x120] sm:$0xff] }
 0x3c9   : > { %8360 = vmatpush3.bf16.msra.mxu0 %v6927_v13  ;;  %8380 = vmatpush3.bf16.msra.mxu1 %v6942_v14  ;;  %v6896_v13 = vld [vmem:[%s9226_s18 + $0xc0] sm:$0xff]  ;;  %v6980_v14 = vunpack.c.l.s8.bf16 %v6900_v42  ;;  %v7035_v31 = vpack.c.bf16 %v6866_v19, %v6866_v19 }
 0x3ca   : > { %8361 = vmatprep.subr.bf16.mxu0 %v6936_v15  ;;  %8381 = vmatprep.subr.bf16.mxu1 %v6951_v18  ;;  %v6893_v15 = vld [vmem:[%s9226_s18 + $0xa8] sm:$0xff]  ;;  %v7033_v18 = vpack.c.bf16 %v6864_v2, %v6864_v2  ;;  %v6972_v62 = vunpack.c.l.s8.bf16 %v6896_v13  ;;  %v6973_v33 = vunpack.c.h.s8.bf16 %v6896_v13  ;;  %v6899_v2 = vld [vmem:[%s9226_s18 + $0xd8] sm:$0xff] }
 0x3cb   : > { %v6967_v35 = vunpack.c.h.s8.bf16 %v6893_v15  ;;  %v6979_v13 = vunpack.c.h.s8.bf16 %v6899_v2 }
 0x3cd   : > { %8362 = vmatpush3.bf16.msra.mxu0 %v6928_v21  ;;  %8382 = vmatpush3.bf16.msra.mxu1 %v6943_v22  ;;  %v7030_v21 = vpack.c.bf16 %v6861_v11, %v6861_v11  ;;  %v6966_v22 = vunpack.c.l.s8.bf16 %v6893_v15  ;;  %v6904_v11 = vld [vmem:[%s9226_s18 + $0x100] sm:$0xff] }
 0x3ce   : > { %8363 = vmatprep.subr.bf16.mxu0 %v6937_v28  ;;  %8383 = vmatprep.subr.bf16.mxu1 %v6952_v30  ;;  %v6981_v28 = vunpack.c.h.s8.bf16 %v6900_v42  ;;  %v6901_v30 = vld [vmem:[%s9226_s18 + $0xe8] sm:$0xff]  ;;  %v6989_v23 = vunpack.c.h.s8.bf16 %v6904_v11 }
 0x3cf   : > { %v6982_v36 = vunpack.c.l.s8.bf16 %v6901_v30  ;;  %v6983_v41 = vunpack.c.h.s8.bf16 %v6901_v30 }
 0x3d1   : > { %8364 = vmatpush3.bf16.msra.mxu0 %v6929_v37  ;;  %8384 = vmatpush3.bf16.msra.mxu1 %v6944_v51  ;;  %v6897_v37 = vld [vmem:[%s9226_s18 + $0xc8] sm:$0xff]  ;;  %v6894_v51 = vld [vmem:[%s9226_s18 + $0xb0] sm:$0xff] }
 0x3d2   : > { %8365 = vmatprep.subr.bf16.mxu0 %v6938_v34  ;;  %8385 = vmatprep.subr.bf16.mxu1 %v6953_v39  ;;  %v6974_v10 = vunpack.c.l.s8.bf16 %v6897_v37  ;;  %v9917_v34 = vsub.s32 4, %v9257_v16  ;;  %v6968_v39 = vunpack.c.l.s8.bf16 %v6894_v51  ;;  %v6975_v4 = vunpack.c.h.s8.bf16 %v6897_v37 }
 0x3d3   : > { %v6961_v16 = vunpack.c.h.s8.bf16 %v6890_v44 }
 0x3d4   : > { %v6800_v57 = vrot.slane %v9845_v40, %v9917_v34 }
 0x3d5   : > { %8366 = vmatpush3.bf16.msra.mxu0 %v6930_v52  ;;  %8386 = vmatpush3.bf16.msra.mxu1 %v6945_v53  ;;  %v6718_v52 = vrot.slane %v9830_v46, %v9917_v34  ;;  %v6969_v53 = vunpack.c.h.s8.bf16 %v6894_v51  ;;  %v6913_v51 = vld [vmem:[%s9226_s18 + $0x148] sm:$0xff] }
 0x3d6   : > { %8367 = vmatprep.subr.bf16.mxu0 %v6939_v29  ;;  %8387 = vmatprep.subr.bf16.mxu1 %v6954_v38  ;;  %v6895_v29 = vld [vmem:[%s9226_s18 + $0xb8] sm:$0xff]  ;;  %v6726_v38 = vrot.slane %v9830_v46, %v6725_v48  ;;  %v6906_v48 = vld [vmem:[%s9226_s18 + $0x110] sm:$0xff] }
 0x3d7   : > { %v6768_v56 = vmul.f32 %v6718_v52, %v9699_v24  ;;  %v6970_v58 = vunpack.c.l.s8.bf16 %v6895_v29  ;;  %v6992_v52 = vunpack.c.l.s8.bf16 %v6906_v48 }
 0x3d8   : > { %v6770_v24 = vmul.f32 %v6726_v38, %v9701_v25  ;;  %v6996_v25 = vunpack.c.l.s8.bf16 %v6908_v3 }
 0x3d9   : > { %8368 = vmatpush3.bf16.msra.mxu0 %v6931_v60  ;;  %8388 = vmatpush3.bf16.msra.mxu1 %v6946_v63  ;;  %v6891_v60 = vld [vmem:[%s9226_s18 + $0x98] sm:$0xff] }
 0x3da   : > { %8389 = vmatprep.subr.bf16.mxu1 %v6955_v5  ;;  %8397 = vmatprep.subr.bf16.mxu0 %v6964_v0  ;;  %v6903_v63 = vld [vmem:[%s9226_s18 + $0xf8] sm:$0xff]  ;;  %v6962_v46 = vunpack.c.l.s8.bf16 %v6891_v60  ;;  %v6850_v5 = vadd.f32 %v6800_v57, %v6768_v56  ;;  %v6971_v0 = vunpack.c.h.s8.bf16 %v6895_v29  ;;  %v6963_v42 = vunpack.c.h.s8.bf16 %v6891_v60 }
 0x3db   : > { %v6986_v1 = vunpack.c.l.s8.bf16 %v6903_v63  ;;  %v6911_v29 = vld [vmem:[%s9226_s18 + $0x138] sm:$0xff] }
 0x3dc   : > { %7074 = vmatmul.mubr.bf16.vlgmr.msra.gmra.mrb[20].mxu0 %v7028_v9  ;;  %v6863_v40 = vmax.f32 %v6850_v5, 0.0  ;;  %v6987_v9 = vunpack.c.h.s8.bf16 %v6903_v63  ;;  %v7002_v56 = vunpack.c.l.s8.bf16 %v6911_v29  ;;  %v6907_v57 = vld [vmem:[%s9226_s18 + $0x118] sm:$0xff] }
 0x3dd   : > { %8390 = vmatpush3.bf16.msra.mxu1 %v6947_v27  ;;  %8398 = vmatpush3.bf16.msra.mxu0 %v6956_v8  ;;  %v6978_v27 = vunpack.c.l.s8.bf16 %v6899_v2  ;;  %v6852_v8 = vadd.f32 %v6808_v47, %v6770_v24  ;;  %v6994_v60 = vunpack.c.l.s8.bf16 %v6907_v57  ;;  %v6915_v47 = vld [vmem:[%s9226_s18 + $0x158] sm:$0xff]  ;;  %v6995_v5 = vunpack.c.h.s8.bf16 %v6907_v57 }
 0x3de   : > { %7153 = vmatprep.mubr.bf16.mxu0 %v7033_v18  ;;  %8399 = vmatprep.subr.bf16.mxu0 %v6965_v12  ;;  %v6916_v12 = vld [vmem:[%s9226_s18 + $0x160] sm:$0xff]  ;;  %v7032_v15 = vpack.c.bf16 %v6863_v40, %v6863_v40 }
 0x3df   : > { %8419 = vmatprep.subr.bf16.mxu1 %v6980_v14  ;;  %v6988_v14 = vunpack.c.l.s8.bf16 %v6904_v11  ;;  %v6865_v18 = vmax.f32 %v6852_v8, 0.0  ;;  %v7012_v19 = vunpack.c.l.s8.bf16 %v6916_v12  ;;  %v7013_v30 = vunpack.c.h.s8.bf16 %v6916_v12  ;;  %v9953_v2 = vld [vmem:[%s9217_s16 + $0x8] sm:$0x1f] }
 0x3e0   : > { %7114 = vmatmul.mubr.bf16.vlgmr.msra.gmra.mrb[20].mxu1 %v7030_v21  ;;  %v6909_v21 = vld [vmem:[%s9226_s18 + $0x128] sm:$0xff]  ;;  %v6738_v40 = vrot.slane %v9953_v2, %v9825_v43  ;;  %v6746_v8 = vrot.slane %v9953_v2, %v9840_v50 }
 0x3e1   : > { %8400 = vmatpush3.bf16.msra.mxu0 %v6957_v20  ;;  %8420 = vmatpush3.bf16.msra.mxu1 %v6972_v62  ;;  %v6912_v20 = vld [vmem:[%s9226_s18 + $0x140] sm:$0xff]  ;;  %v6997_v62 = vunpack.c.h.s8.bf16 %v6908_v3  ;;  %v9956_v3 = vld [vmem:[%s9224_s19 + $0x8] sm:$0x1f] }
 0x3e2   : > { %7193 = vmatprep.mubr.bf16.mxu1 %v7035_v31  ;;  %8401 = vmatprep.subr.bf16.mxu0 %v6966_v22  ;;  %v7004_v22 = vunpack.c.l.s8.bf16 %v6912_v20  ;;  %v6998_v31 = vunpack.c.l.s8.bf16 %v6909_v21 }
 0x3e3   : > { %8421 = vmatprep.subr.bf16.mxu1 %v6981_v28  ;;  %v7034_v28 = vpack.c.bf16 %v6865_v18, %v6865_v18 }
 0x3e5   : > { %8402 = vmatpush3.bf16.msra.mxu0 %v6958_v32  ;;  %8422 = vmatpush3.bf16.msra.mxu1 %v6973_v33  ;;  %v6905_v32 = vld [vmem:[%s9226_s18 + $0x108] sm:$0xff] }
 0x3e6   : > { %8403 = vmatprep.subr.bf16.mxu0 %v6967_v35  ;;  %8423 = vmatprep.subr.bf16.mxu1 %v6982_v36  ;;  %v6917_v33 = vld [vmem:[%s9226_s18 + $0x168] sm:$0xff]  ;;  %v7005_v35 = vunpack.c.h.s8.bf16 %v6912_v20  ;;  %v6990_v36 = vunpack.c.l.s8.bf16 %v6905_v32 }
 0x3e7   : > { %v7014_v37 = vunpack.c.l.s8.bf16 %v6917_v33  ;;  %v7015_v44 = vunpack.c.h.s8.bf16 %v6917_v33 }
 0x3e9   : > { %8404 = vmatpush3.bf16.msra.mxu0 %v6959_v6  ;;  %8424 = vmatpush3.bf16.msra.mxu1 %v6974_v10  ;;  %v6999_v6 = vunpack.c.h.s8.bf16 %v6909_v21  ;;  %v6910_v10 = vld [vmem:[%s9226_s18 + $0x130] sm:$0xff] }
 0x3ea   : > { %8405 = vmatprep.subr.bf16.mxu0 %v6968_v39  ;;  %8425 = vmatprep.subr.bf16.mxu1 %v6983_v41  ;;  %v7006_v39 = vunpack.c.l.s8.bf16 %v6913_v51  ;;  %v6991_v41 = vunpack.c.h.s8.bf16 %v6905_v32  ;;  %v7000_v45 = vunpack.c.l.s8.bf16 %v6910_v10  ;;  %v7001_v54 = vunpack.c.h.s8.bf16 %v6910_v10 }
 0x3ed   : > { %8406 = vmatpush3.bf16.msra.mxu0 %v6960_v49  ;;  %8426 = vmatpush3.bf16.msra.mxu1 %v6975_v4  ;;  %v6918_v49 = vld [vmem:[%s9226_s18 + $0x170] sm:$0xff]  ;;  %v7007_v4 = vunpack.c.h.s8.bf16 %v6913_v51 }
 0x3ee   : > { %8407 = vmatprep.subr.bf16.mxu0 %v6969_v53  ;;  %8427 = vmatprep.subr.bf16.mxu1 %v6984_v7  ;;  %v7016_v53 = vunpack.c.l.s8.bf16 %v6918_v49  ;;  %v6914_v7 = vld [vmem:[%s9226_s18 + $0x150] sm:$0xff] }
 0x3ef   : > { %v7008_v38 = vunpack.c.l.s8.bf16 %v6914_v7 }
 0x3f1   : > { %8408 = vmatpush3.bf16.msra.mxu0 %v6961_v16  ;;  %8428 = vmatpush3.bf16.msra.mxu1 %v6976_v26  ;;  %v6993_v16 = vunpack.c.h.s8.bf16 %v6906_v48  ;;  %v7017_v26 = vunpack.c.h.s8.bf16 %v6918_v49  ;;  %v6922_v49 = vld [vmem:[%s9226_s18 + $0x190] sm:$0xff] }
 0x3f2   : > { %8409 = vmatprep.subr.bf16.mxu0 %v6970_v58  ;;  %8429 = vmatprep.subr.bf16.mxu1 %v6985_v59  ;;  %v6919_v58 = vld [vmem:[%s9226_s18 + $0x178] sm:$0xff]  ;;  %v7009_v59 = vunpack.c.h.s8.bf16 %v6914_v7 }
 0x3f3   : > { %v7018_v63 = vunpack.c.l.s8.bf16 %v6919_v58  ;;  %v7019_v24 = vunpack.c.h.s8.bf16 %v6919_v58 }
 0x3f5   : > { %8410 = vmatpush3.bf16.msra.mxu0 %v6962_v46  ;;  %8430 = vmatpush3.bf16.msra.mxu1 %v6977_v61  ;;  %v7003_v46 = vunpack.c.h.s8.bf16 %v6911_v29  ;;  %v7010_v61 = vunpack.c.l.s8.bf16 %v6915_v47 }
 0x3f6   : > { %8411 = vmatprep.subr.bf16.mxu0 %v6971_v0  ;;  %8431 = vmatprep.subr.bf16.mxu1 %v6986_v1  ;;  %v7011_v0 = vunpack.c.h.s8.bf16 %v6915_v47  ;;  %v8916_v1 = vmov 0.0  }
 0x3f9   : > { %8412 = vmatpush3.bf16.msra.mxu0 %v6963_v42  ;;  %8432 = vmatpush3.bf16.msra.mxu1 %v6978_v27  ;;  %v6734_v42 = vrot.slane %v9953_v2, %v9877_v17  ;;  %v6742_v27 = vrot.slane %v9953_v2, %v9883_v55 }
 0x3fa   : > { %8433 = vmatprep.subr.bf16.mxu1 %v6987_v9  ;;  %8441 = vmatprep.subr.bf16.mxu0 %v6996_v25  ;;  %v6816_v9 = vrot.slane %v9956_v3, %v9877_v17  ;;  %v6824_v25 = vrot.slane %v9956_v3, %v9883_v55 }
 0x3fc   : > { %7154 = vmatmul.mubr.bf16.vlgmr.msra.gmra.mrb[24].mxu0 %v7032_v15 }
 0x3fd   : > { %8434 = vmatpush3.bf16.msra.mxu1 %v6979_v13  ;;  %8442 = vmatpush3.bf16.msra.mxu0 %v6988_v14  ;;  %v6820_v13 = vrot.slane %v9956_v3, %v9825_v43  ;;  %v6828_v14 = vrot.slane %v9956_v3, %v9840_v50 }
 0x3fe   : > { %8463 = vmatprep.subr.bf16.mxu1 %v7012_v19  ;;  %8443 = vmatprep.subr.bf16.mxu0 %v6997_v62 }
 0x400   : > { %7194 = vmatmul.mubr.bf16.vlgmr.msra.gmra.mrb[24].mxu1 %v7034_v28 }
 0x401   : > { %8464 = vmatpush3.bf16.msra.mxu1 %v7004_v22  ;;  %8444 = vmatpush3.bf16.msra.mxu0 %v6989_v23 }
 0x402   : > { %8465 = vmatprep.subr.bf16.mxu1 %v7013_v30  ;;  %8445 = vmatprep.subr.bf16.mxu0 %v6998_v31 }
 0x405   : > { %8466 = vmatpush3.bf16.msra.mxu1 %v7005_v35  ;;  %8446 = vmatpush3.bf16.msra.mxu0 %v6990_v36  ;;  %v6920_v35 = vld [vmem:[%s9226_s18 + $0x180] sm:$0xff] }
 0x406   : > { %8467 = vmatprep.subr.bf16.mxu1 %v7014_v37  ;;  %8447 = vmatprep.subr.bf16.mxu0 %v6999_v6  ;;  %v7020_v6 = vunpack.c.l.s8.bf16 %v6920_v35 }
 0x409   : > { %8468 = vmatpush3.bf16.msra.mxu1 %v7006_v39  ;;  %8448 = vmatpush3.bf16.msra.mxu0 %v6991_v41  ;;  %v7021_v41 = vunpack.c.h.s8.bf16 %v6920_v35 }
 0x40a   : > { %8469 = vmatprep.subr.bf16.mxu1 %v7015_v44  ;;  %8449 = vmatprep.subr.bf16.mxu0 %v7000_v45  ;;  %v6921_v44 = vld [vmem:[%s9226_s18 + $0x188] sm:$0xff] }
 0x40b   : > { %v7022_v45 = vunpack.c.l.s8.bf16 %v6921_v44  ;;  %v7023_v48 = vunpack.c.h.s8.bf16 %v6921_v44 }
 0x40d   : > { %8470 = vmatpush3.bf16.msra.mxu1 %v7007_v4  ;;  %8450 = vmatpush3.bf16.msra.mxu0 %v6992_v52  ;;  %v7024_v4 = vunpack.c.l.s8.bf16 %v6922_v49  ;;  %v7025_v52 = vunpack.c.h.s8.bf16 %v6922_v49 }
 0x40e   : > { %8471 = vmatprep.subr.bf16.mxu1 %v7016_v53  ;;  %8451 = vmatprep.subr.bf16.mxu0 %v7001_v54  ;;  %v6923_v53 = vld [vmem:[%s9226_s18 + $0x198] sm:$0xff] }
 0x40f   : > { %v7026_v29 = vunpack.c.l.s8.bf16 %v6923_v53  ;;  %v7027_v47 = vunpack.c.h.s8.bf16 %v6923_v53 }
 0x411   : > { %8472 = vmatpush3.bf16.msra.mxu1 %v7008_v38  ;;  %8452 = vmatpush3.bf16.msra.mxu0 %v6993_v16 }
 0x412   : > { %8473 = vmatprep.subr.bf16.mxu1 %v7017_v26  ;;  %8453 = vmatprep.subr.bf16.mxu0 %v7002_v56 }
 0x415   : > { %8474 = vmatpush3.bf16.msra.mxu1 %v7009_v59  ;;  %8454 = vmatpush3.bf16.msra.mxu0 %v6994_v60 }
 0x416   : > { %8475 = vmatprep.subr.bf16.mxu1 %v7018_v63  ;;  %8455 = vmatprep.subr.bf16.mxu0 %v7003_v46 }
 0x419   : > { %8476 = vmatpush3.bf16.msra.mxu1 %v7010_v61  ;;  %8456 = vmatpush3.bf16.msra.mxu0 %v6995_v5 }
 0x41a   : > { %8477 = vmatprep.subr.bf16.mxu1 %v7019_v24  ;;  %8494 = vmatprep.subr.bf16.mxu0 %v8916_v1 }
 0x41d   : > { %8478 = vmatpush3.bf16.msra.mxu1 %v7011_v0 }
 0x44f   : > { %v6364_v11 = vpop.f32.mrb[8].mxu0  ;;  %v6528_v12 = vpop.f32.mrb[8].mxu1 }
 0x450   : > { %v6772_v15 = vmul.f32 %v6734_v42, %v6364_v11  ;;  %v6774_v18 = vmul.f32 %v6742_v27, %v6528_v12  ;;  %v6366_v19 = vpop.f32.mrb[9].mxu0  ;;  %v6530_v20 = vpop.f32.mrb[9].mxu1 }
 0x451   : > { %v6773_v62 = vmul.f32 %v6738_v40, %v6366_v19  ;;  %v6775_v21 = vmul.f32 %v6746_v8, %v6530_v20  ;;  %v6368_v22 = vpop.f32.mrb[10].mxu0  ;;  %v6532_v17 = vpop.f32.mrb[10].mxu1  ;;  %v6750_v40 = vrot.slane %v9953_v2, %v9917_v34 }
 0x452   : > { %v6854_v23 = vadd.f32 %v6816_v9, %v6772_v15  ;;  %v6856_v28 = vadd.f32 %v6824_v25, %v6774_v18  ;;  %v6369_v55 = vpop.f32.mrb[11].mxu0  ;;  %v6533_v30 = vpop.f32.mrb[11].mxu1  ;;  %v6832_v25 = vrot.slane %v9956_v3, %v9917_v34 }
 0x453   : > { %v6855_v31 = vadd.f32 %v6820_v13, %v6773_v62  ;;  %v6857_v32 = vadd.f32 %v6828_v14, %v6775_v21 }
 0x454   : > { %v6867_v33 = vmax.f32 %v6854_v23, 0.0  ;;  %v6869_v43 = vmax.f32 %v6856_v28, 0.0 }
 0x455   : > { %v6868_v36 = vmax.f32 %v6855_v31, 0.0  ;;  %v6870_v50 = vmax.f32 %v6857_v32, 0.0 }
 0x456   : > { %v7036_v10 = vpack.c.bf16 %v6867_v33, %v6867_v33  ;;  %v7038_v39 = vpack.c.bf16 %v6869_v43, %v6869_v43 }
 0x457   : > { %v7037_v37 = vpack.c.bf16 %v6868_v36, %v6868_v36  ;;  %v7039_v51 = vpack.c.bf16 %v6870_v50, %v6870_v50 }
 0x459   : > { %7233 = vmatprep.mubr.bf16.mxu0 %v7037_v37  ;;  %7273 = vmatprep.mubr.bf16.mxu1 %v7039_v51 }
 0x45a   : > { %7234 = vmatmul.mubr.bf16.vlgmr.msra.gmra.mrb[28].mxu0 %v7036_v10  ;;  %7274 = vmatmul.mubr.bf16.vlgmr.msra.gmra.mrb[28].mxu1 %v7038_v39 }
 0x45b   : > { %8495 = vmatpush3.bf16.msra.mxu0 %v7020_v6  ;;  %8510 = vmatprep.mubr.msk.bf16.mxu0 %vm8917_vm2, %v8916_v1 }
 0x45c   : > { %8496 = vmatprep.subr.bf16.mxu0 %v8916_v1 }
 0x45f   : > { %8497 = vmatpush3.bf16.msra.mxu0 %v7021_v41 }
 0x460   : > { %8498 = vmatprep.subr.bf16.mxu0 %v8916_v1 }
 0x463   : > { %8499 = vmatpush3.bf16.msra.mxu0 %v7022_v45 }
 0x464   : > { %8500 = vmatprep.subr.bf16.mxu0 %v8916_v1 }
 0x467   : > { %8501 = vmatpush3.bf16.msra.mxu0 %v7023_v48 }
 0x468   : > { %8502 = vmatprep.subr.bf16.mxu0 %v8916_v1 }
 0x46b   : > { %8503 = vmatpush3.bf16.msra.mxu0 %v7024_v4 }
 0x46c   : > { %8504 = vmatprep.subr.bf16.mxu0 %v8916_v1 }
 0x46f   : > { %v8303_v7 = vpop.f32.mrb[12].mxu0  ;;  %v8325_v54 = vpop.f32.mrb[12].mxu1  ;;  %8505 = vmatpush3.bf16.msra.mxu0 %v7025_v52 }
 0x470   : > { %v8304_v38 = vpop.f32.mrb[13].mxu0  ;;  %v8326_v16 = vpop.f32.mrb[13].mxu1  ;;  %8506 = vmatprep.subr.bf16.mxu0 %v8916_v1 }
 0x471   : > { %v8305_v26 = vadd.f32 %v8304_v38, %v8303_v7  ;;  %v8327_v56 = vadd.f32 %v8326_v16, %v8325_v54  ;;  %v8306_v57 = vpop.f32.mrb[14].mxu0  ;;  %v8328_v58 = vpop.f32.mrb[14].mxu1 }
 0x472   : > { %v8307_v59 = vpop.f32.mrb[15].mxu0  ;;  %v8329_v60 = vpop.f32.mrb[15].mxu1 }
 0x473   : > { %v6610_v63 = vadd.f32 %v8327_v56, %v8305_v26  ;;  %8507 = vmatpush3.bf16.msra.mxu0 %v7026_v29  ;;  %v8282_v29 = vld [vmem:[%s410_s27] ss:$0 sm:$0xff] }
 0x474   : > { %8508 = vmatprep.subr.bf16.mxu0 %v8916_v1  ;;  %v8283_v26 = vld [vmem:[%s418_s9] ss:$0 sm:$0xff] }
 0x477   : > { %8509 = vmatpush3.bf16.msra.mxu0 %v7027_v47 }
 0x48f   : > { %v8347_v46 = vpop.f32.mrb[16].mxu0 }
 0x490   : > { %v8348_v61 = vpop.f32.mrb[17].mxu0 }
 0x491   : > { %v8349_v5 = vadd.f32 %v8348_v61, %v8347_v46  ;;  %v8350_v24 = vpop.f32.mrb[18].mxu0  ;;  %v7345_v46 = vstv %s7344_s11 }
 0x492   : > { %v8351_v0 = vpop.f32.mrb[19].mxu0  ;;  %vm7346_vm3 = vcmp.eq.s32.totalorder %v7345_v46, 1 }
 0x493   : > { %v6650_v42 = vadd.f32 %v8349_v5, %v6610_v63  ;;  %v6689_v27 = vpop.f32.mrb[16].mxu1 }
 0x494   : > { %v6691_v8 = vpop.f32.mrb[17].mxu1 }
 0x495   : > { %v6690_v9 = vadd.f32 %v6689_v27, %v6650_v42  ;;  %v6692_v11 = vpop.f32.mrb[18].mxu1 }
 0x496   : > { %v6693_v12 = vpop.f32.mrb[19].mxu1 }
 0x497   : > { %v6776_v13 = vmul.f32 %v6750_v40, %v6690_v9 }
 0x499   : > { %v6858_v1 = vadd.f32 %v6832_v25, %v6776_v13 }
 0x49b   : > { %v6871_v14 = vmax.f32 %v6858_v1, 0.0 }
 0x49d   : > { %v7040_v15 = vpack.c.bf16 %v6871_v14, %v6871_v14 }
 0x49f   : > { %8511 = vmatmul.mubr.bf16.vlgmr.msra.gmra.mrb[32].mxu0 %v7040_v15 }
 0x4af   : > { %v8369_v18 = vpop.f32.mrb[20].mxu0 }
 0x4b0   : > { %v8370_v19 = vpop.f32.mrb[21].mxu0 }
 0x4b1   : > { %v8371_v20 = vadd.f32 %v8370_v19, %v8369_v18  ;;  %v8372_v62 = vpop.f32.mrb[22].mxu0 }
 0x4b2   : > { %v8373_v21 = vpop.f32.mrb[23].mxu0 }
 0x4b3   : > { %v8391_v22 = vpop.f32.mrb[20].mxu1 }
 0x4b4   : > { %v8392_v17 = vpop.f32.mrb[21].mxu1 }
 0x4b5   : > { %v8393_v2 = vadd.f32 %v8392_v17, %v8391_v22  ;;  %v8394_v23 = vpop.f32.mrb[22].mxu1 }
 0x4b6   : > { %v8395_v28 = vpop.f32.mrb[23].mxu1 }
 0x4b7   : > { %v7116_v55 = vadd.f32 %v8393_v2, %v8371_v20 }
 0x4cf   : > { %v8413_v30 = vpop.f32.mrb[24].mxu0 }
 0x4d0   : > { %v8414_v34 = vpop.f32.mrb[25].mxu0 }
 0x4d1   : > { %v8415_v3 = vadd.f32 %v8414_v34, %v8413_v30  ;;  %v8416_v31 = vpop.f32.mrb[26].mxu0 }
 0x4d2   : > { %v8417_v32 = vpop.f32.mrb[27].mxu0 }
 0x4d3   : > { %v7156_v33 = vadd.f32 %v8415_v3, %v7116_v55  ;;  %v8435_v43 = vpop.f32.mrb[24].mxu1 }
 0x4d4   : > { %v8436_v35 = vpop.f32.mrb[25].mxu1 }
 0x4d5   : > { %v8437_v36 = vadd.f32 %v8436_v35, %v8435_v43  ;;  %v8438_v50 = vpop.f32.mrb[26].mxu1 }
 0x4d6   : > { %v8439_v37 = vpop.f32.mrb[27].mxu1 }
 0x4d7   : > { %v7196_v51 = vadd.f32 %v8437_v36, %v7156_v33 }
 0x52d   : > { %v8457_v6 = vpop.f32.mrb[28].mxu0  ;;  %v8479_v10 = vpop.f32.mrb[28].mxu1 }
 0x52e   : > { %v8458_v39 = vpop.f32.mrb[29].mxu0  ;;  %v8480_v41 = vpop.f32.mrb[29].mxu1 }
 0x52f   : > { %v8459_v44 = vadd.f32 %v8458_v39, %v8457_v6  ;;  %v8481_v45 = vadd.f32 %v8480_v41, %v8479_v10  ;;  %v8460_v48 = vpop.f32.mrb[30].mxu0  ;;  %v8482_v49 = vpop.f32.mrb[30].mxu1 }
 0x530   : > { %v8461_v4 = vpop.f32.mrb[31].mxu0  ;;  %v8483_v52 = vpop.f32.mrb[31].mxu1 }
 0x531   : > { %v7236_v53 = vadd.f32 %v8459_v44, %v7196_v51 }
 0x533   : > { %v7276_v7 = vadd.f32 %v8481_v45, %v7236_v53 }
 0x572   : > { %v7315_v54 = vpop.f32.mrb[32].mxu0 }
 0x573   : > { %v7316_v38 = vadd.f32 %v7315_v54, %v7276_v7  ;;  %v8512_v16 = vpop.f32.mrb[33].mxu0 }
 0x574   : > { %v7318_v56 = vpop.f32.mrb[34].mxu0 }
 0x575   : > { %v7328_v57 = vmul.f32 %v8282_v29, %v7316_v38  ;;  %v8513_v58 = vpop.f32.mrb[35].mxu0 }
 0x577   : > { %v7336_v59 = vadd.f32 %v8283_v26, %v7328_v57 }
 0x579   : > { %v8284_v60 = vmul.f32 -1.442695, %v7336_v59 }
 0x57b   : > { %8670 = vpow2.f32 %v8284_v60 }
 0x57c   : > { %8672 = vtanh.f32 %v7336_v59 }
 0x585   : > { %v8671_v63 = vpop.eup %8670 }
 0x586   : > { %v7340_v47 = vadd.f32 1.0, %v8671_v63  ;;  %v8673_v61 = vpop.eup %8672 }
 0x588   : > { %8674 = vrcp.f32 %v7340_v47 }
 0x592   : > { %v8675_v5 = vpop.eup %8674 }
 0x593   : > { %v7347_v24 = vsel %vm7346_vm3, %v8675_v5, %v8673_v61 }
 0x594   : > { %7348 = vst [vmem:[%s474_s23] sm:$0x3] %v7347_v24 }
 0x595 PF: > { %s10046_s13 = sld [smem:[#allocation16_spill]]  ;;  %p26_p10 = scmp.ge.s32.totalorder %s8980_s29, 4  }
 0x596   : > { %s10047_s24 = smov %s8894_s25  ;;  %s10048_s25 = smov %s8898_s26 }
 0x597   : > { %s10050_s27 = smov %s8980_s29  ;;  %28 = sbr.rel (!%p26_p10) target bundleno = 12 (0xc), region = 149 }
 0x59b   : > { %s10049_s26 = smov %s10046_s13 }
 0x59e   :  { %7368 = vsyncpa [#allocation3], 1 }
 0x59f   :  { %7370 = vsyncpa [#allocation3 + $0x1], 1 }
 0x5a0   :  { %7371 = vsyncpa [#allocation5], 1 }
 0x5a1   :  { %7373 = vsyncpa [#allocation5 + $0x1], 1 }
 0x5a2   :  { %7374 = vsyncpa [#allocation8], 1 }
 0x5a3   :  { %7376 = vsyncpa [#allocation8 + $0x1], 1 }
 0x5a4   :  { %7377 = vsyncpa [#allocation11], 1 }
 0x5a5   :  { %7379 = vsyncpa [#allocation11 + $0x1], 1 }

</bundles_post_ra>
